<compile_context>
chip_gen: v7x
topology: tpu7x:2x2x1
jax: 0.10.0
libtpu: 0.0.40
codegen_flags: <defaults>
</compile_context>

<pallas_src>
import numpy as np
import jax
import jax.numpy as jnp
from jax.experimental import pallas as pl
from jax.experimental.pallas import tpu as pltpu

H_IMG = W_IMG = 64
LEVELS = 3
GROUP_SIZE = 4                      # images per grid step -> 4*64 = 256 lanes
BIG = np.float32(1e30)              # soft-threshold sentinel (zeroes a band)

# ---------------- db4 analysis filters (pywt dec_lo), hardcoded -------------
_DB4_DEC_LO = np.array([
    -0.010597401784997278, 0.032883011666982945, 0.030841381835986965,
    -0.18703481171888114, -0.02798376941698385, 0.6308807679295904,
    0.7148465705525415, 0.23037781330885523], dtype=np.float64)


def _qmf(h):
    L = len(h)
    return np.array([((-1.0) ** k) * h[L - 1 - k] for k in range(L)], np.float64)


def dwt_matrix(n, h):
    """Orthogonal 1-D periodized DWT matrix W = [L; H], shape (n, n), float64."""
    g = _qmf(h)
    Wm = np.zeros((n, n), dtype=np.float64)
    half = n // 2
    for k in range(half):
        for m in range(len(h)):
            j = (2 * k + m) % n
            Wm[k, j] += h[m]
            Wm[half + k, j] += g[m]
    assert np.allclose(Wm @ Wm.T, np.eye(n), atol=1e-10)
    return Wm


# ---------------- matmul / soft-threshold helpers ----------------------------
def _mm(a, b):     # a @ b
    return jax.lax.dot_general(a, b, (((1,), (0,)), ((), ())),
                               preferred_element_type=jnp.float32)


def _mm_tn(a, b):  # a.T @ b
    return jax.lax.dot_general(a, b, (((0,), (0,)), ((), ())),
                               preferred_element_type=jnp.float32)


def _soft(v, lam):
    # relu(v - lam) - relu(-v - lam)
    return jnp.maximum(v - lam, 0.0) - jnp.maximum(-v - lam, 0.0)


# ---------------- single fused forward kernel --------------------------------
def fused_forward_kernel(ab_ref, x_ref,
                         acat_ref, d1_ref, d2_ref, d3_ref,
                         t1_ref, t2_ref, t3_ref, ecat_ref,
                         o_ref):
    """Whole unfolded-ISTA forward for one slab of GROUP_SIZE images.

    x_ref / o_ref: (64, gs*64) lane-dense slab (images along lanes).
    ab_ref       : (num_steps, 2) SMEM table of per-layer affine (a, b).
    Constants (VMEM resident for the whole call):
      acat: vstack(A1,A2,A3)            (112, 64)
      d_i : kron(I_gs, A_i^T)           (gs*64, gs*n_i)  (level 3 lane-padded)
      t_i : lane-tiled thresholds
      ecat: vstack(kron(I,A1),kron(I,A2),kron(I,A3)pad)  (gs*128, gs*64)
    """
    n1, n2 = H_IMG, H_IMG // 2
    x = x_ref[...]
    num_steps = ab_ref.shape[0]

    def prox(xin):
        A = acat_ref[...]                                   # (112, 64)
        L = _mm(A, xin)                                     # (112, gs*64)
        # per-level subbands  Y_i = A_i X A_i^T  (wide, per image)
        Y1 = _mm(L[:n1, :], d1_ref[...])                    # (64, gs*64)
        Y2 = _mm(L[n1:n1 + n2, :], d2_ref[...])             # (32, gs*32)
        Y3 = _mm(L[n1 + n2:, :], d3_ref[...])               # (16, gs*32) padded
        # soft-threshold + left reconstruction  A_i^T Yn_i
        R1 = _mm_tn(A[:n1, :], _soft(Y1, t1_ref[...]))      # (64, gs*64)
        R2 = _mm_tn(A[n1:n1 + n2, :], _soft(Y2, t2_ref[...]))  # (64, gs*32)
        R3 = _mm_tn(A[n1 + n2:, :], _soft(Y3, t3_ref[...]))    # (64, gs*32)
        # fused right reconstruction: one K = gs*128 matmul
        Rcat = jnp.concatenate([R1, R2, R3], axis=1)        # (64, gs*128)
        return _mm(Rcat, ecat_ref[...])                     # (64, gs*64)

    cur = x                                                 # layers[0](x, x) == x
    for s in range(num_steps):                              # unrolled layer loop
        a = ab_ref[s, 0]
        b = ab_ref[s, 1]
        cur = prox(a * cur + b * x)                         # fused affine + prox
    o_ref[...] = cur


def fused_forward(ab, xw, consts, gs, num_groups):
    A_cat, D1, D2, D3, T1w, T2w, T3w, E_cat = consts
    img_spec = pl.BlockSpec((H_IMG, gs * W_IMG), lambda g: (0, g))
    vmem_spec = pl.BlockSpec(memory_space=pltpu.MemorySpace.VMEM)   # whole array, single copy
    smem_spec = pl.BlockSpec(memory_space=pltpu.MemorySpace.SMEM)
    return pl.pallas_call(
        fused_forward_kernel,
        out_shape=jax.ShapeDtypeStruct(xw.shape, jnp.float32),
        grid=(num_groups,),
        in_specs=[smem_spec, img_spec] + [vmem_spec] * 8,
        out_specs=img_spec,
        compiler_params=pltpu.CompilerParams(dimension_semantics=("parallel",)),
    )(ab, xw, A_cat, D1, D2, D3, T1w, T2w, T3w, E_cat)


# ---------------- parameter construction --------------------------------------
def _quad(tl, bands):
    # band order within a level: top-right / bottom-left / bottom-right
    top = np.concatenate([tl, bands[0]], axis=1)
    bot = np.concatenate([bands[1], bands[2]], axis=1)
    return np.concatenate([top, bot], axis=0).astype(np.float32)


def make_prox_consts(prox_in, wavefamily="db4"):
    assert wavefamily == "db4", "only db4 filters are hardcoded in-script"
    n = H_IMG
    W1 = dwt_matrix(n, _DB4_DEC_LO)
    W2 = dwt_matrix(n // 2, _DB4_DEC_LO)
    W3 = dwt_matrix(n // 4, _DB4_DEC_LO)
    # composite analysis operators: level-i subbands = A_i X A_i^T
    A1 = W1
    A2 = W2 @ A1[: n // 2]
    A3 = W3 @ A2[: n // 4]
    # threshold tensors (deterministic init, shapes as in proxlayer.__init__)
    lamda0 = np.full((8, 8), prox_in[0], np.float32)          # (1,1,8,8)
    lamda1 = np.full((3, 32, 32), prox_in[1], np.float32)     # (1,1,3,32,32)
    lamda2 = np.full((3, 16, 16), prox_in[2], np.float32)     # (1,1,3,16,16)
    lamda3 = np.full((3, 8, 8), prox_in[3], np.float32)       # (1,1,3,8,8)
    T3 = _quad(lamda0, lamda3)                                # (16,16) incl. yl thresh
    T2 = _quad(np.full((16, 16), BIG, np.float32), lamda2)    # (32,32), approx -> 0
    T1 = _quad(np.full((32, 32), BIG, np.float32), lamda1)    # (64,64), approx -> 0
    return {
        "A": (A1.astype(np.float32), A2.astype(np.float32), A3.astype(np.float32)),
        "W": (W1.astype(np.float32), W2.astype(np.float32), W3.astype(np.float32)),
        "T": (T1, T2, T3),
    }


def _widen_consts_fused(base, gs):
    """Block-diagonal / lane-tiled constants for a slab of `gs` images.

    Level 3 is lane-padded from gs*16 to gs*32 (zeros / BIG thresholds) so that
    every lane-concat boundary in the kernel is a multiple of 128.
    """
    A1, A2, A3 = base["A"]
    T1, T2, T3 = base["T"]
    n1, n2, n3 = A1.shape[0], A2.shape[0], A3.shape[0]        # 64, 32, 16
    eye = np.eye(gs, dtype=np.float32)

    A_cat = np.vstack([A1, A2, A3]).astype(np.float32)        # (112, 64)
    D1 = np.kron(eye, A1.T).astype(np.float32)                # (gs*64, gs*64)
    D2 = np.kron(eye, A2.T).astype(np.float32)                # (gs*64, gs*32)
    D3 = np.concatenate(
        [np.kron(eye, A3.T), np.zeros((gs * n1, gs * (n2 - n3)), np.float32)],
        axis=1).astype(np.float32)                            # (gs*64, gs*32) padded

    T1w = np.tile(T1, (1, gs))
    T2w = np.tile(T2, (1, gs))
    T3w = np.concatenate(
        [np.tile(T3, (1, gs)), np.full((n3, gs * (n2 - n3)), BIG, np.float32)],
        axis=1)                                               # (16, gs*32) padded

    E3 = np.concatenate(
        [np.kron(eye, A3), np.zeros((gs * (n2 - n3), gs * n1), np.float32)],
        axis=0)                                               # (gs*32, gs*64) padded
    E_cat = np.vstack([np.kron(eye, A1), np.kron(eye, A2), E3]).astype(np.float32)

    return tuple(jnp.asarray(m) for m in (A_cat, D1, D2, D3, T1w, T2w, T3w, E_cat))


# -------- pure-JAX nested-form reference (numerical sanity check only) --------
def _prox_ref_nested(x4d, base):
    W1, W2, W3 = (jnp.asarray(m, jnp.float32) for m in base["W"])
    T1, T2, T3 = (jnp.asarray(m, jnp.float32) for m in base["T"])
    hp = jax.lax.Precision.HIGHEST
    mm = lambda u, v: jnp.matmul(u, v, precision=hp)

    def one(img):
        y1 = mm(mm(W1, img), W1.T)
        y2 = mm(mm(W2, y1[:32, :32]), W2.T)
        y3 = mm(mm(W3, y2[:16, :16]), W3.T)
        y3n = _soft(y3, T3)
        a2n = mm(mm(W3.T, y3n), W3)
        y2n = _soft(y2, T2).at[:16, :16].set(a2n)
        a1n = mm(mm(W2.T, y2n), W2)
        y1n = _soft(y1, T1).at[:32, :32].set(a1n)
        return mm(mm(W1.T, y1n), W1)

    B, C, H, W = x4d.shape
    return jax.vmap(one)(x4d.reshape(B * C, H, W)).reshape(B, C, H, W)


def forward_reference(model, x):
    a0 = model.grad_alpha
    out = (1.0 - a0) * x + a0 * x                       # layers[0](x, x)
    out = (1.0 - a0) * out + a0 * x                     # gradientlayer again
    for wave in model.wavefamilyset:
        out = _prox_ref_nested(out, model.base_consts[wave])
    for a in model.proxf_alphas:
        out = (1.0 / (1.0 + a)) * out + (a / (1.0 + a)) * x
        for wave in model.wavefamilyset:
            out = _prox_ref_nested(out, model.base_consts[wave])
    return out


# ---------------- the module --------------------------------------------------
class NonExpansiveNN:
    def __init__(self, prox_in, wavefamilyset, levels=3, grad_in=0.1,
                 num_of_layers=3):
        assert levels == LEVELS          # see NOTE / TODO at top of file
        assert len(wavefamilyset) >= 1
        self.grad_alpha = float(grad_in)                               # gradientlayer.alpha
        self.proxf_alphas = [float(grad_in)
                             for _ in range(num_of_layers - 1)]        # proxflayer.alpha
        self.wavefamilyset = list(wavefamilyset)
        self.num_of_layers = num_of_layers
        self.base_consts = {w: make_prox_consts(prox_in, w) for w in self.wavefamilyset}

        # (a, b) affine table, one row per prox step (SMEM inside the kernel)
        affines = [(1.0 - self.grad_alpha, self.grad_alpha)]
        affines += [(1.0 / (1.0 + a), a / (1.0 + a)) for a in self.proxf_alphas]
        steps = []
        for (a, b) in affines:
            for wi, _ in enumerate(self.wavefamilyset):
                steps.append((a, b) if wi == 0 else (1.0, 0.0))
        self._ab = jnp.asarray(np.asarray(steps, np.float32))          # (num_steps, 2)

        # all wave entries are db4 (only db4 filters are hardcoded), so a single
        # constant set serves every prox step inside the fused kernel.
        self._consts = _widen_consts_fused(
            self.base_consts[self.wavefamilyset[0]], GROUP_SIZE)
        self._jit_fwd = jax.jit(self._forward)

    def _forward(self, x):
        x = x.astype(jnp.float32)
        B, C, H, W = x.shape
        assert H == H_IMG and W == W_IMG
        G = B * C
        gs = GROUP_SIZE
        ng = -(-G // gs)                                  # ceil
        Gp = ng * gs
        # lane-dense wide layout: images concatenated along the lane axis
        xw = jnp.transpose(x.reshape(G, H, W), (1, 0, 2)).reshape(H, G * W)
        if Gp != G:                                       # pad to a whole slab
            xw = jnp.pad(xw, ((0, 0), (0, (Gp - G) * W)))
        ow = fused_forward(self._ab, xw, self._consts, gs, ng)
        ow = ow[:, :G * W]
        return jnp.transpose(ow.reshape(H, G, W), (1, 0, 2)).reshape(B, C, H, W)

    def __call__(self, x):
        return self._jit_fwd(x)


if __name__ == "__main__":
    key = jax.random.PRNGKey(0)
    # batch=2, channels=4, 64x64 images (spatial size implied by lamda shapes)
    x = jax.random.normal(key, (2, 4, H_IMG, W_IMG), dtype=jnp.float32)

    model = NonExpansiveNN(prox_in=(0.01, 0.02, 0.03, 0.04),
                           wavefamilyset=("db4",), levels=3,
                           grad_in=0.1, num_of_layers=3)

    out = jax.block_until_ready(model(x))
    ref = jax.block_until_ready(forward_reference(model, x))

    assert out.shape == x.shape
    assert bool(jnp.all(jnp.isfinite(out)))
    err = float(jnp.max(jnp.abs(out - ref)))
    assert err < 2e-3, f"max abs err {err}"
    print("KERNEL_OK")
</pallas_src>

<mosaic_0001>
module attributes {stable_mosaic.version = 11 : i64} {
  func.func @fused_forward_kernel(%arg0: i32, %arg1: memref<3x2xf32, #tpu.memory_space<smem>>, %arg2: memref<64x256xf32, #tpu.memory_space<vmem>>, %arg3: memref<112x64xf32, #tpu.memory_space<vmem>>, %arg4: memref<256x256xf32, #tpu.memory_space<vmem>>, %arg5: memref<256x128xf32, #tpu.memory_space<vmem>>, %arg6: memref<256x128xf32, #tpu.memory_space<vmem>>, %arg7: memref<64x256xf32, #tpu.memory_space<vmem>>, %arg8: memref<32x128xf32, #tpu.memory_space<vmem>>, %arg9: memref<16x128xf32, #tpu.memory_space<vmem>>, %arg10: memref<512x256xf32, #tpu.memory_space<vmem>>, %arg11: memref<64x256xf32, #tpu.memory_space<vmem>>) attributes {dimension_semantics = [#tpu.dimension_semantics<parallel>], iteration_bounds = array<i64: 2>, scalar_prefetch = 0 : i64, scratch_operands = 0 : i64, tpu.core_type = #tpu.core_type<tc>, window_params = [{transform_indices = @transform_0, window_bounds = array<i64: 3, 2>}, {transform_indices = @transform_1, window_bounds = array<i64: 64, 256>}, {pipeline_mode = #tpu.pipeline_mode<synchronous>, transform_indices = @transform_2, window_bounds = array<i64: 112, 64>}, {pipeline_mode = #tpu.pipeline_mode<synchronous>, transform_indices = @transform_3, window_bounds = array<i64: 256, 256>}, {pipeline_mode = #tpu.pipeline_mode<synchronous>, transform_indices = @transform_4, window_bounds = array<i64: 256, 128>}, {pipeline_mode = #tpu.pipeline_mode<synchronous>, transform_indices = @transform_5, window_bounds = array<i64: 256, 128>}, {pipeline_mode = #tpu.pipeline_mode<synchronous>, transform_indices = @transform_6, window_bounds = array<i64: 64, 256>}, {pipeline_mode = #tpu.pipeline_mode<synchronous>, transform_indices = @transform_7, window_bounds = array<i64: 32, 128>}, {pipeline_mode = #tpu.pipeline_mode<synchronous>, transform_indices = @transform_8, window_bounds = array<i64: 16, 128>}, {pipeline_mode = #tpu.pipeline_mode<synchronous>, transform_indices = @transform_9, window_bounds = array<i64: 512, 256>}, {transform_indices = @transform_10, window_bounds = array<i64: 64, 256>}]} {
    %c0 = arith.constant 0 : index
    %c0_0 = arith.constant 0 : index
    %0 = vector.load %arg2[%c0, %c0_0] : memref<64x256xf32, #tpu.memory_space<vmem>>, vector<64x256xf32>
    %c0_1 = arith.constant 0 : index
    %c0_2 = arith.constant 0 : index
    %1 = memref.load %arg1[%c0_1, %c0_2] : memref<3x2xf32, #tpu.memory_space<smem>>
    %c0_3 = arith.constant 0 : index
    %c1 = arith.constant 1 : index
    %2 = memref.load %arg1[%c0_3, %c1] : memref<3x2xf32, #tpu.memory_space<smem>>
    %3 = vector.broadcast %1 : f32 to vector<64x256xf32>
    %4 = arith.mulf %3, %0 : vector<64x256xf32>
    %5 = vector.broadcast %2 : f32 to vector<64x256xf32>
    %6 = arith.mulf %5, %0 : vector<64x256xf32>
    %7 = arith.addf %4, %6 : vector<64x256xf32>
    %c0_4 = arith.constant 0 : index
    %c0_5 = arith.constant 0 : index
    %8 = vector.load %arg3[%c0_4, %c0_5] : memref<112x64xf32, #tpu.memory_space<vmem>>, vector<112x64xf32>
    %cst = arith.constant dense<0.000000e+00> : vector<112x256xf32>
    %9 = tpu.matmul %8, %7, %cst {dimension_numbers = #tpu.dot_dimension_numbers<[1], [0], [0], [1], [0, 0, 1, 1], [], []>} : vector<112x64xf32>, vector<64x256xf32>, vector<112x256xf32> -> vector<112x256xf32>
    %10 = vector.extract_strided_slice %9 {offsets = [0, 0], sizes = [64, 256], strides = [1, 1]} : vector<112x256xf32> to vector<64x256xf32>
    %c0_6 = arith.constant 0 : index
    %c0_7 = arith.constant 0 : index
    %11 = vector.load %arg4[%c0_6, %c0_7] : memref<256x256xf32, #tpu.memory_space<vmem>>, vector<256x256xf32>
    %cst_8 = arith.constant dense<0.000000e+00> : vector<64x256xf32>
    %12 = tpu.matmul %10, %11, %cst_8 {dimension_numbers = #tpu.dot_dimension_numbers<[1], [0], [0], [1], [0, 0, 1, 1], [], []>} : vector<64x256xf32>, vector<256x256xf32>, vector<64x256xf32> -> vector<64x256xf32>
    %13 = vector.extract_strided_slice %9 {offsets = [64, 0], sizes = [32, 256], strides = [1, 1]} : vector<112x256xf32> to vector<32x256xf32>
    %c0_9 = arith.constant 0 : index
    %c0_10 = arith.constant 0 : index
    %14 = vector.load %arg5[%c0_9, %c0_10] : memref<256x128xf32, #tpu.memory_space<vmem>>, vector<256x128xf32>
    %cst_11 = arith.constant dense<0.000000e+00> : vector<32x128xf32>
    %15 = tpu.matmul %13, %14, %cst_11 {dimension_numbers = #tpu.dot_dimension_numbers<[1], [0], [0], [1], [0, 0, 1, 1], [], []>} : vector<32x256xf32>, vector<256x128xf32>, vector<32x128xf32> -> vector<32x128xf32>
    %16 = vector.extract_strided_slice %9 {offsets = [96, 0], sizes = [16, 256], strides = [1, 1]} : vector<112x256xf32> to vector<16x256xf32>
    %c0_12 = arith.constant 0 : index
    %c0_13 = arith.constant 0 : index
    %17 = vector.load %arg6[%c0_12, %c0_13] : memref<256x128xf32, #tpu.memory_space<vmem>>, vector<256x128xf32>
    %cst_14 = arith.constant dense<0.000000e+00> : vector<16x128xf32>
    %18 = tpu.matmul %16, %17, %cst_14 {dimension_numbers = #tpu.dot_dimension_numbers<[1], [0], [0], [1], [0, 0, 1, 1], [], []>} : vector<16x256xf32>, vector<256x128xf32>, vector<16x128xf32> -> vector<16x128xf32>
    %19 = vector.extract_strided_slice %8 {offsets = [0, 0], sizes = [64, 64], strides = [1, 1]} : vector<112x64xf32> to vector<64x64xf32>
    %c0_15 = arith.constant 0 : index
    %c0_16 = arith.constant 0 : index
    %20 = vector.load %arg7[%c0_15, %c0_16] : memref<64x256xf32, #tpu.memory_space<vmem>>, vector<64x256xf32>
    %21 = arith.subf %12, %20 : vector<64x256xf32>
    %cst_17 = arith.constant 0.000000e+00 : f32
    %22 = vector.broadcast %cst_17 : f32 to vector<64x256xf32>
    %23 = arith.maximumf %21, %22 : vector<64x256xf32>
    %cst_18 = arith.constant 0.000000e+00 : f32
    %24 = vector.broadcast %cst_18 : f32 to vector<64x256xf32>
    %25 = arith.subf %24, %12 : vector<64x256xf32>
    %26 = arith.subf %25, %20 : vector<64x256xf32>
    %cst_19 = arith.constant 0.000000e+00 : f32
    %27 = vector.broadcast %cst_19 : f32 to vector<64x256xf32>
    %28 = arith.maximumf %26, %27 : vector<64x256xf32>
    %29 = arith.subf %23, %28 : vector<64x256xf32>
    %cst_20 = arith.constant dense<0.000000e+00> : vector<64x256xf32>
    %30 = tpu.matmul %19, %29, %cst_20 {dimension_numbers = #tpu.dot_dimension_numbers<[0], [0], [1], [1], [0, 1, 1, 1], [], []>} : vector<64x64xf32>, vector<64x256xf32>, vector<64x256xf32> -> vector<64x256xf32>
    %31 = vector.extract_strided_slice %8 {offsets = [64, 0], sizes = [32, 64], strides = [1, 1]} : vector<112x64xf32> to vector<32x64xf32>
    %c0_21 = arith.constant 0 : index
    %c0_22 = arith.constant 0 : index
    %32 = vector.load %arg8[%c0_21, %c0_22] : memref<32x128xf32, #tpu.memory_space<vmem>>, vector<32x128xf32>
    %33 = arith.subf %15, %32 : vector<32x128xf32>
    %cst_23 = arith.constant 0.000000e+00 : f32
    %34 = vector.broadcast %cst_23 : f32 to vector<32x128xf32>
    %35 = arith.maximumf %33, %34 : vector<32x128xf32>
    %cst_24 = arith.constant 0.000000e+00 : f32
    %36 = vector.broadcast %cst_24 : f32 to vector<32x128xf32>
    %37 = arith.subf %36, %15 : vector<32x128xf32>
    %38 = arith.subf %37, %32 : vector<32x128xf32>
    %cst_25 = arith.constant 0.000000e+00 : f32
    %39 = vector.broadcast %cst_25 : f32 to vector<32x128xf32>
    %40 = arith.maximumf %38, %39 : vector<32x128xf32>
    %41 = arith.subf %35, %40 : vector<32x128xf32>
    %cst_26 = arith.constant dense<0.000000e+00> : vector<64x128xf32>
    %42 = tpu.matmul %31, %41, %cst_26 {dimension_numbers = #tpu.dot_dimension_numbers<[0], [0], [1], [1], [0, 1, 1, 1], [], []>} : vector<32x64xf32>, vector<32x128xf32>, vector<64x128xf32> -> vector<64x128xf32>
    %43 = vector.extract_strided_slice %8 {offsets = [96, 0], sizes = [16, 64], strides = [1, 1]} : vector<112x64xf32> to vector<16x64xf32>
    %c0_27 = arith.constant 0 : index
    %c0_28 = arith.constant 0 : index
    %44 = vector.load %arg9[%c0_27, %c0_28] : memref<16x128xf32, #tpu.memory_space<vmem>>, vector<16x128xf32>
    %45 = arith.subf %18, %44 : vector<16x128xf32>
    %cst_29 = arith.constant 0.000000e+00 : f32
    %46 = vector.broadcast %cst_29 : f32 to vector<16x128xf32>
    %47 = arith.maximumf %45, %46 : vector<16x128xf32>
    %cst_30 = arith.constant 0.000000e+00 : f32
    %48 = vector.broadcast %cst_30 : f32 to vector<16x128xf32>
    %49 = arith.subf %48, %18 : vector<16x128xf32>
    %50 = arith.subf %49, %44 : vector<16x128xf32>
    %cst_31 = arith.constant 0.000000e+00 : f32
    %51 = vector.broadcast %cst_31 : f32 to vector<16x128xf32>
    %52 = arith.maximumf %50, %51 : vector<16x128xf32>
    %53 = arith.subf %47, %52 : vector<16x128xf32>
    %cst_32 = arith.constant dense<0.000000e+00> : vector<64x128xf32>
    %54 = tpu.matmul %43, %53, %cst_32 {dimension_numbers = #tpu.dot_dimension_numbers<[0], [0], [1], [1], [0, 1, 1, 1], [], []>} : vector<16x64xf32>, vector<16x128xf32>, vector<64x128xf32> -> vector<64x128xf32>
    %55 = tpu.concatenate %30, %42, %54 in 1 : vector<64x256xf32>, vector<64x128xf32>, vector<64x128xf32> -> vector<64x512xf32>
    %c0_33 = arith.constant 0 : index
    %c0_34 = arith.constant 0 : index
    %56 = vector.load %arg10[%c0_33, %c0_34] : memref<512x256xf32, #tpu.memory_space<vmem>>, vector<512x256xf32>
    %cst_35 = arith.constant dense<0.000000e+00> : vector<64x256xf32>
    %57 = tpu.matmul %55, %56, %cst_35 {dimension_numbers = #tpu.dot_dimension_numbers<[1], [0], [0], [1], [0, 0, 1, 1], [], []>} : vector<64x512xf32>, vector<512x256xf32>, vector<64x256xf32> -> vector<64x256xf32>
    %c1_36 = arith.constant 1 : index
    %c0_37 = arith.constant 0 : index
    %58 = memref.load %arg1[%c1_36, %c0_37] : memref<3x2xf32, #tpu.memory_space<smem>>
    %c1_38 = arith.constant 1 : index
    %c1_39 = arith.constant 1 : index
    %59 = memref.load %arg1[%c1_38, %c1_39] : memref<3x2xf32, #tpu.memory_space<smem>>
    %60 = vector.broadcast %58 : f32 to vector<64x256xf32>
    %61 = arith.mulf %60, %57 : vector<64x256xf32>
    %62 = vector.broadcast %59 : f32 to vector<64x256xf32>
    %63 = arith.mulf %62, %0 : vector<64x256xf32>
    %64 = arith.addf %61, %63 : vector<64x256xf32>
    %c0_40 = arith.constant 0 : index
    %c0_41 = arith.constant 0 : index
    %65 = vector.load %arg3[%c0_40, %c0_41] : memref<112x64xf32, #tpu.memory_space<vmem>>, vector<112x64xf32>
    %cst_42 = arith.constant dense<0.000000e+00> : vector<112x256xf32>
    %66 = tpu.matmul %65, %64, %cst_42 {dimension_numbers = #tpu.dot_dimension_numbers<[1], [0], [0], [1], [0, 0, 1, 1], [], []>} : vector<112x64xf32>, vector<64x256xf32>, vector<112x256xf32> -> vector<112x256xf32>
    %67 = vector.extract_strided_slice %66 {offsets = [0, 0], sizes = [64, 256], strides = [1, 1]} : vector<112x256xf32> to vector<64x256xf32>
    %c0_43 = arith.constant 0 : index
    %c0_44 = arith.constant 0 : index
    %68 = vector.load %arg4[%c0_43, %c0_44] : memref<256x256xf32, #tpu.memory_space<vmem>>, vector<256x256xf32>
    %cst_45 = arith.constant dense<0.000000e+00> : vector<64x256xf32>
    %69 = tpu.matmul %67, %68, %cst_45 {dimension_numbers = #tpu.dot_dimension_numbers<[1], [0], [0], [1], [0, 0, 1, 1], [], []>} : vector<64x256xf32>, vector<256x256xf32>, vector<64x256xf32> -> vector<64x256xf32>
    %70 = vector.extract_strided_slice %66 {offsets = [64, 0], sizes = [32, 256], strides = [1, 1]} : vector<112x256xf32> to vector<32x256xf32>
    %c0_46 = arith.constant 0 : index
    %c0_47 = arith.constant 0 : index
    %71 = vector.load %arg5[%c0_46, %c0_47] : memref<256x128xf32, #tpu.memory_space<vmem>>, vector<256x128xf32>
    %cst_48 = arith.constant dense<0.000000e+00> : vector<32x128xf32>
    %72 = tpu.matmul %70, %71, %cst_48 {dimension_numbers = #tpu.dot_dimension_numbers<[1], [0], [0], [1], [0, 0, 1, 1], [], []>} : vector<32x256xf32>, vector<256x128xf32>, vector<32x128xf32> -> vector<32x128xf32>
    %73 = vector.extract_strided_slice %66 {offsets = [96, 0], sizes = [16, 256], strides = [1, 1]} : vector<112x256xf32> to vector<16x256xf32>
    %c0_49 = arith.constant 0 : index
    %c0_50 = arith.constant 0 : index
    %74 = vector.load %arg6[%c0_49, %c0_50] : memref<256x128xf32, #tpu.memory_space<vmem>>, vector<256x128xf32>
    %cst_51 = arith.constant dense<0.000000e+00> : vector<16x128xf32>
    %75 = tpu.matmul %73, %74, %cst_51 {dimension_numbers = #tpu.dot_dimension_numbers<[1], [0], [0], [1], [0, 0, 1, 1], [], []>} : vector<16x256xf32>, vector<256x128xf32>, vector<16x128xf32> -> vector<16x128xf32>
    %76 = vector.extract_strided_slice %65 {offsets = [0, 0], sizes = [64, 64], strides = [1, 1]} : vector<112x64xf32> to vector<64x64xf32>
    %c0_52 = arith.constant 0 : index
    %c0_53 = arith.constant 0 : index
    %77 = vector.load %arg7[%c0_52, %c0_53] : memref<64x256xf32, #tpu.memory_space<vmem>>, vector<64x256xf32>
    %78 = arith.subf %69, %77 : vector<64x256xf32>
    %cst_54 = arith.constant 0.000000e+00 : f32
    %79 = vector.broadcast %cst_54 : f32 to vector<64x256xf32>
    %80 = arith.maximumf %78, %79 : vector<64x256xf32>
    %cst_55 = arith.constant 0.000000e+00 : f32
    %81 = vector.broadcast %cst_55 : f32 to vector<64x256xf32>
    %82 = arith.subf %81, %69 : vector<64x256xf32>
    %83 = arith.subf %82, %77 : vector<64x256xf32>
    %cst_56 = arith.constant 0.000000e+00 : f32
    %84 = vector.broadcast %cst_56 : f32 to vector<64x256xf32>
    %85 = arith.maximumf %83, %84 : vector<64x256xf32>
    %86 = arith.subf %80, %85 : vector<64x256xf32>
    %cst_57 = arith.constant dense<0.000000e+00> : vector<64x256xf32>
    %87 = tpu.matmul %76, %86, %cst_57 {dimension_numbers = #tpu.dot_dimension_numbers<[0], [0], [1], [1], [0, 1, 1, 1], [], []>} : vector<64x64xf32>, vector<64x256xf32>, vector<64x256xf32> -> vector<64x256xf32>
    %88 = vector.extract_strided_slice %65 {offsets = [64, 0], sizes = [32, 64], strides = [1, 1]} : vector<112x64xf32> to vector<32x64xf32>
    %c0_58 = arith.constant 0 : index
    %c0_59 = arith.constant 0 : index
    %89 = vector.load %arg8[%c0_58, %c0_59] : memref<32x128xf32, #tpu.memory_space<vmem>>, vector<32x128xf32>
    %90 = arith.subf %72, %89 : vector<32x128xf32>
    %cst_60 = arith.constant 0.000000e+00 : f32
    %91 = vector.broadcast %cst_60 : f32 to vector<32x128xf32>
    %92 = arith.maximumf %90, %91 : vector<32x128xf32>
    %cst_61 = arith.constant 0.000000e+00 : f32
    %93 = vector.broadcast %cst_61 : f32 to vector<32x128xf32>
    %94 = arith.subf %93, %72 : vector<32x128xf32>
    %95 = arith.subf %94, %89 : vector<32x128xf32>
    %cst_62 = arith.constant 0.000000e+00 : f32
    %96 = vector.broadcast %cst_62 : f32 to vector<32x128xf32>
    %97 = arith.maximumf %95, %96 : vector<32x128xf32>
    %98 = arith.subf %92, %97 : vector<32x128xf32>
    %cst_63 = arith.constant dense<0.000000e+00> : vector<64x128xf32>
    %99 = tpu.matmul %88, %98, %cst_63 {dimension_numbers = #tpu.dot_dimension_numbers<[0], [0], [1], [1], [0, 1, 1, 1], [], []>} : vector<32x64xf32>, vector<32x128xf32>, vector<64x128xf32> -> vector<64x128xf32>
    %100 = vector.extract_strided_slice %65 {offsets = [96, 0], sizes = [16, 64], strides = [1, 1]} : vector<112x64xf32> to vector<16x64xf32>
    %c0_64 = arith.constant 0 : index
    %c0_65 = arith.constant 0 : index
    %101 = vector.load %arg9[%c0_64, %c0_65] : memref<16x128xf32, #tpu.memory_space<vmem>>, vector<16x128xf32>
    %102 = arith.subf %75, %101 : vector<16x128xf32>
    %cst_66 = arith.constant 0.000000e+00 : f32
    %103 = vector.broadcast %cst_66 : f32 to vector<16x128xf32>
    %104 = arith.maximumf %102, %103 : vector<16x128xf32>
    %cst_67 = arith.constant 0.000000e+00 : f32
    %105 = vector.broadcast %cst_67 : f32 to vector<16x128xf32>
    %106 = arith.subf %105, %75 : vector<16x128xf32>
    %107 = arith.subf %106, %101 : vector<16x128xf32>
    %cst_68 = arith.constant 0.000000e+00 : f32
    %108 = vector.broadcast %cst_68 : f32 to vector<16x128xf32>
    %109 = arith.maximumf %107, %108 : vector<16x128xf32>
    %110 = arith.subf %104, %109 : vector<16x128xf32>
    %cst_69 = arith.constant dense<0.000000e+00> : vector<64x128xf32>
    %111 = tpu.matmul %100, %110, %cst_69 {dimension_numbers = #tpu.dot_dimension_numbers<[0], [0], [1], [1], [0, 1, 1, 1], [], []>} : vector<16x64xf32>, vector<16x128xf32>, vector<64x128xf32> -> vector<64x128xf32>
    %112 = tpu.concatenate %87, %99, %111 in 1 : vector<64x256xf32>, vector<64x128xf32>, vector<64x128xf32> -> vector<64x512xf32>
    %c0_70 = arith.constant 0 : index
    %c0_71 = arith.constant 0 : index
    %113 = vector.load %arg10[%c0_70, %c0_71] : memref<512x256xf32, #tpu.memory_space<vmem>>, vector<512x256xf32>
    %cst_72 = arith.constant dense<0.000000e+00> : vector<64x256xf32>
    %114 = tpu.matmul %112, %113, %cst_72 {dimension_numbers = #tpu.dot_dimension_numbers<[1], [0], [0], [1], [0, 0, 1, 1], [], []>} : vector<64x512xf32>, vector<512x256xf32>, vector<64x256xf32> -> vector<64x256xf32>
    %c2 = arith.constant 2 : index
    %c0_73 = arith.constant 0 : index
    %115 = memref.load %arg1[%c2, %c0_73] : memref<3x2xf32, #tpu.memory_space<smem>>
    %c2_74 = arith.constant 2 : index
    %c1_75 = arith.constant 1 : index
    %116 = memref.load %arg1[%c2_74, %c1_75] : memref<3x2xf32, #tpu.memory_space<smem>>
    %117 = vector.broadcast %115 : f32 to vector<64x256xf32>
    %118 = arith.mulf %117, %114 : vector<64x256xf32>
    %119 = vector.broadcast %116 : f32 to vector<64x256xf32>
    %120 = arith.mulf %119, %0 : vector<64x256xf32>
    %121 = arith.addf %118, %120 : vector<64x256xf32>
    %c0_76 = arith.constant 0 : index
    %c0_77 = arith.constant 0 : index
    %122 = vector.load %arg3[%c0_76, %c0_77] : memref<112x64xf32, #tpu.memory_space<vmem>>, vector<112x64xf32>
    %cst_78 = arith.constant dense<0.000000e+00> : vector<112x256xf32>
    %123 = tpu.matmul %122, %121, %cst_78 {dimension_numbers = #tpu.dot_dimension_numbers<[1], [0], [0], [1], [0, 0, 1, 1], [], []>} : vector<112x64xf32>, vector<64x256xf32>, vector<112x256xf32> -> vector<112x256xf32>
    %124 = vector.extract_strided_slice %123 {offsets = [0, 0], sizes = [64, 256], strides = [1, 1]} : vector<112x256xf32> to vector<64x256xf32>
    %c0_79 = arith.constant 0 : index
    %c0_80 = arith.constant 0 : index
    %125 = vector.load %arg4[%c0_79, %c0_80] : memref<256x256xf32, #tpu.memory_space<vmem>>, vector<256x256xf32>
    %cst_81 = arith.constant dense<0.000000e+00> : vector<64x256xf32>
    %126 = tpu.matmul %124, %125, %cst_81 {dimension_numbers = #tpu.dot_dimension_numbers<[1], [0], [0], [1], [0, 0, 1, 1], [], []>} : vector<64x256xf32>, vector<256x256xf32>, vector<64x256xf32> -> vector<64x256xf32>
    %127 = vector.extract_strided_slice %123 {offsets = [64, 0], sizes = [32, 256], strides = [1, 1]} : vector<112x256xf32> to vector<32x256xf32>
    %c0_82 = arith.constant 0 : index
    %c0_83 = arith.constant 0 : index
    %128 = vector.load %arg5[%c0_82, %c0_83] : memref<256x128xf32, #tpu.memory_space<vmem>>, vector<256x128xf32>
    %cst_84 = arith.constant dense<0.000000e+00> : vector<32x128xf32>
    %129 = tpu.matmul %127, %128, %cst_84 {dimension_numbers = #tpu.dot_dimension_numbers<[1], [0], [0], [1], [0, 0, 1, 1], [], []>} : vector<32x256xf32>, vector<256x128xf32>, vector<32x128xf32> -> vector<32x128xf32>
    %130 = vector.extract_strided_slice %123 {offsets = [96, 0], sizes = [16, 256], strides = [1, 1]} : vector<112x256xf32> to vector<16x256xf32>
    %c0_85 = arith.constant 0 : index
    %c0_86 = arith.constant 0 : index
    %131 = vector.load %arg6[%c0_85, %c0_86] : memref<256x128xf32, #tpu.memory_space<vmem>>, vector<256x128xf32>
    %cst_87 = arith.constant dense<0.000000e+00> : vector<16x128xf32>
    %132 = tpu.matmul %130, %131, %cst_87 {dimension_numbers = #tpu.dot_dimension_numbers<[1], [0], [0], [1], [0, 0, 1, 1], [], []>} : vector<16x256xf32>, vector<256x128xf32>, vector<16x128xf32> -> vector<16x128xf32>
    %133 = vector.extract_strided_slice %122 {offsets = [0, 0], sizes = [64, 64], strides = [1, 1]} : vector<112x64xf32> to vector<64x64xf32>
    %c0_88 = arith.constant 0 : index
    %c0_89 = arith.constant 0 : index
    %134 = vector.load %arg7[%c0_88, %c0_89] : memref<64x256xf32, #tpu.memory_space<vmem>>, vector<64x256xf32>
    %135 = arith.subf %126, %134 : vector<64x256xf32>
    %cst_90 = arith.constant 0.000000e+00 : f32
    %136 = vector.broadcast %cst_90 : f32 to vector<64x256xf32>
    %137 = arith.maximumf %135, %136 : vector<64x256xf32>
    %cst_91 = arith.constant 0.000000e+00 : f32
    %138 = vector.broadcast %cst_91 : f32 to vector<64x256xf32>
    %139 = arith.subf %138, %126 : vector<64x256xf32>
    %140 = arith.subf %139, %134 : vector<64x256xf32>
    %cst_92 = arith.constant 0.000000e+00 : f32
    %141 = vector.broadcast %cst_92 : f32 to vector<64x256xf32>
    %142 = arith.maximumf %140, %141 : vector<64x256xf32>
    %143 = arith.subf %137, %142 : vector<64x256xf32>
    %cst_93 = arith.constant dense<0.000000e+00> : vector<64x256xf32>
    %144 = tpu.matmul %133, %143, %cst_93 {dimension_numbers = #tpu.dot_dimension_numbers<[0], [0], [1], [1], [0, 1, 1, 1], [], []>} : vector<64x64xf32>, vector<64x256xf32>, vector<64x256xf32> -> vector<64x256xf32>
    %145 = vector.extract_strided_slice %122 {offsets = [64, 0], sizes = [32, 64], strides = [1, 1]} : vector<112x64xf32> to vector<32x64xf32>
    %c0_94 = arith.constant 0 : index
    %c0_95 = arith.constant 0 : index
    %146 = vector.load %arg8[%c0_94, %c0_95] : memref<32x128xf32, #tpu.memory_space<vmem>>, vector<32x128xf32>
    %147 = arith.subf %129, %146 : vector<32x128xf32>
    %cst_96 = arith.constant 0.000000e+00 : f32
    %148 = vector.broadcast %cst_96 : f32 to vector<32x128xf32>
    %149 = arith.maximumf %147, %148 : vector<32x128xf32>
    %cst_97 = arith.constant 0.000000e+00 : f32
    %150 = vector.broadcast %cst_97 : f32 to vector<32x128xf32>
    %151 = arith.subf %150, %129 : vector<32x128xf32>
    %152 = arith.subf %151, %146 : vector<32x128xf32>
    %cst_98 = arith.constant 0.000000e+00 : f32
    %153 = vector.broadcast %cst_98 : f32 to vector<32x128xf32>
    %154 = arith.maximumf %152, %153 : vector<32x128xf32>
    %155 = arith.subf %149, %154 : vector<32x128xf32>
    %cst_99 = arith.constant dense<0.000000e+00> : vector<64x128xf32>
    %156 = tpu.matmul %145, %155, %cst_99 {dimension_numbers = #tpu.dot_dimension_numbers<[0], [0], [1], [1], [0, 1, 1, 1], [], []>} : vector<32x64xf32>, vector<32x128xf32>, vector<64x128xf32> -> vector<64x128xf32>
    %157 = vector.extract_strided_slice %122 {offsets = [96, 0], sizes = [16, 64], strides = [1, 1]} : vector<112x64xf32> to vector<16x64xf32>
    %c0_100 = arith.constant 0 : index
    %c0_101 = arith.constant 0 : index
    %158 = vector.load %arg9[%c0_100, %c0_101] : memref<16x128xf32, #tpu.memory_space<vmem>>, vector<16x128xf32>
    %159 = arith.subf %132, %158 : vector<16x128xf32>
    %cst_102 = arith.constant 0.000000e+00 : f32
    %160 = vector.broadcast %cst_102 : f32 to vector<16x128xf32>
    %161 = arith.maximumf %159, %160 : vector<16x128xf32>
    %cst_103 = arith.constant 0.000000e+00 : f32
    %162 = vector.broadcast %cst_103 : f32 to vector<16x128xf32>
    %163 = arith.subf %162, %132 : vector<16x128xf32>
    %164 = arith.subf %163, %158 : vector<16x128xf32>
    %cst_104 = arith.constant 0.000000e+00 : f32
    %165 = vector.broadcast %cst_104 : f32 to vector<16x128xf32>
    %166 = arith.maximumf %164, %165 : vector<16x128xf32>
    %167 = arith.subf %161, %166 : vector<16x128xf32>
    %cst_105 = arith.constant dense<0.000000e+00> : vector<64x128xf32>
    %168 = tpu.matmul %157, %167, %cst_105 {dimension_numbers = #tpu.dot_dimension_numbers<[0], [0], [1], [1], [0, 1, 1, 1], [], []>} : vector<16x64xf32>, vector<16x128xf32>, vector<64x128xf32> -> vector<64x128xf32>
    %169 = tpu.concatenate %144, %156, %168 in 1 : vector<64x256xf32>, vector<64x128xf32>, vector<64x128xf32> -> vector<64x512xf32>
    %c0_106 = arith.constant 0 : index
    %c0_107 = arith.constant 0 : index
    %170 = vector.load %arg10[%c0_106, %c0_107] : memref<512x256xf32, #tpu.memory_space<vmem>>, vector<512x256xf32>
    %cst_108 = arith.constant dense<0.000000e+00> : vector<64x256xf32>
    %171 = tpu.matmul %169, %170, %cst_108 {dimension_numbers = #tpu.dot_dimension_numbers<[1], [0], [0], [1], [0, 0, 1, 1], [], []>} : vector<64x512xf32>, vector<512x256xf32>, vector<64x256xf32> -> vector<64x256xf32>
    %c0_109 = arith.constant 0 : index
    %c0_110 = arith.constant 0 : index
    %172 = vector.load %arg11[%c0_109, %c0_110] : memref<64x256xf32, #tpu.memory_space<vmem>>, vector<64x256xf32>
    tpu.vector_store %arg11[%c0_109, %c0_110], %171 {strides = array<i32>} : memref<64x256xf32, #tpu.memory_space<vmem>>, vector<64x256xf32>,
    return
  }
  func.func @transform_0(%arg0: i32) -> (i32, i32) {
    %c0_i32 = arith.constant 0 : i32
    %c0_i32_0 = arith.constant 0 : i32
    %c0_i32_1 = arith.constant 0 : i32
    return %c0_i32, %c0_i32_0 : i32, i32
  }
  func.func @transform_1(%arg0: i32) -> (i32, i32) {
    %c0_i32 = arith.constant 0 : i32
    %c0_i32_0 = arith.constant 0 : i32
    return %c0_i32, %arg0 : i32, i32
  }
  func.func @transform_2(%arg0: i32) -> (i32, i32) {
    %c0_i32 = arith.constant 0 : i32
    %c0_i32_0 = arith.constant 0 : i32
    %c0_i32_1 = arith.constant 0 : i32
    return %c0_i32, %c0_i32_0 : i32, i32
  }
  func.func @transform_3(%arg0: i32) -> (i32, i32) {
    %c0_i32 = arith.constant 0 : i32
    %c0_i32_0 = arith.constant 0 : i32
    %c0_i32_1 = arith.constant 0 : i32
    return %c0_i32, %c0_i32_0 : i32, i32
  }
  func.func @transform_4(%arg0: i32) -> (i32, i32) {
    %c0_i32 = arith.constant 0 : i32
    %c0_i32_0 = arith.constant 0 : i32
    %c0_i32_1 = arith.constant 0 : i32
    return %c0_i32, %c0_i32_0 : i32, i32
  }
  func.func @transform_5(%arg0: i32) -> (i32, i32) {
    %c0_i32 = arith.constant 0 : i32
    %c0_i32_0 = arith.constant 0 : i32
    %c0_i32_1 = arith.constant 0 : i32
    return %c0_i32, %c0_i32_0 : i32, i32
  }
  func.func @transform_6(%arg0: i32) -> (i32, i32) {
    %c0_i32 = arith.constant 0 : i32
    %c0_i32_0 = arith.constant 0 : i32
    %c0_i32_1 = arith.constant 0 : i32
    return %c0_i32, %c0_i32_0 : i32, i32
  }
  func.func @transform_7(%arg0: i32) -> (i32, i32) {
    %c0_i32 = arith.constant 0 : i32
    %c0_i32_0 = arith.constant 0 : i32
    %c0_i32_1 = arith.constant 0 : i32
    return %c0_i32, %c0_i32_0 : i32, i32
  }
  func.func @transform_8(%arg0: i32) -> (i32, i32) {
    %c0_i32 = arith.constant 0 : i32
    %c0_i32_0 = arith.constant 0 : i32
    %c0_i32_1 = arith.constant 0 : i32
    return %c0_i32, %c0_i32_0 : i32, i32
  }
  func.func @transform_9(%arg0: i32) -> (i32, i32) {
    %c0_i32 = arith.constant 0 : i32
    %c0_i32_0 = arith.constant 0 : i32
    %c0_i32_1 = arith.constant 0 : i32
    return %c0_i32, %c0_i32_0 : i32, i32
  }
  func.func @transform_10(%arg0: i32) -> (i32, i32) {
    %c0_i32 = arith.constant 0 : i32
    %c0_i32_0 = arith.constant 0 : i32
    return %c0_i32, %arg0 : i32, i32
  }
}

</mosaic_0001>

<bundles_post_ra>
// kernel: _forward.1
= control target key start
LH: loop header
LB: loop body
LE: loop exit
PB: predicated region body
PF: predicated region fallthrough
CT: control target
= control target key end

     0   :  { %s8704_s0 = inlined_call_operand.vmem [shape: f32[3,2], index: 0, kind: input, shape index: {}]   ;;  %s8705_s1 = inlined_call_operand.vmem [shape: f32[64,512], index: 1, kind: input, shape index: {}]   ;;  %s8706_s2 = inlined_call_operand.hbm [shape: f32[112,64], index: 2, kind: input, shape index: {}]   ;;  %s8707_s3 = inlined_call_operand.vmem [shape: f32[256,256], index: 3, kind: input, shape index: {}]   ;;  %s8708_s4 = inlined_call_operand.hbm [shape: f32[256,128], index: 4, kind: input, shape index: {}]   ;;  %s8709_s5 = inlined_call_operand.vmem [shape: f32[256,128], index: 5, kind: input, shape index: {}]   ;;  %s8710_s6 = inlined_call_operand.hbm [shape: f32[64,256], index: 6, kind: input, shape index: {}]   ;;  %s8711_s7 = inlined_call_operand.vmem [shape: f32[32,128], index: 7, kind: input, shape index: {}]   ;;  %s8712_s8 = inlined_call_operand.hbm [shape: f32[16,128], index: 8, kind: input, shape index: {}]   ;;  %s8713_s9 = inlined_call_operand.vmem [shape: f32[512,256], index: 9, kind: input, shape index: {}]   ;;  %s8714_s10 = inlined_call_operand.vmem [shape: f32[64,512], index: 10, kind: output, shape index: {}]  }
   0x1   :  { %8977 = sst [smem:[#allocation157_spill]] %s8704_s0 }
   0x2   :  { %8978 = sst [smem:[#allocation158_spill]] %s8706_s2 }
   0x3   :  { %8979 = sst [smem:[#allocation159_spill]] %s8708_s4 }
   0x4   :  { %8980 = sst [smem:[#allocation160_spill]] %s8714_s10 }
   0x5   :  { %15 = vsyncpa [#allocation4], 0 }
   0x6   :  { %16 = vsyncpa [#allocation3], 0 }
   0x7   :  { %17 = vsyncpa [#allocation8], 0 }
   0x8   :  { %18 = vsyncpa [#allocation11], 0  ;;  %s6577_s13 = smov 0   ;;  %s6579_s14 = smov 0  }
   0x9   :  { %s6581_s15 = smov 0  }
   0xa LB: > { %s6593_s16 = sadd.s32 4294967295, %s6510_s15   ;;  %s6596_s17 = sadd.s32 1, %s6510_s15   ;;  %s6510_s15 = sphi %s6581_s15, %s9363_s15   ;;  %s6506_s14 = sphi %s6579_s14, %s9366_s14   ;;  %s6502_s13 = sphi %s6577_s13, %s9365_s13  }
   0xb   : > { %8981 = sst [smem:[#allocation17_spill]] %s6596_s17  ;;  %s49_s18 = ssub.s32 %s6510_s15, %s6596_s17 }
   0xc   : > { %s52_s19 = sadd.s32 1, %s6506_s14  ;;  %p50_p0 = scmp.eq.s32.totalorder %s49_s18, 0 }
   0xd   : > { %p59_p1 = scmp.ne.s32.totalorder %s6506_s14, %s6502_s13  ;;  %p60_p2 = scmp.eq.s32.totalorder %s6510_s15, 0 }
   0xe   : > { %p257_p3 = scmp.eq.s32.totalorder %s6593_s16, 1  ;;  %p4649_p6 = scmp.ge.s32.totalorder %s6510_s15, 1 }
   0xf   : > { %s6606_s20 = scalar_select %p50_p0, %s6506_s14, %s52_s19  }
  0x10   : > { %p6608_p4 = por %p60_p2, %p59_p1  ;;  %p6612_p5 = por %p257_p3, %p59_p1 }
  0x11   : > { %8982 = sst [smem:[#allocation18_spill]] %s6606_s20  ;;  %p270_p7 = scmp.lt.s32.totalorder %s6510_s15, 3 }
  0x12   : > { %s8983_s21 = scalar_select %p6608_p4, 1, 0 }
  0x13   : > { %s8984_s22 = scalar_select %p6612_p5, 1, 0 }
  0x14   : > { %p8715_p8 = scmp.eq.s32.totalorder %s6593_s16, 0  ;;  %p6619_p9 = pnand %p4649_p6, %p270_p7 }
  0x15   : > { %8985 = sst [smem:[#allocation19_spill]] %s8984_s22  ;;  %s6512_s24 = smov [#allocation7]  }
  0x16   : > { %s8986_s23 = scalar_select %p6619_p9, 1, 0 }
  0x17   : > { %p6181_p10 = pneg %p6619_p9  ;;  %s309_s25 = sshll.u32 %s6512_s24, 4  ;;  %s310_s25 = int_to_ptr.vmem [resolvable:$true] %s309_s25 }
  0x18   : > { %s8987_s0 = sld [smem:[#allocation157_spill]]  ;;  %s6513_s30 = smov [#allocation6]  }
  0x19   : > { %p6630_p11 = pnand %p8715_p8, %p6181_p10  ;;  %s6636_s11 = sshll.u32 %s6513_s30, 4  ;;  %s294_s11 = int_to_ptr.vmem [resolvable:$true] %s6636_s11 }
  0x1a   : > { %s8989_s4 = sld [smem:[#allocation159_spill]] }
  0x1b   : > { %p6646_p13 = pneg %p6630_p11 }
  0x1e   : > { %s283_s28 = sshll.u32 %s8987_s0, 4  ;;  %s6634_s28 = int_to_ptr.vmem [resolvable:$true] %s283_s28 }
  0x20   : > { %s6345_s19 = scalar_lea.hbm %s8989_s4, 4096 }
  0x21   : > { %p6346_p12 = scmp.ne.s32.totalorder %s8989_s4, %s6345_s19  ;;  %p6352_p2 = scmp.lt.u32.totalorder %s6345_s19, %s8989_s4 }
  0x23   : > { %p6348_p0 = pnand %p6646_p13, %p6346_p12 }
  0x25   : > { %p6349_p1 = pneg %p6348_p0 }
  0x27   : > { %p6354_p3 = pnand %p6352_p2, %p6349_p1 }
  0x29   : > { %6357 = shalt.err (!%p6354_p3)
}
  0x2a   : > { %s6358_s12 = scalar_lea.vmem %s310_s25, 4096  ;;  %p6366_p8 = scmp.lt.s32.totalorder %s310_s25, %s310_s25 }
  0x2b   : > { %p6359_p6 = scmp.ne.s32.totalorder %s310_s25, %s6358_s12  ;;  %p6367_p5 = scmp.lt.s32.totalorder %s6358_s12, %s6358_s12 }
  0x2d   : > { %p6361_p7 = pnand %p6359_p6, %p6646_p13  ;;  %p6368_p9 = por %p6367_p5, %p6366_p8 }
  0x2f   : > { %p6362_p10 = pneg %p6361_p7 }
  0x31   : > { %p6369_p4 = pnand %p6368_p9, %p6362_p10 }
  0x33   : > { %6372 = shalt.err (!%p6369_p4)
}
  0x34   : > { %s8717_s20 = smov 128   ;;  %s8719_s18 = smov 8  }
  0x35   : > { %6190 = dma.hbm_to_vmem [thread:$0]  (!%p6630_p11), %s8989_s4, 4096, %s310_s25, [#allocation8], %s8717_s20, %s8717_s20, %s8719_s18  }
  0x36   : > { %s6373_s27 = scalar_lea.vmem %s6634_s28, 64  ;;  %p6381_p8 = scmp.lt.s32.totalorder %s6634_s28, %s6634_s28 }
  0x37   : > { %p6374_p12 = scmp.ne.s32.totalorder %s6634_s28, %s6373_s27  ;;  %p6382_p9 = scmp.lt.s32.totalorder %s6373_s27, %s6373_s27 }
  0x39   : > { %p6376_p5 = pnand %p6374_p12, %p6646_p13  ;;  %p6383_p0 = por %p6382_p9, %p6381_p8 }
  0x3b   : > { %p6377_p4 = pneg %p6376_p5 }
  0x3d   : > { %p6384_p1 = pnand %p6383_p0, %p6377_p4 }
  0x3f   : > { %6387 = shalt.err (!%p6384_p1)
}
  0x40   : > { %s6516_s30 = smov [#allocation2]   ;;  %s8991_s2 = sld [smem:[#allocation158_spill]] }
  0x41   : > { %6184 = dma.vmem_to_smem (!%p6630_p11), %s6634_s28, 64, %s6516_s30, [#allocation4]  }
  0x46   : > { %s6388_s19 = scalar_lea.hbm %s8991_s2, 1792 }
  0x47   : > { %p6389_p2 = scmp.ne.s32.totalorder %s8991_s2, %s6388_s19  ;;  %p6395_p7 = scmp.lt.u32.totalorder %s6388_s19, %s8991_s2 }
  0x49   : > { %p6391_p3 = pnand %p6389_p2, %p6646_p13 }
  0x4b   : > { %p6392_p6 = pneg %p6391_p3 }
  0x4d   : > { %p6397_p10 = pnand %p6395_p7, %p6392_p6 }
  0x4f   : > { %6400 = shalt.err (!%p6397_p10)
}
  0x50   : > { %s6401_s0 = scalar_lea.vmem %s294_s11, 1792  ;;  %p6409_p8 = scmp.lt.s32.totalorder %s294_s11, %s294_s11 }
  0x51   : > { %p6402_p12 = scmp.ne.s32.totalorder %s294_s11, %s6401_s0  ;;  %p6410_p9 = scmp.lt.s32.totalorder %s6401_s0, %s6401_s0 }
  0x53   : > { %p6404_p5 = pnand %p6402_p12, %p6646_p13  ;;  %p6411_p0 = por %p6410_p9, %p6409_p8 }
  0x55   : > { %p6405_p4 = pneg %p6404_p5 }
  0x57   : > { %p6412_p1 = pnand %p6411_p0, %p6405_p4 }
  0x59   : > { %6415 = shalt.err (!%p6412_p1)
}
  0x5a   : > { %s8992_s28 = smov 8   ;;  %s8993_s20 = smov 128  }
  0x5b   : > { %6187 = dma.hbm_to_vmem [thread:$0]  (!%p6630_p11), %s8991_s2, 1792, %s294_s11, [#allocation3], %s8993_s20, %s8993_s20, %s8992_s28  }
  0x5c   : > { %s6517_s25 = smov [#allocation9]   ;;  %s6416_s0 = scalar_lea.hbm %s8710_s6, 2048 }
  0x5d   : > { %s325_s12 = sshll.u32 %s6517_s25, 4  ;;  %p6417_p2 = scmp.ne.s32.totalorder %s8710_s6, %s6416_s0  ;;  %s326_s12 = int_to_ptr.vmem [resolvable:$true] %s325_s12 }
  0x5e   : > { %p6423_p7 = scmp.lt.u32.totalorder %s6416_s0, %s8710_s6 }
  0x5f   : > { %p6419_p3 = pnand %p6417_p2, %p6646_p13 }
  0x61   : > { %p6420_p6 = pneg %p6419_p3 }
  0x63   : > { %p6425_p10 = pnand %p6423_p7, %p6420_p6 }
  0x65   : > { %6428 = shalt.err (!%p6425_p10)
}
  0x66   : > { %s6429_s11 = scalar_lea.vmem %s326_s12, 2048  ;;  %p6437_p8 = scmp.lt.s32.totalorder %s326_s12, %s326_s12 }
  0x67   : > { %p6430_p12 = scmp.ne.s32.totalorder %s326_s12, %s6429_s11  ;;  %p6438_p9 = scmp.lt.s32.totalorder %s6429_s11, %s6429_s11 }
  0x69   : > { %p6432_p5 = pnand %p6430_p12, %p6646_p13  ;;  %p6439_p0 = por %p6438_p9, %p6437_p8 }
  0x6b   : > { %p6433_p4 = pneg %p6432_p5 }
  0x6d   : > { %p6440_p1 = pnand %p6439_p0, %p6433_p4 }
  0x6f   : > { %6443 = shalt.err (!%p6440_p1)
}
  0x70   : > { %s6518_s4 = smov 256   ;;  %s6519_s18 = smov 16  }
  0x71   : > { %6193 = dma.hbm_to_vmem [thread:$0]  (!%p6630_p11), %s8710_s6, 2048, %s326_s12, [#allocation8], %s6518_s4, %s6518_s4, %s6519_s18  }
  0x72   : > { %s6520_s30 = smov [#allocation10]   ;;  %s6444_s0 = scalar_lea.hbm %s8712_s8, 256 }
  0x73   : > { %s341_s25 = sshll.u32 %s6520_s30, 4  ;;  %p6445_p2 = scmp.ne.s32.totalorder %s8712_s8, %s6444_s0  ;;  %s342_s25 = int_to_ptr.vmem [resolvable:$true] %s341_s25 }
  0x74   : > { %p6451_p7 = scmp.lt.u32.totalorder %s6444_s0, %s8712_s8 }
  0x75   : > { %p6447_p3 = pnand %p6445_p2, %p6646_p13 }
  0x77   : > { %p6448_p6 = pneg %p6447_p3 }
  0x79   : > { %p6453_p10 = pnand %p6451_p7, %p6448_p6 }
  0x7b   : > { %6456 = shalt.err (!%p6453_p10)
}
  0x7c   : > { %s6457_s12 = scalar_lea.vmem %s342_s25, 256  ;;  %p6465_p8 = scmp.lt.s32.totalorder %s342_s25, %s342_s25 }
  0x7d   : > { %p6458_p12 = scmp.ne.s32.totalorder %s342_s25, %s6457_s12  ;;  %p6466_p9 = scmp.lt.s32.totalorder %s6457_s12, %s6457_s12 }
  0x7f   : > { %p6460_p5 = pnand %p6458_p12, %p6646_p13  ;;  %p6467_p0 = por %p6466_p9, %p6465_p8 }
  0x81   : > { %p6461_p4 = pneg %p6460_p5 }
  0x83   : > { %p6468_p1 = pnand %p6467_p0, %p6461_p4 }
  0x85   : > { %6471 = shalt.err (!%p6468_p1)
}
  0x86   : > { %6196 = dma.hbm_to_vmem [thread:$0]  (!%p6630_p11), %s8712_s8, 256, %s342_s25, [#allocation11], %s8993_s20, %s8993_s20, %s8992_s28  }
  0x87   : > { %p4655_p2 = scmp.ge.s32.totalorder %s6510_s15, 2 }
  0x88   : > { %p8994_p13 = scmp.ne.s32.totalorder (!%p4655_p2), %s8983_s21, 0 }
  0x89   : > { %354 = sbr.rel (%p4655_p2) target bundleno = 156 (0x9c), region = 52 }
  0x90   : > { %357 = sbr.rel (!%p8994_p13) target bundleno = 156 (0x9c), region = 56  ;;  %s359_s26 = sand.u32 (%p8994_p13), 1, %s6506_s14  }
  0x91   : > { %s4791_s4 = sshll.u32 (%p8994_p13), %s6510_s15, 4  ;;  %s4656_s18 = sshll.u32 (%p8994_p13), %s359_s26, 7 }
  0x92   : > { %s6743_s17 = scalar_lea.vmem (%p8994_p13), %s8705_s1, %s4791_s4  ;;  %s361_s21 = scalar_lea.vmem (%p8994_p13), [#allocation5], %s4656_s18 }
  0x93   : > { %v377_v0 = vld [vmem:[%s6743_s17] sm:$0xff] (%p8994_p13)  ;;  %v379_v1 = vld [vmem:[%s6743_s17 + $0x8] sm:$0xff] (%p8994_p13) }
  0x94   : > { %v381_v2 = vld [vmem:[%s6743_s17 + $0x20] sm:$0xff] (%p8994_p13)  ;;  %378 = vst [vmem:[%s361_s21] sm:$0xff] (%p8994_p13), %v377_v0  ;;  %380 = vst [vmem:[%s361_s21 + $0x8] sm:$0xff] (%p8994_p13), %v379_v1  ;;  %v383_v3 = vld [vmem:[%s6743_s17 + $0x28] sm:$0xff] (%p8994_p13) }
  0x95   : > { %382 = vst [vmem:[%s361_s21 + $0x10] sm:$0xff] (%p8994_p13), %v381_v2  ;;  %v385_v4 = vld [vmem:[%s6743_s17 + $0x40] sm:$0xff] (%p8994_p13)  ;;  %v387_v5 = vld [vmem:[%s6743_s17 + $0x48] sm:$0xff] (%p8994_p13)  ;;  %384 = vst [vmem:[%s361_s21 + $0x18] sm:$0xff] (%p8994_p13), %v383_v3 }
  0x96   : > { %386 = vst [vmem:[%s361_s21 + $0x20] sm:$0xff] (%p8994_p13), %v385_v4  ;;  %388 = vst [vmem:[%s361_s21 + $0x28] sm:$0xff] (%p8994_p13), %v387_v5  ;;  %v389_v6 = vld [vmem:[%s6743_s17 + $0x60] sm:$0xff] (%p8994_p13)  ;;  %v391_v7 = vld [vmem:[%s6743_s17 + $0x68] sm:$0xff] (%p8994_p13) }
  0x97   : > { %v393_v8 = vld [vmem:[%s6743_s17 + $0x80] sm:$0xff]  ;;  %390 = vst [vmem:[%s361_s21 + $0x30] sm:$0xff] %v389_v6  ;;  %392 = vst [vmem:[%s361_s21 + $0x38] sm:$0xff] %v391_v7  ;;  %v395_v9 = vld [vmem:[%s6743_s17 + $0x88] sm:$0xff] }
  0x98   : > { %394 = vst [vmem:[%s361_s21 + $0x40] sm:$0xff] %v393_v8  ;;  %v397_v10 = vld [vmem:[%s6743_s17 + $0xa0] sm:$0xff]  ;;  %v399_v11 = vld [vmem:[%s6743_s17 + $0xa8] sm:$0xff]  ;;  %396 = vst [vmem:[%s361_s21 + $0x48] sm:$0xff] %v395_v9 }
  0x99   : > { %398 = vst [vmem:[%s361_s21 + $0x50] sm:$0xff] %v397_v10  ;;  %400 = vst [vmem:[%s361_s21 + $0x58] sm:$0xff] %v399_v11  ;;  %v401_v12 = vld [vmem:[%s6743_s17 + $0xc0] sm:$0xff]  ;;  %v403_v13 = vld [vmem:[%s6743_s17 + $0xc8] sm:$0xff] }
  0x9a   : > { %v405_v14 = vld [vmem:[%s6743_s17 + $0xe0] sm:$0xff]  ;;  %402 = vst [vmem:[%s361_s21 + $0x60] sm:$0xff] %v401_v12  ;;  %404 = vst [vmem:[%s361_s21 + $0x68] sm:$0xff] %v403_v13  ;;  %v407_v15 = vld [vmem:[%s6743_s17 + $0xe8] sm:$0xff] }
  0x9b   : > { %406 = vst [vmem:[%s361_s21 + $0x70] sm:$0xff] %v405_v14  ;;  %408 = vst [vmem:[%s361_s21 + $0x78] sm:$0xff] %v407_v15 }
  0x9c PF: > { %p8995_p11 = scmp.ne.s32.totalorder %s8986_s23, 0 }
  0x9e   : > { %417 = sbr.rel (%p8995_p11) target bundleno = 3203 (0xc83), region = 79 }
  0xa5   : > { %p8996_p3 = scmp.eq.s32.totalorder %s6593_s16, 0 }
  0xa7   : > { %6485 = dma.done.wait (%p8996_p3), [#allocation4], 64   ;;  %p8997_p6 = pmov %p8996_p3 }
  0xa8   : > { %s424_s15 = sand.u32 1, %s6502_s13   ;;  %p8998_p7 = pmov %p8996_p3 }
  0xa9   : > { %6487 = vsyncadd (%p8997_p6), [#allocation4], 4294967232  ;;  %s6768_s28 = sshll.u32 %s424_s15, 7 }
  0xaa   : > { %s6771_s20 = scalar_lea.vmem [#allocation5], %s6768_s28 }
  0xab   : > { %6489 = dma.done.wait (%p8998_p7), [#allocation3], 1792   ;;  %p8999_p10 = pmov %p8996_p3 }
  0xac   : > { %p9000_p12 = pmov %p8996_p3 }
  0xad   : > { %6491 = vsyncadd (%p8999_p10), [#allocation3], 4294965504 }
  0xae   : > { %6493 = dma.done.wait (%p9000_p12), [#allocation8], 6144   ;;  %p9001_p5 = pmov %p8996_p3 }
  0xaf   : > { %p9002_p4 = pmov %p8996_p3 }
  0xb0   : > { %6495 = vsyncadd (%p9001_p5), [#allocation8], 4294961152 }
  0xb1   : > { %6497 = dma.done.wait (%p9002_p4), [#allocation11], 256   ;;  %p9003_p8 = pmov %p8996_p3 }
  0xb3   : > { %6499 = vsyncadd (%p9003_p8), [#allocation11], 4294967040 }
  0xb4   : > { %446 = sfence }
  0xb5   : > { %s495_s13 = sld [smem:[#allocation2]]  ;;  %s4667_s23 = sld [smem:[#allocation2 + $0x1]]  ;;  %v8724_v16 = vmov 0.0   ;;  %v480_v17 = vld [vmem:[%s6771_s20 + $0x8] sm:$0xff]  ;;  %v482_v18 = vld [vmem:[%s6771_s20 + $0x18] sm:$0xff]  ;;  %v479_v19 = vld [vmem:[%s6771_s20] sm:$0xff] }
  0xb6   : > { %668 = vmatprep.mubr.f32.mxu0 %v8724_v16  ;;  %v481_v20 = vld [vmem:[%s6771_s20 + $0x10] sm:$0xff]  ;;  %v6790_v21 = vld [vmem:[#allocation6] sm:$0xff]  ;;  %v484_v24 = vld [vmem:[%s6771_s20 + $0x28] sm:$0xff]  ;;  %vm561_vm0 = vcmask 523264   ;;  %vm1495_vm1 = vcmask 261120   ;;  %vm1671_vm2 = vcmask 130048  }
  0xb7   : > { %v486_v25 = vld [vmem:[%s6771_s20 + $0x38] sm:$0xff]  ;;  %1266 = vxpose.xlu0.b32.start [1/8] (short) (narrow) %v6790_v21, 64  ;;  %v483_v34 = vld [vmem:[%s6771_s20 + $0x20] sm:$0xff]  ;;  %v485_v35 = vld [vmem:[%s6771_s20 + $0x30] sm:$0xff]  ;;  %s4706_s21 = sld [smem:[#allocation2 + $0x80]]  ;;  %s4707_s15 = sld [smem:[#allocation2 + $0x81]] }
  0xb8   : > { %v6809_v36 = vld [vmem:[#allocation6 + $0x40] sm:$0xff]  ;;  %v6813_v41 = vld [vmem:[#allocation6 + $0x8] sm:$0xff]  ;;  %v490_v47 = vld [vmem:[%s6771_s20 + $0x58] sm:$0xff]  ;;  %s4746_s11 = sld [smem:[#allocation2 + $0x100]]  ;;  %s4747_s12 = sld [smem:[#allocation2 + $0x101]] }
  0xb9   : > { %1463 = vxpose.xlu1.b32.start [1/4] (short) (narrow) %v6809_v36, 64  ;;  %v488_v46 = vld [vmem:[%s6771_s20 + $0x48] sm:$0xff]  ;;  %v487_v52 = vld [vmem:[%s6771_s20 + $0x40] sm:$0xff]  ;;  %v489_v57 = vld [vmem:[%s6771_s20 + $0x50] sm:$0xff]  ;;  %s8654_s17 = scalar_lea.vmem [#allocation12], %s6768_s28  ;;  %s9360_s28 = sld [smem:[#allocation19_spill]] }
  0xba   : > { %v492_v62 = vld [vmem:[%s6771_s20 + $0x68] sm:$0xff]  ;;  %v494_v63 = vld [vmem:[%s6771_s20 + $0x78] sm:$0xff]  ;;  %v6834_v4 = vld [vmem:[#allocation6 + $0x10] sm:$0xff] }
  0xbb   : > { %v6792_v22 = vstv %s495_s13  ;;  %v6794_v23 = vstv %s4667_s23  ;;  %1267 = vxpose.xlu0.b32.cont [2/8] (short) (narrow) %v6813_v41, 64  ;;  %v491_v9 = vld [vmem:[%s6771_s20 + $0x60] sm:$0xff]  ;;  %v493_v10 = vld [vmem:[%s6771_s20 + $0x70] sm:$0xff]  ;;  %v6844_v15 = vld [vmem:[#allocation6 + $0x48] sm:$0xff] }
  0xbc   : > { %v499_v26 = vmul.f32 %v6792_v22, %v480_v17  ;;  %v501_v27 = vmul.f32 %v6792_v22, %v482_v18  ;;  %v516_v28 = vmul.f32 %v6794_v23, %v480_v17  ;;  %v518_v29 = vmul.f32 %v6794_v23, %v482_v18 }
  0xbd   : > { %v498_v30 = vmul.f32 %v6792_v22, %v479_v19  ;;  %v500_v31 = vmul.f32 %v6792_v22, %v481_v20  ;;  %v515_v32 = vmul.f32 %v6794_v23, %v479_v19  ;;  %v517_v33 = vmul.f32 %v6794_v23, %v481_v20  ;;  %1464 = vxpose.xlu1.b32.cont [2/4] (short) (narrow) %v6844_v15, 64 }
  0xbe   : > { %v532_v37 = vadd.f32 %v516_v28, %v499_v26  ;;  %v534_v38 = vadd.f32 %v518_v29, %v501_v27  ;;  %v503_v39 = vmul.f32 %v6792_v22, %v484_v24  ;;  %v505_v40 = vmul.f32 %v6792_v22, %v486_v25  ;;  %v6852_v28 = vld [vmem:[#allocation6 + $0x18] sm:$0xff] }
  0xbf   : > { %v531_v42 = vadd.f32 %v515_v32, %v498_v30  ;;  %v533_v43 = vadd.f32 %v517_v33, %v500_v31  ;;  %v520_v44 = vmul.f32 %v6794_v23, %v484_v24  ;;  %v522_v45 = vmul.f32 %v6794_v23, %v486_v25  ;;  %1268 = vxpose.xlu0.b32.cont [3/8] (short) (narrow) %v6834_v4, 64  ;;  %p9361_p9 = scmp.ne.s32.totalorder %s9360_s28, 0 }
  0xc0   : > { %v5213_v48 = vpack.c.bf16 %v534_v38, %v532_v37  ;;  %v502_v49 = vmul.f32 %v6792_v22, %v483_v34  ;;  %v504_v50 = vmul.f32 %v6792_v22, %v485_v35  ;;  %v519_v51 = vmul.f32 %v6794_v23, %v483_v34  ;;  %v6856_v34 = vld [vmem:[#allocation6 + $0x50] sm:$0xff]  ;;  %s9362_s23 = sld [smem:[#allocation160_spill]] (%p9361_p9) }
  0xc1   : > { %v5215_v53 = vpack.c.bf16 %v533_v43, %v531_v42  ;;  %v536_v54 = vadd.f32 %v520_v44, %v503_v39  ;;  %v538_v55 = vadd.f32 %v522_v45, %v505_v40  ;;  %v521_v56 = vmul.f32 %v6794_v23, %v485_v35  ;;  %v754_v35 = vld [vmem:[%s8707_s3 + $0x8] sm:$0xff]  ;;  %1465 = vxpose.xlu1.b32.cont [3/4] (short) (narrow) %v6856_v34, 64  ;;  %v6865_v39 = vld [vmem:[#allocation6 + $0x20] sm:$0xff]  ;;  %v755_v43 = vld [vmem:[%s8707_s3 + $0x10] sm:$0xff] }
  0xc2   : > { %5214 = vmatprep.subr.bf16.mxu0 %v5213_v48  ;;  %v535_v58 = vadd.f32 %v519_v51, %v502_v49  ;;  %v507_v59 = vmul.f32 %v6792_v22, %v488_v46  ;;  %v509_v60 = vmul.f32 %v6792_v22, %v490_v47  ;;  %v524_v61 = vmul.f32 %v6794_v23, %v488_v46  ;;  %v753_v42 = vld [vmem:[%s8707_s3] sm:$0xff]  ;;  %v6875_v44 = vld [vmem:[#allocation6 + $0x58] sm:$0xff]  ;;  %v758_v45 = vld [vmem:[%s8707_s3 + $0x28] sm:$0xff] }
  0xc3   : > { %5216 = vmatpush1.bf16.msra.mxu0 %v5215_v53  ;;  %v5217_v0 = vpack.c.bf16 %v538_v55, %v536_v54  ;;  %v537_v1 = vadd.f32 %v521_v56, %v504_v50  ;;  %v526_v2 = vmul.f32 %v6794_v23, %v490_v47  ;;  %v506_v3 = vmul.f32 %v6792_v22, %v487_v52  ;;  %v760_v46 = vld [vmem:[%s8707_s3 + $0x38] sm:$0xff]  ;;  %v6887_v48 = vld [vmem:[#allocation6 + $0x28] sm:$0xff]  ;;  %v757_v50 = vld [vmem:[%s8707_s3 + $0x20] sm:$0xff] }
  0xc4   : > { %v540_v5 = vadd.f32 %v524_v61, %v507_v59  ;;  %v508_v6 = vmul.f32 %v6792_v22, %v489_v57  ;;  %v523_v7 = vmul.f32 %v6794_v23, %v487_v52  ;;  %v525_v8 = vmul.f32 %v6794_v23, %v489_v57  ;;  %1269 = vxpose.xlu0.b32.cont [4/8] (short) (narrow) %v6852_v28, 64  ;;  %v759_v51 = vld [vmem:[%s8707_s3 + $0x30] sm:$0xff]  ;;  %v762_v52 = vld [vmem:[%s8707_s3 + $0x48] sm:$0xff]  ;;  %v764_v53 = vld [vmem:[%s8707_s3 + $0x58] sm:$0xff] }
  0xc5   : > { %5218 = vmatprep.subr.bf16.mxu0 %v5217_v0  ;;  %v5219_v11 = vpack.c.bf16 %v537_v1, %v535_v58  ;;  %v542_v12 = vadd.f32 %v526_v2, %v509_v60  ;;  %v511_v13 = vmul.f32 %v6792_v22, %v492_v62  ;;  %v513_v14 = vmul.f32 %v6792_v22, %v494_v63  ;;  %v6911_v55 = vld [vmem:[#allocation6 + $0x30] sm:$0xff]  ;;  %v761_v57 = vld [vmem:[%s8707_s3 + $0x40] sm:$0xff]  ;;  %v766_v58 = vld [vmem:[%s8707_s3 + $0x68] sm:$0xff] }
  0xc6   : > { %v539_v17 = vadd.f32 %v523_v7, %v506_v3  ;;  %v541_v18 = vadd.f32 %v525_v8, %v508_v6  ;;  %v528_v19 = vmul.f32 %v6794_v23, %v492_v62  ;;  %v530_v20 = vmul.f32 %v6794_v23, %v494_v63  ;;  %1466 = vxpose.xlu1.b32.end [4/4] (short) (narrow) %v6875_v44, 64  ;;  %v768_v59 = vld [vmem:[%s8707_s3 + $0x78] sm:$0xff]  ;;  %v765_v63 = vld [vmem:[%s8707_s3 + $0x60] sm:$0xff]  ;;  %v767_v0 = vld [vmem:[%s8707_s3 + $0x70] sm:$0xff] }
  0xc7   : > { %5220 = vmatpush1.bf16.msra.mxu0 %v5219_v11  ;;  %v5221_v24 = vpack.c.bf16 %v542_v12, %v540_v5  ;;  %v510_v25 = vmul.f32 %v6792_v22, %v491_v9  ;;  %v512_v26 = vmul.f32 %v6792_v22, %v493_v10  ;;  %v527_v27 = vmul.f32 %v6794_v23, %v491_v9  ;;  %v756_v22 = vld [vmem:[%s8707_s3 + $0x18] sm:$0xff]  ;;  %v769_v5 = vld [vmem:[%s8707_s3 + $0x80] sm:$0xff]  ;;  %v771_v6 = vld [vmem:[%s8707_s3 + $0x90] sm:$0xff] }
  0xc8   : > { %v5223_v29 = vpack.c.bf16 %v541_v18, %v539_v17  ;;  %v544_v30 = vadd.f32 %v528_v19, %v511_v13  ;;  %v546_v31 = vadd.f32 %v530_v20, %v513_v14  ;;  %v529_v32 = vmul.f32 %v6794_v23, %v493_v10  ;;  %1270 = vxpose.xlu0.b32.cont [5/8] (short) (narrow) %v6865_v39, 64  ;;  %v554_v61 = vld [vmem:[#allocation6 + $0x38] sm:$0xff]  ;;  %v6974_v8 = vld [vmem:[#allocation6 + $0x60] sm:$0xff]  ;;  %v775_v12 = vld [vmem:[%s8707_s3 + $0xb0] sm:$0xff] }
  0xc9   : > { %5222 = vmatprep.subr.bf16.mxu0 %v5221_v24  ;;  %v543_v33 = vadd.f32 %v527_v27, %v510_v25  ;;  %v6867_v40 = vpack.c.bf16 %v756_v22, %v754_v35  ;;  %v6885_v47 = vpack.c.bf16 %v755_v43, %v753_v42  ;;  %v6890_v49 = vpack.c.bf16 %v760_v46, %v758_v45  ;;  %v772_v1 = vld [vmem:[%s8707_s3 + $0x98] sm:$0xff]  ;;  %v773_v11 = vld [vmem:[%s8707_s3 + $0xa0] sm:$0xff]  ;;  %v778_v13 = vld [vmem:[%s8707_s3 + $0xc8] sm:$0xff] }
  0xca   : > { %v5225_v37 = vpack.c.bf16 %v546_v31, %v544_v30  ;;  %v545_v38 = vadd.f32 %v529_v32, %v512_v26  ;;  %v6909_v54 = vpack.c.bf16 %v759_v51, %v757_v50  ;;  %v6914_v56 = vpack.c.bf16 %v764_v53, %v762_v52  ;;  %v776_v7 = vld [vmem:[%s8707_s3 + $0xb8] sm:$0xff]  ;;  %v6998_v17 = vld [vmem:[#allocation6 + $0x68] sm:$0xff]  ;;  %v777_v20 = vld [vmem:[%s8707_s3 + $0xc0] sm:$0xff] }
  0xcb   : > { %5224 = vmatpush1.bf16.msra.mxu0 %v5223_v29  ;;  %v6936_v62 = vpack.c.bf16 %v768_v59, %v766_v58  ;;  %v6954_v2 = vpack.c.bf16 %v767_v0, %v765_v63  ;;  %v6977_v9 = vpack.c.bf16 %v771_v6, %v769_v5  ;;  %v780_v14 = vld [vmem:[%s8707_s3 + $0xd8] sm:$0xff]  ;;  %v7001_v18 = vpack.c.bf16 %v775_v12, %v773_v11  ;;  %v779_v24 = vld [vmem:[%s8707_s3 + $0xd0] sm:$0xff]  ;;  %v782_v25 = vld [vmem:[%s8707_s3 + $0xe8] sm:$0xff] }
  0xcc   : > { %5226 = vmatprep.subr.bf16.mxu0 %v5225_v37  ;;  %v5227_v23 = vpack.c.bf16 %v545_v38, %v543_v33  ;;  %1271 = vxpose.xlu0.b32.cont [6/8] (short) (narrow) %v6887_v48, 64  ;;  %9004 = vst [vmem:[#allocation20_spill] sm:$0xff] %v6909_v54  ;;  %9005 = vst [vmem:[#allocation21_spill] sm:$0xff] %v6914_v56  ;;  %v7004_v19 = vpack.c.bf16 %v780_v14, %v778_v13  ;;  %v784_v26 = vld [vmem:[%s8707_s3 + $0xf8] sm:$0xff]  ;;  %v781_v29 = vld [vmem:[%s8707_s3 + $0xe0] sm:$0xff] }
  0xcd   : > { %9007 = vst [vmem:[#allocation23_spill] sm:$0xff] %v6936_v62  ;;  %9008 = vst [vmem:[#allocation24_spill] sm:$0xff] %v6954_v2  ;;  %v7023_v27 = vpack.c.bf16 %v779_v24, %v777_v20  ;;  %v783_v30 = vld [vmem:[%s8707_s3 + $0xf0] sm:$0xff]  ;;  %v786_v31 = vld [vmem:[%s8707_s3 + $0x108] sm:$0xff] }
  0xce   : > { %9010 = vst [vmem:[#allocation26_spill] sm:$0xff] %v6977_v9  ;;  %9012 = vst [vmem:[#allocation28_spill] sm:$0xff] %v7001_v18  ;;  %v788_v32 = vld [vmem:[%s8707_s3 + $0x118] sm:$0xff]  ;;  %v7044_v33 = vpack.c.bf16 %v783_v30, %v781_v29  ;;  %v785_v22 = vld [vmem:[%s8707_s3 + $0x100] sm:$0xff] }
  0xcf   : > { %5228 = vmatpush1.bf16.msra.mxu0 %v5227_v23  ;;  %9013 = vst [vmem:[#allocation29_spill] sm:$0xff] %v7004_v19  ;;  %9014 = vst [vmem:[#allocation30_spill] sm:$0xff] %v7023_v27  ;;  %v7047_v35 = vpack.c.bf16 %v788_v32, %v786_v31  ;;  %v787_v37 = vld [vmem:[%s8707_s3 + $0x110] sm:$0xff]  ;;  %v790_v38 = vld [vmem:[%s8707_s3 + $0x128] sm:$0xff] }
  0xd0   : > { %5230 = vmatprep.subr.bf16.mxu0 %v6867_v40  ;;  %1272 = vxpose.xlu0.b32.cont [7/8] (short) (narrow) %v6911_v55, 64  ;;  %9016 = vst [vmem:[#allocation32_spill] sm:$0xff] %v7044_v33  ;;  %v792_v23 = vld [vmem:[%s8707_s3 + $0x138] sm:$0xff]  ;;  %v789_v43 = vld [vmem:[%s8707_s3 + $0x120] sm:$0xff]  ;;  %v791_v45 = vld [vmem:[%s8707_s3 + $0x130] sm:$0xff] }
  0xd1   : > { %9017 = vst [vmem:[#allocation33_spill] sm:$0xff] %v7047_v35  ;;  %v7067_v42 = vpack.c.bf16 %v792_v23, %v790_v38  ;;  %v794_v46 = vld [vmem:[%s8707_s3 + $0x148] sm:$0xff]  ;;  %v7085_v50 = vpack.c.bf16 %v791_v45, %v789_v43  ;;  %v793_v52 = vld [vmem:[%s8707_s3 + $0x140] sm:$0xff]  ;;  %v795_v53 = vld [vmem:[%s8707_s3 + $0x150] sm:$0xff] }
  0xd2   : > { %4668 = vmatmul.mubr.msk.f32.vlgmr.msra.gmra.mrb[0].mxu0 %vm561_vm0, %v6790_v21  ;;  %v763_v21 = vld [vmem:[%s8707_s3 + $0x50] sm:$0xff]  ;;  %v797_v58 = vld [vmem:[%s8707_s3 + $0x160] sm:$0xff]  ;;  %v808_v5 = vld [vmem:[%s8707_s3 + $0x1b8] sm:$0xff] }
  0xd3   : > { %674 = vmatprep.mubr.f32.mxu0 %v8724_v16  ;;  %5232 = vmatpush1.bf16.msra.mxu0 %v6885_v47  ;;  %v6933_v60 = vpack.c.bf16 %v763_v21, %v761_v57  ;;  %9019 = vst [vmem:[#allocation35_spill] sm:$0xff] %v7067_v42  ;;  %9020 = vst [vmem:[#allocation36_spill] sm:$0xff] %v7085_v50  ;;  %v7106_v57 = vpack.c.bf16 %v795_v53, %v793_v52  ;;  %v799_v59 = vld [vmem:[%s8707_s3 + $0x170] sm:$0xff]  ;;  %v812_v12 = vld [vmem:[%s8707_s3 + $0x1d8] sm:$0xff] }
  0xd4   : > { %5234 = vmatprep.subr.bf16.mxu0 %v6890_v49  ;;  %1273 = vxpose.xlu0.b32.end [8/8] (short) (narrow) %v554_v61, 64  ;;  %v7127_v63 = vpack.c.bf16 %v799_v59, %v797_v58  ;;  %v807_v11 = vld [vmem:[%s8707_s3 + $0x1b0] sm:$0xff]  ;;  %v809_v20 = vld [vmem:[%s8707_s3 + $0x1c0] sm:$0xff]  ;;  %v1064_v23 = vld [vmem:[%s8709_s5 + $0x88] sm:$0xff] }
  0xd5   : > { %9006 = vst [vmem:[#allocation22_spill] sm:$0xff] %v6933_v60  ;;  %9022 = vst [vmem:[#allocation38_spill] sm:$0xff] %v7106_v57  ;;  %v811_v24 = vld [vmem:[%s8707_s3 + $0x1d0] sm:$0xff]  ;;  %v813_v30 = vld [vmem:[%s8707_s3 + $0x1e0] sm:$0xff] }
  0xd6   : > { %4669 = vmatmul.mubr.msk.f32.gmra.mrb[2].mxu0 %vm561_vm0, %v6813_v41  ;;  %v770_v41 = vld [vmem:[%s8707_s3 + $0x88] sm:$0xff]  ;;  %9024 = vst [vmem:[#allocation40_spill] sm:$0xff] %v7127_v63  ;;  %v946_v32 = vld [vmem:[#allocation7 + $0x80] sm:$0xff]  ;;  %v1063_v38 = vld [vmem:[%s8709_s5 + $0x80] sm:$0xff] }
  0xd7   : > { %680 = vmatprep.mubr.f32.mxu0 %v8724_v16  ;;  %5236 = vmatpush1.bf16.msra.mxu0 %v6909_v54  ;;  %v6957_v3 = vpack.c.bf16 %v772_v1, %v770_v41  ;;  %v801_v41 = vld [vmem:[%s8707_s3 + $0x180] sm:$0xff]  ;;  %v803_v1 = vld [vmem:[%s8707_s3 + $0x190] sm:$0xff]  ;;  %v7214_v43 = vpack.c.bf16 %v1064_v23, %v1063_v38  ;;  %v1066_v53 = vld [vmem:[%s8709_s5 + $0x98] sm:$0xff] }
  0xd8   : > { %5238 = vmatprep.subr.bf16.mxu0 %v6914_v56  ;;  %1639 = vxpose.xlu1.b32.start [1/2] (short) (narrow) %v6974_v8, 64  ;;  %v7148_v6 = vpack.c.bf16 %v803_v1, %v801_v41  ;;  %v1047_v45 = vld [vmem:[%s8709_s5] sm:$0xff]  ;;  %v1065_v52 = vld [vmem:[%s8709_s5 + $0x90] sm:$0xff]  ;;  %v1050_v58 = vld [vmem:[%s8709_s5 + $0x18] sm:$0xff] }
  0xd9   : > { %9009 = vst [vmem:[#allocation25_spill] sm:$0xff] %v6957_v3  ;;  %9034 = vst [vmem:[#allocation50_spill] sm:$0xff] %v7214_v43  ;;  %5326 = vmatprep.subr.bf16.mxu1 %v7214_v43  ;;  %v1067_v59 = vld [vmem:[%s8709_s5 + $0xa0] sm:$0xff]  ;;  %v1074_v38 = vld [vmem:[%s8709_s5 + $0xd8] sm:$0xff] }
  0xda   : > { %4670 = vmatmul.mubr.msk.f32.gmra.mrb[4].mxu0 %vm561_vm0, %v6834_v4  ;;  %v774_v4 = vld [vmem:[%s8707_s3 + $0xa8] sm:$0xff]  ;;  %9026 = vst [vmem:[#allocation42_spill] sm:$0xff] %v7148_v6  ;;  %v1051_v1 = vld [vmem:[%s8709_s5 + $0x20] sm:$0xff] }
  0xdb   : > { %686 = vmatprep.mubr.f32.mxu0 %v8724_v16  ;;  %5240 = vmatpush1.bf16.msra.mxu0 %v6933_v60  ;;  %v6980_v10 = vpack.c.bf16 %v776_v7, %v774_v4  ;;  %v805_v7 = vld [vmem:[%s8707_s3 + $0x1a0] sm:$0xff] }
  0xdc   : > { %5242 = vmatprep.subr.bf16.mxu0 %v6936_v62  ;;  %1640 = vxpose.xlu1.b32.end [2/2] (short) (narrow) %v6998_v17, 64  ;;  %v7169_v13 = vpack.c.bf16 %v807_v11, %v805_v7  ;;  %v1070_v7 = vld [vmem:[%s8709_s5 + $0xb8] sm:$0xff] }
  0xdd   : > { %9011 = vst [vmem:[#allocation27_spill] sm:$0xff] %v6980_v10 }
  0xde   : > { %4671 = vmatmul.mubr.msk.f32.gmra.mrb[6].mxu0 %vm561_vm0, %v6852_v28  ;;  %v7026_v28 = vpack.c.bf16 %v784_v26, %v782_v25  ;;  %9028 = vst [vmem:[#allocation44_spill] sm:$0xff] %v7169_v13  ;;  %v816_v25 = vld [vmem:[%s8707_s3 + $0x1f8] sm:$0xff]  ;;  %v7189_v26 = vpack.c.bf16 %v811_v24, %v809_v20  ;;  %v1071_v24 = vld [vmem:[%s8709_s5 + $0xc0] sm:$0xff] }
  0xdf   : > { %692 = vmatprep.mubr.f32.mxu0 %v8724_v16  ;;  %5244 = vmatpush1.bf16.msra.mxu0 %v6954_v2  ;;  %v1054_v20 = vld [vmem:[%s8709_s5 + $0x38] sm:$0xff] }
  0xe0   : > { %5246 = vmatprep.subr.bf16.mxu0 %v6957_v3  ;;  %9015 = vst [vmem:[#allocation31_spill] sm:$0xff] %v7026_v28  ;;  %9030 = vst [vmem:[#allocation46_spill] sm:$0xff] %v7189_v26 }
  0xe2   : > { %4672 = vmatmul.mubr.msk.f32.gmra.mrb[8].mxu0 %vm561_vm0, %v6865_v39  ;;  %v7064_v39 = vpack.c.bf16 %v787_v37, %v785_v22  ;;  %v947_v22 = vld [vmem:[#allocation7 + $0x88] sm:$0xff] }
  0xe3   : > { %698 = vmatprep.mubr.f32.mxu0 %v8724_v16  ;;  %5248 = vmatpush1.bf16.msra.mxu0 %v6977_v9  ;;  %v7205_v37 = vpack.c.bf16 %v947_v22, %v946_v32  ;;  %v1056_v32 = vld [vmem:[%s8709_s5 + $0x48] sm:$0xff]  ;;  %v1073_v22 = vld [vmem:[%s8709_s5 + $0xd0] sm:$0xff] }
  0xe4   : > { %5250 = vmatprep.subr.bf16.mxu0 %v6980_v10  ;;  %9018 = vst [vmem:[#allocation34_spill] sm:$0xff] %v7064_v39 }
  0xe5   : > { %9033 = vst [vmem:[#allocation49_spill] sm:$0xff] %v7205_v37 }
  0xe6   : > { %4673 = vmatmul.mubr.msk.f32.gmra.mrb[10].mxu0 %vm561_vm0, %v6887_v48  ;;  %v796_v48 = vld [vmem:[%s8707_s3 + $0x158] sm:$0xff] }
  0xe7   : > { %704 = vmatprep.mubr.f32.mxu0 %v8724_v16  ;;  %5252 = vmatpush1.bf16.msra.mxu0 %v7001_v18  ;;  %v7088_v51 = vpack.c.bf16 %v796_v48, %v794_v46  ;;  %v1048_v46 = vld [vmem:[%s8709_s5 + $0x8] sm:$0xff] }
  0xe8   : > { %5254 = vmatprep.subr.bf16.mxu0 %v7004_v19  ;;  %v7222_v48 = vpack.c.bf16 %v1048_v46, %v1047_v45  ;;  %v7303_v45 = vpack.c.bf16 %v1074_v38, %v1073_v22  ;;  %v1057_v46 = vld [vmem:[%s8709_s5 + $0x50] sm:$0xff]  ;;  %v948_v22 = vld [vmem:[#allocation7 + $0x90] sm:$0xff]  ;;  %v949_v38 = vld [vmem:[#allocation7 + $0x98] sm:$0xff] }
  0xe9   : > { %9021 = vst [vmem:[#allocation37_spill] sm:$0xff] %v7088_v51 }
  0xea   : > { %4674 = vmatmul.mubr.msk.f32.gmra.mrb[12].mxu0 %vm561_vm0, %v6911_v55  ;;  %v800_v55 = vld [vmem:[%s8707_s3 + $0x178] sm:$0xff]  ;;  %9035 = vst [vmem:[#allocation51_spill] sm:$0xff] %v7222_v48  ;;  %5328 = vmatpush3.bf16.msra.mxu1 %v7222_v48  ;;  %9044 = vst [vmem:[#allocation60_spill] sm:$0xff] %v7303_v45  ;;  %v1831_v48 = vld [vmem:[%s8713_s9 + $0xf0] sm:$0xff] }
  0xeb   : > { %710 = vmatprep.mubr.f32.mxu0 %v8724_v16  ;;  %5256 = vmatpush1.bf16.msra.mxu0 %v7023_v27 }
  0xec   : > { %5258 = vmatprep.subr.bf16.mxu0 %v7026_v28 }
  0xee   : > { %4675 = vmatmul.mubr.msk.f32.gmra.mrb[14].mxu0 %vm561_vm0, %v554_v61  ;;  %v804_v61 = vld [vmem:[%s8707_s3 + $0x198] sm:$0xff] }
  0xef   : > { %716 = vmatprep.mubr.f32.mxu0 %v8724_v16  ;;  %5260 = vmatpush1.bf16.msra.mxu0 %v7044_v33 }
  0xf0   : > { %5262 = vmatprep.subr.bf16.mxu0 %v7047_v35 }
  0xf2   : > { %4676 = vmatmul.mubr.msk.f32.gmra.mrb[16].mxu0 %vm561_vm0, %v6809_v36  ;;  %v798_v36 = vld [vmem:[%s8707_s3 + $0x168] sm:$0xff] }
  0xf3   : > { %722 = vmatprep.mubr.f32.mxu0 %v8724_v16  ;;  %5264 = vmatpush1.bf16.msra.mxu0 %v7064_v39  ;;  %v7109_v21 = vpack.c.bf16 %v800_v55, %v798_v36  ;;  %v1049_v36 = vld [vmem:[%s8709_s5 + $0x10] sm:$0xff]  ;;  %v7235_v55 = vpack.c.bf16 %v1066_v53, %v1065_v52  ;;  %v1058_v52 = vld [vmem:[%s8709_s5 + $0x58] sm:$0xff]  ;;  %v1075_v53 = vld [vmem:[%s8709_s5 + $0xe0] sm:$0xff] }
  0xf4   : > { %5266 = vmatprep.subr.bf16.mxu0 %v7067_v42 }
  0xf5   : > { %9023 = vst [vmem:[#allocation39_spill] sm:$0xff] %v7109_v21  ;;  %9036 = vst [vmem:[#allocation52_spill] sm:$0xff] %v7235_v55  ;;  %5330 = vmatprep.subr.bf16.mxu1 %v7235_v55  ;;  %v1829_v55 = vld [vmem:[%s8713_s9 + $0xe0] sm:$0xff] }
  0xf6   : > { %4677 = vmatmul.mubr.msk.f32.gmra.mrb[18].mxu0 %vm561_vm0, %v6844_v15  ;;  %v802_v15 = vld [vmem:[%s8707_s3 + $0x188] sm:$0xff] }
  0xf7   : > { %728 = vmatprep.mubr.f32.mxu0 %v8724_v16  ;;  %5268 = vmatpush1.bf16.msra.mxu0 %v7085_v50  ;;  %v7130_v0 = vpack.c.bf16 %v804_v61, %v802_v15  ;;  %v1068_v15 = vld [vmem:[%s8709_s5 + $0xa8] sm:$0xff]  ;;  %v7246_v61 = vpack.c.bf16 %v1050_v58, %v1049_v36  ;;  %v7318_v58 = vpack.c.bf16 %v1058_v52, %v1057_v46 }
  0xf8   : > { %5270 = vmatprep.subr.bf16.mxu0 %v7088_v51  ;;  %v7248_v41 = vpack.c.bf16 %v1068_v15, %v1067_v59  ;;  %v1076_v36 = vld [vmem:[%s8709_s5 + $0xe8] sm:$0xff]  ;;  %v1059_v15 = vld [vmem:[%s8709_s5 + $0x60] sm:$0xff] }
  0xf9   : > { %9025 = vst [vmem:[#allocation41_spill] sm:$0xff] %v7130_v0  ;;  %9037 = vst [vmem:[#allocation53_spill] sm:$0xff] %v7246_v61  ;;  %5332 = vmatpush3.bf16.msra.mxu1 %v7246_v61  ;;  %v7321_v59 = vpack.c.bf16 %v1076_v36, %v1075_v53  ;;  %v7354_v36 = vpack.c.bf16 %v949_v38, %v948_v22  ;;  %v952_v22 = vld [vmem:[#allocation7 + $0xb0] sm:$0xff]  ;;  %v953_v38 = vld [vmem:[#allocation7 + $0xb8] sm:$0xff] }
  0xfa   : > { %4678 = vmatmul.mubr.msk.f32.gmra.mrb[20].mxu0 %vm561_vm0, %v6856_v34  ;;  %v806_v34 = vld [vmem:[%s8707_s3 + $0x1a8] sm:$0xff]  ;;  %9038 = vst [vmem:[#allocation54_spill] sm:$0xff] %v7248_v41  ;;  %5334 = vmatprep.subr.bf16.mxu1 %v7248_v41  ;;  %9045 = vst [vmem:[#allocation61_spill] sm:$0xff] %v7318_v58 }
  0xfb   : > { %734 = vmatprep.mubr.f32.mxu0 %v8724_v16  ;;  %5272 = vmatpush1.bf16.msra.mxu0 %v7106_v57  ;;  %v7151_v4 = vpack.c.bf16 %v808_v5, %v806_v34  ;;  %v1052_v34 = vld [vmem:[%s8709_s5 + $0x28] sm:$0xff]  ;;  %v1069_v5 = vld [vmem:[%s8709_s5 + $0xb0] sm:$0xff]  ;;  %9046 = vst [vmem:[#allocation62_spill] sm:$0xff] %v7321_v59  ;;  %9051 = vst [vmem:[#allocation67_spill] sm:$0xff] %v7354_v36 }
  0xfc   : > { %5274 = vmatprep.subr.bf16.mxu0 %v7109_v21  ;;  %v7264_v11 = vpack.c.bf16 %v1052_v34, %v1051_v1  ;;  %v1060_v1 = vld [vmem:[%s8709_s5 + $0x68] sm:$0xff]  ;;  %v1077_v34 = vld [vmem:[%s8709_s5 + $0xf0] sm:$0xff] }
  0xfd   : > { %9027 = vst [vmem:[#allocation43_spill] sm:$0xff] %v7151_v4  ;;  %v1814_v41 = vld [vmem:[%s8713_s9 + $0x68] sm:$0xff] }
  0xfe   : > { %4679 = vmatmul.mubr.msk.f32.gmra.mrb[22].mxu0 %vm561_vm0, %v6875_v44  ;;  %v810_v44 = vld [vmem:[%s8707_s3 + $0x1c8] sm:$0xff]  ;;  %9039 = vst [vmem:[#allocation55_spill] sm:$0xff] %v7264_v11  ;;  %5336 = vmatpush3.bf16.msra.mxu1 %v7264_v11 }
  0xff   : > { %740 = vmatprep.mubr.f32.mxu0 %v8724_v16  ;;  %5276 = vmatpush1.bf16.msra.mxu0 %v7127_v63  ;;  %v7172_v14 = vpack.c.bf16 %v812_v12, %v810_v44  ;;  %v7267_v44 = vpack.c.bf16 %v1070_v7, %v1069_v5  ;;  %v1053_v12 = vld [vmem:[%s8709_s5 + $0x30] sm:$0xff]  ;;  %v1078_v5 = vld [vmem:[%s8709_s5 + $0xf8] sm:$0xff]  ;;  %v7336_v7 = vpack.c.bf16 %v1060_v1, %v1059_v15  ;;  %v932_v15 = vld [vmem:[#allocation7 + $0x10] sm:$0xff] }
 0x100   : > { %5278 = vmatprep.subr.bf16.mxu0 %v7130_v0  ;;  %v933_v1 = vld [vmem:[#allocation7 + $0x18] sm:$0xff] }
 0x101   : > { %9029 = vst [vmem:[#allocation45_spill] sm:$0xff] %v7172_v14  ;;  %9040 = vst [vmem:[#allocation56_spill] sm:$0xff] %v7267_v44  ;;  %5338 = vmatprep.subr.bf16.mxu1 %v7267_v44  ;;  %v945_v11 = vld [vmem:[#allocation7 + $0x78] sm:$0xff] }
 0x102   : > { %4680 = vmatmul.mubr.msk.f32.gmra.mrb[24].mxu0 %vm561_vm0, %v6974_v8  ;;  %v814_v8 = vld [vmem:[%s8707_s3 + $0x1e8] sm:$0xff]  ;;  %9047 = vst [vmem:[#allocation63_spill] sm:$0xff] %v7336_v7 }
 0x103   : > { %746 = vmatprep.mubr.f32.mxu0 %v8724_v16  ;;  %5280 = vmatpush1.bf16.msra.mxu0 %v7148_v6  ;;  %v7192_v29 = vpack.c.bf16 %v816_v25, %v814_v8  ;;  %v1072_v8 = vld [vmem:[%s8709_s5 + $0xc8] sm:$0xff]  ;;  %v7282_v25 = vpack.c.bf16 %v1054_v20, %v1053_v12  ;;  %v7339_v12 = vpack.c.bf16 %v1078_v5, %v1077_v34  ;;  %v1061_v20 = vld [vmem:[%s8709_s5 + $0x70] sm:$0xff]  ;;  %v951_v5 = vld [vmem:[#allocation7 + $0xa8] sm:$0xff] }
 0x104   : > { %5282 = vmatprep.subr.bf16.mxu0 %v7151_v4  ;;  %v950_v34 = vld [vmem:[#allocation7 + $0xa0] sm:$0xff] }
 0x105   : > { %9031 = vst [vmem:[#allocation47_spill] sm:$0xff] %v7192_v29  ;;  %9041 = vst [vmem:[#allocation57_spill] sm:$0xff] %v7282_v25  ;;  %5340 = vmatpush3.bf16.msra.mxu1 %v7282_v25  ;;  %v943_v25 = vld [vmem:[#allocation7 + $0x68] sm:$0xff] }
 0x106   : > { %4681 = vmatmul.mubr.msk.f32.gmra.mrb[26].mxu0 %vm561_vm0, %v6998_v17  ;;  %v815_v17 = vld [vmem:[%s8707_s3 + $0x1f0] sm:$0xff]  ;;  %9048 = vst [vmem:[#allocation64_spill] sm:$0xff] %v7339_v12 }
 0x107   : > { %5284 = vmatpush1.bf16.msra.mxu0 %v7169_v13  ;;  %v7202_v31 = vpack.c.bf16 %v815_v17, %v813_v30  ;;  %v7285_v30 = vpack.c.bf16 %v1072_v8, %v1071_v24  ;;  %v1055_v17 = vld [vmem:[%s8709_s5 + $0x40] sm:$0xff]  ;;  %v1062_v24 = vld [vmem:[%s8709_s5 + $0x78] sm:$0xff] }
 0x108   : > { %5286 = vmatprep.subr.bf16.mxu0 %v7172_v14  ;;  %v7300_v23 = vpack.c.bf16 %v1056_v32, %v1055_v17  ;;  %v7348_v8 = vpack.c.bf16 %v1062_v24, %v1061_v20  ;;  %v930_v17 = vld [vmem:[#allocation7] sm:$0xff]  ;;  %v931_v32 = vld [vmem:[#allocation7 + $0x8] sm:$0xff]  ;;  %v7357_v24 = vpack.c.bf16 %v933_v1, %v932_v15  ;;  %v7366_v15 = vpack.c.bf16 %v953_v38, %v952_v22  ;;  %v936_v1 = vld [vmem:[#allocation7 + $0x30] sm:$0xff] }
 0x109   : > { %9032 = vst [vmem:[#allocation48_spill] sm:$0xff] %v7202_v31  ;;  %9042 = vst [vmem:[#allocation58_spill] sm:$0xff] %v7285_v30  ;;  %5342 = vmatprep.subr.bf16.mxu1 %v7285_v30  ;;  %v7352_v52 = vpack.c.bf16 %v931_v32, %v930_v17  ;;  %v934_v17 = vld [vmem:[#allocation7 + $0x20] sm:$0xff]  ;;  %v935_v32 = vld [vmem:[#allocation7 + $0x28] sm:$0xff] }
 0x10a   : > { %9043 = vst [vmem:[#allocation59_spill] sm:$0xff] %v7300_v23  ;;  %5344 = vmatpush3.bf16.msra.mxu1 %v7300_v23  ;;  %9049 = vst [vmem:[#allocation65_spill] sm:$0xff] %v7348_v8  ;;  %v956_v22 = vld [vmem:[#allocation7 + $0xd0] sm:$0xff]  ;;  %v957_v38 = vld [vmem:[#allocation7 + $0xd8] sm:$0xff] }
 0x10b   : > { %5288 = vmatpush1.bf16.msra.mxu0 %v7189_v26  ;;  %5346 = vmatprep.subr.bf16.mxu1 %v7303_v45  ;;  %9050 = vst [vmem:[#allocation66_spill] sm:$0xff] %v7352_v52  ;;  %9052 = vst [vmem:[#allocation68_spill] sm:$0xff] %v7357_v24  ;;  %v941_v23 = vld [vmem:[#allocation7 + $0x58] sm:$0xff] }
 0x10c   : > { %5290 = vmatprep.subr.bf16.mxu0 %v7192_v29  ;;  %9055 = vst [vmem:[#allocation71_spill] sm:$0xff] %v7366_v15 }
 0x10e   : > { %5348 = vmatpush3.bf16.msra.mxu1 %v7318_v58  ;;  %v939_v58 = vld [vmem:[#allocation7 + $0x48] sm:$0xff] }
 0x10f   : > { %5292 = vmatpush1.bf16.msra.mxu0 %v7202_v31  ;;  %5350 = vmatprep.subr.bf16.mxu1 %v7321_v59 }
 0x110   : > { %5294 = vmatprep.subr.bf16.mxu0 %v7205_v37 }
 0x112   : > { %5352 = vmatpush3.bf16.msra.mxu1 %v7336_v7  ;;  %v937_v7 = vld [vmem:[#allocation7 + $0x38] sm:$0xff] }
 0x113   : > { %5354 = vmatprep.subr.bf16.mxu1 %v7339_v12 }
 0x116   : > { %5356 = vmatpush3.bf16.msra.mxu1 %v7348_v8  ;;  %v7360_v8 = vpack.c.bf16 %v951_v5, %v950_v34  ;;  %v954_v34 = vld [vmem:[#allocation7 + $0xc0] sm:$0xff]  ;;  %v955_v5 = vld [vmem:[#allocation7 + $0xc8] sm:$0xff] }
 0x118   : > { %9053 = vst [vmem:[#allocation69_spill] sm:$0xff] %v7360_v8 }
 0x1a5   : > { %v670_v46 = vpop.f32.mrb[0].mxu0 }
 0x1a6   : > { %v672_v53 = vpop.f32.mrb[1].mxu0 }
 0x1a7   : > { %881 = vmatprep.mubr.f32.mxu0 %v672_v53 }
 0x1a8   : > { %882 = vmatmul.mubr.f32.vlgmr.msra.gmra.mrb[28].mxu0 %v670_v46  ;;  %v7363_v46 = vpack.c.bf16 %v935_v32, %v934_v17  ;;  %v7372_v17 = vpack.c.bf16 %v955_v5, %v954_v34  ;;  %v938_v32 = vld [vmem:[#allocation7 + $0x40] sm:$0xff]  ;;  %v959_v5 = vld [vmem:[#allocation7 + $0xe8] sm:$0xff] }
 0x1a9   : > { %v676_v20 = vpop.f32.mrb[2].mxu0  ;;  %5296 = vmatpush3.bf16.msra.mxu0 %v7352_v52  ;;  %v958_v34 = vld [vmem:[#allocation7 + $0xe0] sm:$0xff] }
 0x1aa   : > { %v678_v16 = vpop.f32.mrb[3].mxu0  ;;  %5298 = vmatprep.subr.bf16.mxu0 %v7354_v36  ;;  %9054 = vst [vmem:[#allocation70_spill] sm:$0xff] %v7363_v46  ;;  %9057 = vst [vmem:[#allocation73_spill] sm:$0xff] %v7372_v17 }
 0x1ab   : > { %887 = vmatprep.mubr.f32.mxu0 %v678_v16 }
 0x1ac   : > { %888 = vmatmul.mubr.f32.gmra.mrb[30].mxu0 %v676_v20  ;;  %v7369_v20 = vpack.c.bf16 %v937_v7, %v936_v1  ;;  %v7378_v7 = vpack.c.bf16 %v957_v38, %v956_v22  ;;  %v940_v1 = vld [vmem:[#allocation7 + $0x50] sm:$0xff]  ;;  %v961_v38 = vld [vmem:[#allocation7 + $0xf8] sm:$0xff] }
 0x1ad   : > { %v682_v53 = vpop.f32.mrb[4].mxu0  ;;  %5300 = vmatpush3.bf16.msra.mxu0 %v7357_v24  ;;  %v960_v22 = vld [vmem:[#allocation7 + $0xf0] sm:$0xff] }
 0x1ae   : > { %v684_v12 = vpop.f32.mrb[5].mxu0  ;;  %5302 = vmatprep.subr.bf16.mxu0 %v7360_v8  ;;  %9056 = vst [vmem:[#allocation72_spill] sm:$0xff] %v7369_v20  ;;  %9059 = vst [vmem:[#allocation75_spill] sm:$0xff] %v7378_v7  ;;  %v1837_v8 = vld [vmem:[%s8713_s9 + $0x120] sm:$0xff] }
 0x1af   : > { %893 = vmatprep.mubr.f32.mxu0 %v684_v12 }
 0x1b0   : > { %894 = vmatmul.mubr.f32.gmra.mrb[32].mxu0 %v682_v53  ;;  %v7375_v53 = vpack.c.bf16 %v939_v58, %v938_v32  ;;  %v7384_v58 = vpack.c.bf16 %v959_v5, %v958_v34  ;;  %v942_v32 = vld [vmem:[#allocation7 + $0x60] sm:$0xff] }
 0x1b1   : > { %v688_v16 = vpop.f32.mrb[6].mxu0  ;;  %5304 = vmatpush3.bf16.msra.mxu0 %v7363_v46 }
 0x1b2   : > { %v690_v59 = vpop.f32.mrb[7].mxu0  ;;  %5306 = vmatprep.subr.bf16.mxu0 %v7366_v15  ;;  %9058 = vst [vmem:[#allocation74_spill] sm:$0xff] %v7375_v53  ;;  %9061 = vst [vmem:[#allocation77_spill] sm:$0xff] %v7384_v58 }
 0x1b3   : > { %899 = vmatprep.mubr.f32.mxu0 %v690_v59 }
 0x1b4   : > { %900 = vmatmul.mubr.f32.gmra.mrb[34].mxu0 %v688_v16  ;;  %v7381_v16 = vpack.c.bf16 %v941_v23, %v940_v1  ;;  %v7390_v23 = vpack.c.bf16 %v961_v38, %v960_v22  ;;  %v944_v1 = vld [vmem:[#allocation7 + $0x70] sm:$0xff] }
 0x1b5   : > { %v694_v12 = vpop.f32.mrb[8].mxu0  ;;  %5308 = vmatpush3.bf16.msra.mxu0 %v7369_v20 }
 0x1b6   : > { %v696_v45 = vpop.f32.mrb[9].mxu0  ;;  %5310 = vmatprep.subr.bf16.mxu0 %v7372_v17  ;;  %9060 = vst [vmem:[#allocation76_spill] sm:$0xff] %v7381_v16  ;;  %9063 = vst [vmem:[#allocation79_spill] sm:$0xff] %v7390_v23 }
 0x1b7   : > { %905 = vmatprep.mubr.f32.mxu0 %v696_v45 }
 0x1b8   : > { %906 = vmatmul.mubr.f32.gmra.mrb[36].mxu0 %v694_v12  ;;  %v7387_v12 = vpack.c.bf16 %v943_v25, %v942_v32 }
 0x1b9   : > { %v700_v59 = vpop.f32.mrb[10].mxu0  ;;  %5312 = vmatpush3.bf16.msra.mxu0 %v7375_v53 }
 0x1ba   : > { %v702_v30 = vpop.f32.mrb[11].mxu0  ;;  %5314 = vmatprep.subr.bf16.mxu0 %v7378_v7  ;;  %9062 = vst [vmem:[#allocation78_spill] sm:$0xff] %v7387_v12 }
 0x1bb   : > { %911 = vmatprep.mubr.f32.mxu0 %v702_v30  ;;  %v7393_v30 = vpack.c.bf16 %v945_v11, %v944_v1 }
 0x1bc   : > { %912 = vmatmul.mubr.f32.gmra.mrb[38].mxu0 %v700_v59 }
 0x1bd   : > { %v706_v45 = vpop.f32.mrb[12].mxu0  ;;  %5316 = vmatpush3.bf16.msra.mxu0 %v7381_v16  ;;  %9064 = vst [vmem:[#allocation80_spill] sm:$0xff] %v7393_v30 }
 0x1be   : > { %v708_v44 = vpop.f32.mrb[13].mxu0  ;;  %5318 = vmatprep.subr.bf16.mxu0 %v7384_v58  ;;  %v1833_v58 = vld [vmem:[%s8713_s9 + $0x100] sm:$0xff] }
 0x1bf   : > { %917 = vmatprep.mubr.f32.mxu0 %v708_v44 }
 0x1c0   : > { %918 = vmatmul.mubr.f32.gmra.mrb[40].mxu0 %v706_v45 }
 0x1c1   : > { %v712_v34 = vpop.f32.mrb[14].mxu0  ;;  %5320 = vmatpush3.bf16.msra.mxu0 %v7387_v12  ;;  %v7544_v12 = vpack.c.bf16 %v1831_v48, %v1829_v55  ;;  %v1838_v48 = vld [vmem:[%s8713_s9 + $0x128] sm:$0xff]  ;;  %v1840_v55 = vld [vmem:[%s8713_s9 + $0x138] sm:$0xff] }
 0x1c2   : > { %v714_v5 = vpop.f32.mrb[15].mxu0  ;;  %5322 = vmatprep.subr.bf16.mxu0 %v7390_v23  ;;  %v7564_v46 = vpack.c.bf16 %v1840_v55, %v1838_v48  ;;  %v1158_v55 = vld [vmem:[#allocation9 + $0x20] sm:$0xff] }
 0x1c3   : > { %923 = vmatprep.mubr.f32.mxu0 %v714_v5  ;;  %9081 = vst [vmem:[#allocation96_spill] sm:$0xff] %v7544_v12 }
 0x1c4   : > { %924 = vmatmul.mubr.f32.gmra.mrb[42].mxu0 %v712_v34  ;;  %v9065_v34 = vmov 0.0   ;;  %9084 = vst [vmem:[#allocation99_spill] sm:$0xff] %v7564_v46 }
 0x1c5   : > { %v718_v25 = vpop.f32.mrb[16].mxu0  ;;  %5324 = vmatpush3.bf16.msra.mxu0 %v7393_v30  ;;  %v1156_v30 = vld [vmem:[#allocation9 + $0x10] sm:$0xff] }
 0x1c6   : > { %v720_v59 = vpop.f32.mrb[17].mxu0 }
 0x1c7   : > { %1026 = vmatprep.mubr.f32.mxu0 %v720_v59 }
 0x1c8   : > { %1027 = vmatmul.mubr.f32.vlgmr.msra.gmra.mrb[44].mxu0 %v718_v25 }
 0x1c9   : > { %v724_v32 = vpop.f32.mrb[18].mxu0 }
 0x1ca   : > { %v726_v22 = vpop.f32.mrb[19].mxu0 }
 0x1cb   : > { %1031 = vmatprep.mubr.f32.mxu0 %v726_v22  ;;  %v1804_v22 = vld [vmem:[%s8713_s9 + $0x18] sm:$0xff] }
 0x1cc   : > { %1032 = vmatmul.mubr.f32.gmra.mrb[46].mxu0 %v724_v32  ;;  %v1802_v32 = vld [vmem:[%s8713_s9 + $0x8] sm:$0xff] }
 0x1cd   : > { %v730_v44 = vpop.f32.mrb[20].mxu0 }
 0x1ce   : > { %v732_v38 = vpop.f32.mrb[21].mxu0 }
 0x1cf   : > { %1036 = vmatprep.mubr.f32.mxu0 %v732_v38  ;;  %v7407_v38 = vpack.c.bf16 %v1804_v22, %v1802_v32  ;;  %v1807_v32 = vld [vmem:[%s8713_s9 + $0x30] sm:$0xff]  ;;  %v1810_v22 = vld [vmem:[%s8713_s9 + $0x48] sm:$0xff] }
 0x1d0   : > { %1037 = vmatmul.mubr.f32.gmra.mrb[48].mxu0 %v730_v44  ;;  %v1801_v44 = vld [vmem:[%s8713_s9] sm:$0xff] }
 0x1d1   : > { %v736_v11 = vpop.f32.mrb[22].mxu0  ;;  %9066 = vst [vmem:[#allocation81_spill] sm:$0xff] %v7407_v38  ;;  %5386 = vmatprep.subr.bf16.mxu1 %v7407_v38  ;;  %v1811_v38 = vld [vmem:[%s8713_s9 + $0x50] sm:$0xff] }
 0x1d2   : > { %v738_v45 = vpop.f32.mrb[23].mxu0 }
 0x1d3   : > { %1041 = vmatprep.mubr.f32.mxu0 %v738_v45  ;;  %v1806_v45 = vld [vmem:[%s8713_s9 + $0x28] sm:$0xff] }
 0x1d4   : > { %1042 = vmatmul.mubr.f32.gmra.mrb[50].mxu0 %v736_v11  ;;  %v1803_v11 = vld [vmem:[%s8713_s9 + $0x10] sm:$0xff] }
 0x1d5   : > { %v742_v1 = vpop.f32.mrb[24].mxu0  ;;  %1386 = vmatprep.mubr.f32.mxu0 %v9065_v34 }
 0x1d6   : > { %v744_v5 = vpop.f32.mrb[25].mxu0 }
 0x1d7   : > { %1143 = vmatprep.mubr.f32.mxu1 %v744_v5  ;;  %v7418_v5 = vpack.c.bf16 %v1803_v11, %v1801_v44  ;;  %v1812_v44 = vld [vmem:[%s8713_s9 + $0x58] sm:$0xff] }
 0x1d8   : > { %1144 = vmatmul.mubr.f32.vlgmr.msra.gmra.mrb[0].mxu1 %v742_v1  ;;  %v1808_v1 = vld [vmem:[%s8713_s9 + $0x38] sm:$0xff] }
 0x1d9   : > { %v748_v59 = vpop.f32.mrb[26].mxu0  ;;  %9067 = vst [vmem:[#allocation82_spill] sm:$0xff] %v7418_v5  ;;  %5388 = vmatpush1.bf16.msra.mxu1 %v7418_v5  ;;  %v1818_v5 = vld [vmem:[%s8713_s9 + $0x88] sm:$0xff] }
 0x1da   : > { %v750_v25 = vpop.f32.mrb[27].mxu0 }
 0x1db   : > { %1148 = vmatprep.mubr.f32.mxu1 %v750_v25  ;;  %v1805_v25 = vld [vmem:[%s8713_s9 + $0x20] sm:$0xff] }
 0x1dc   : > { %1149 = vmatmul.mubr.f32.gmra.mrb[2].mxu1 %v748_v59  ;;  %v7420_v59 = vpack.c.bf16 %v1808_v1, %v1806_v45  ;;  %v7436_v11 = vpack.c.bf16 %v1807_v32, %v1805_v25  ;;  %v7439_v45 = vpack.c.bf16 %v1812_v44, %v1810_v22  ;;  %v1809_v1 = vld [vmem:[%s8713_s9 + $0x40] sm:$0xff]  ;;  %v1816_v25 = vld [vmem:[%s8713_s9 + $0x78] sm:$0xff] }
 0x1dd   : > { %v7454_v32 = vpack.c.bf16 %v1811_v38, %v1809_v1  ;;  %v7457_v22 = vpack.c.bf16 %v1816_v25, %v1814_v41  ;;  %v1813_v44 = vld [vmem:[%s8713_s9 + $0x60] sm:$0xff]  ;;  %v1820_v38 = vld [vmem:[%s8713_s9 + $0x98] sm:$0xff] }
 0x1de   : > { %9068 = vst [vmem:[#allocation83_spill] sm:$0xff] %v7420_v59  ;;  %9069 = vst [vmem:[#allocation84_spill] sm:$0xff] %v7436_v11  ;;  %5390 = vmatprep.subr.bf16.mxu1 %v7420_v59  ;;  %v1815_v59 = vld [vmem:[%s8713_s9 + $0x70] sm:$0xff]  ;;  %v7475_v1 = vpack.c.bf16 %v1820_v38, %v1818_v5  ;;  %v1817_v25 = vld [vmem:[%s8713_s9 + $0x80] sm:$0xff] }
 0x1df   : > { %9070 = vst [vmem:[#allocation85_spill] sm:$0xff] %v7439_v45  ;;  %5392 = vmatpush1.bf16.msra.mxu1 %v7436_v11  ;;  %9071 = vst [vmem:[#allocation86_spill] sm:$0xff] %v7454_v32  ;;  %v7472_v41 = vpack.c.bf16 %v1815_v59, %v1813_v44  ;;  %v1822_v11 = vld [vmem:[%s8713_s9 + $0xa8] sm:$0xff]  ;;  %v1824_v59 = vld [vmem:[%s8713_s9 + $0xb8] sm:$0xff] }
 0x1e0   : > { %5394 = vmatprep.subr.bf16.mxu1 %v7439_v45  ;;  %9072 = vst [vmem:[#allocation87_spill] sm:$0xff] %v7457_v22  ;;  %9074 = vst [vmem:[#allocation89_spill] sm:$0xff] %v7475_v1  ;;  %v1819_v45 = vld [vmem:[%s8713_s9 + $0x90] sm:$0xff]  ;;  %v7493_v44 = vpack.c.bf16 %v1824_v59, %v1822_v11  ;;  %v1821_v38 = vld [vmem:[%s8713_s9 + $0xa0] sm:$0xff] }
 0x1e1   : > { %9073 = vst [vmem:[#allocation88_spill] sm:$0xff] %v7472_v41  ;;  %v7490_v5 = vpack.c.bf16 %v1819_v45, %v1817_v25  ;;  %v1828_v45 = vld [vmem:[%s8713_s9 + $0xd8] sm:$0xff]  ;;  %v1825_v59 = vld [vmem:[%s8713_s9 + $0xc0] sm:$0xff] }
 0x1e2   : > { %9076 = vst [vmem:[#allocation91_spill] sm:$0xff] %v7493_v44 }
 0x1e3   : > { %5396 = vmatpush1.bf16.msra.mxu1 %v7454_v32  ;;  %9075 = vst [vmem:[#allocation90_spill] sm:$0xff] %v7490_v5  ;;  %v1826_v32 = vld [vmem:[%s8713_s9 + $0xc8] sm:$0xff] }
 0x1e4   : > { %5398 = vmatprep.subr.bf16.mxu1 %v7457_v22  ;;  %v1823_v22 = vld [vmem:[%s8713_s9 + $0xb0] sm:$0xff]  ;;  %v7511_v25 = vpack.c.bf16 %v1828_v45, %v1826_v32 }
 0x1e5   : > { %v7508_v11 = vpack.c.bf16 %v1823_v22, %v1821_v38  ;;  %v1832_v22 = vld [vmem:[%s8713_s9 + $0xf8] sm:$0xff]  ;;  %v1154_v45 = vld [vmem:[#allocation9] sm:$0xff] }
 0x1e6   : > { %9078 = vst [vmem:[#allocation93_spill] sm:$0xff] %v7511_v25 }
 0x1e7   : > { %5400 = vmatpush1.bf16.msra.mxu1 %v7472_v41  ;;  %9077 = vst [vmem:[#allocation92_spill] sm:$0xff] %v7508_v11  ;;  %v1830_v41 = vld [vmem:[%s8713_s9 + $0xe8] sm:$0xff] }
 0x1e8   : > { %5402 = vmatprep.subr.bf16.mxu1 %v7475_v1  ;;  %v1827_v1 = vld [vmem:[%s8713_s9 + $0xd0] sm:$0xff]  ;;  %v7529_v61 = vpack.c.bf16 %v1832_v22, %v1830_v41  ;;  %v1155_v22 = vld [vmem:[#allocation9 + $0x8] sm:$0xff] }
 0x1e9   : > { %v7526_v32 = vpack.c.bf16 %v1827_v1, %v1825_v59  ;;  %v1834_v1 = vld [vmem:[%s8713_s9 + $0x108] sm:$0xff]  ;;  %v1836_v59 = vld [vmem:[%s8713_s9 + $0x118] sm:$0xff] }
 0x1ea   : > { %9080 = vst [vmem:[#allocation95_spill] sm:$0xff] %v7529_v61  ;;  %v7550_v20 = vpack.c.bf16 %v1836_v59, %v1834_v1 }
 0x1eb   : > { %5404 = vmatpush1.bf16.msra.mxu1 %v7490_v5  ;;  %9079 = vst [vmem:[#allocation94_spill] sm:$0xff] %v7526_v32 }
 0x1ec   : > { %5406 = vmatprep.subr.bf16.mxu1 %v7493_v44  ;;  %9082 = vst [vmem:[#allocation97_spill] sm:$0xff] %v7550_v20 }
 0x1ef   : > { %5408 = vmatpush1.bf16.msra.mxu1 %v7508_v11 }
 0x1f0   : > { %5410 = vmatprep.subr.bf16.mxu1 %v7511_v25  ;;  %v1157_v25 = vld [vmem:[#allocation9 + $0x18] sm:$0xff] }
 0x1f3   : > { %5412 = vmatpush1.bf16.msra.mxu1 %v7526_v32 }
 0x1f4   : > { %5414 = vmatprep.subr.bf16.mxu1 %v7529_v61 }
 0x1f7   : > { %5416 = vmatpush1.bf16.msra.mxu1 %v7544_v12  ;;  %v1160_v12 = vld [vmem:[#allocation9 + $0x30] sm:$0xff] }
 0x1f8   : > { %5418 = vmatprep.subr.bf16.mxu1 %v7550_v20 }
 0x27b   : > { %v883_v38 = vpop.f32.mrb[28].mxu0 }
 0x27c   : > { %v1202_v44 = vsub.f32 0.0, %v883_v38  ;;  %v885_v5 = vpop.f32.mrb[29].mxu0  ;;  %v1170_v16 = vsub.f32 %v883_v38, %v1154_v45 }
 0x27d   : > { %v1203_v43 = vsub.f32 0.0, %v885_v5 }
 0x27e   : > { %v1218_v41 = vsub.f32 %v1202_v44, %v1154_v45  ;;  %v1171_v44 = vsub.f32 %v885_v5, %v1155_v22  ;;  %v1839_v5 = vld [vmem:[%s8713_s9 + $0x130] sm:$0xff] }
 0x27f   : > { %v1219_v11 = vsub.f32 %v1203_v43, %v1155_v22  ;;  %v889_v23 = vpop.f32.mrb[30].mxu0  ;;  %v1835_v43 = vld [vmem:[%s8713_s9 + $0x110] sm:$0xff]  ;;  %v7581_v37 = vpack.c.bf16 %v1839_v5, %v1837_v8  ;;  %v1846_v8 = vld [vmem:[%s8713_s9 + $0x168] sm:$0xff]  ;;  %v1848_v5 = vld [vmem:[%s8713_s9 + $0x178] sm:$0xff] }
 0x280   : > { %v1172_v7 = vsub.f32 %v889_v23, %v1156_v30  ;;  %v1204_v53 = vsub.f32 0.0, %v889_v23  ;;  %v891_v17 = vpop.f32.mrb[31].mxu0  ;;  %v1234_v45 = vmax.f32 %v1218_v41, 0.0  ;;  %v7562_v15 = vpack.c.bf16 %v1835_v43, %v1833_v58  ;;  %v1844_v41 = vld [vmem:[%s8713_s9 + $0x158] sm:$0xff] }
 0x281   : > { %v1173_v38 = vsub.f32 %v891_v17, %v1157_v25  ;;  %v1205_v23 = vsub.f32 0.0, %v891_v17  ;;  %v1235_v61 = vmax.f32 %v1219_v11, 0.0  ;;  %v1842_v17 = vld [vmem:[%s8713_s9 + $0x148] sm:$0xff]  ;;  %v1187_v22 = vmax.f32 %v1171_v44, 0.0  ;;  %9086 = vst [vmem:[#allocation101_spill] sm:$0xff] %v7581_v37 }
 0x282   : > { %v1220_v32 = vsub.f32 %v1204_v53, %v1156_v30  ;;  %9083 = vst [vmem:[#allocation98_spill] sm:$0xff] %v7562_v15  ;;  %v1186_v53 = vmax.f32 %v1170_v16, 0.0  ;;  %v1188_v30 = vmax.f32 %v1172_v7, 0.0  ;;  %v1159_v16 = vld [vmem:[#allocation9 + $0x28] sm:$0xff]  ;;  %v1161_v7 = vld [vmem:[#allocation9 + $0x38] sm:$0xff]  ;;  %5420 = vmatpush1.bf16.msra.mxu1 %v7562_v15  ;;  %v7584_v44 = vpack.c.bf16 %v1844_v41, %v1842_v17 }
 0x283   : > { %v1221_v1 = vsub.f32 %v1205_v23, %v1157_v25  ;;  %v895_v59 = vpop.f32.mrb[32].mxu0  ;;  %v1189_v43 = vmax.f32 %v1173_v38, 0.0  ;;  %v1251_v20 = vsub.f32 %v1187_v22, %v1235_v61  ;;  %v1841_v38 = vld [vmem:[%s8713_s9 + $0x140] sm:$0xff]  ;;  %5422 = vmatprep.subr.bf16.mxu1 %v7564_v46  ;;  %v1843_v61 = vld [vmem:[%s8713_s9 + $0x150] sm:$0xff] }
 0x284   : > { %v1236_v11 = vmax.f32 %v1220_v32, 0.0  ;;  %v1206_v25 = vsub.f32 0.0, %v895_v59  ;;  %v897_v58 = vpop.f32.mrb[33].mxu0  ;;  %v1250_v24 = vsub.f32 %v1186_v53, %v1234_v45  ;;  %v7579_v32 = vpop.trf.xlu1  ;;  %9087 = vst [vmem:[#allocation102_spill] sm:$0xff] %v7584_v44 }
 0x285   : > { %v1237_v48 = vmax.f32 %v1221_v1, 0.0  ;;  %v1207_v23 = vsub.f32 0.0, %v897_v58  ;;  %9085 = vst [vmem:[#allocation100_spill] sm:$0xff] %v7579_v32  ;;  %v1174_v1 = vsub.f32 %v895_v59, %v1158_v55  ;;  %v1175_v17 = vsub.f32 %v897_v58, %v1159_v16 }
 0x286   : > { %v1252_v36 = vsub.f32 %v1188_v30, %v1236_v11  ;;  %v1222_v52 = vsub.f32 %v1206_v25, %v1158_v55  ;;  %5424 = vmatpush1.bf16.msra.mxu1 %v7581_v37  ;;  %v7602_v55 = vpack.c.bf16 %v1848_v5, %v1846_v8  ;;  %v1162_v8 = vld [vmem:[#allocation9 + $0x40] sm:$0xff]  ;;  %v1165_v37 = vld [vmem:[#allocation9 + $0x58] sm:$0xff] }
 0x287   : > { %v1253_v31 = vsub.f32 %v1189_v43, %v1237_v48  ;;  %v1223_v29 = vsub.f32 %v1207_v23, %v1159_v16  ;;  %v901_v26 = vpop.f32.mrb[34].mxu0  ;;  %v7600_v48 = vpack.c.bf16 %v1843_v61, %v1841_v38  ;;  %v1845_v23 = vld [vmem:[%s8713_s9 + $0x160] sm:$0xff]  ;;  %5426 = vmatprep.subr.bf16.mxu1 %v7584_v44  ;;  %v1852_v38 = vld [vmem:[%s8713_s9 + $0x198] sm:$0xff] }
 0x288   : > { %v5359_v45 = vpack.c.bf16 %v1252_v36, %v1250_v24  ;;  %v1176_v53 = vsub.f32 %v901_v26, %v1160_v12  ;;  %v1208_v30 = vsub.f32 0.0, %v901_v26  ;;  %v903_v11 = vpop.f32.mrb[35].mxu0  ;;  %v1238_v26 = vmax.f32 %v1222_v52, 0.0  ;;  %9089 = vst [vmem:[#allocation104_spill] sm:$0xff] %v7602_v55 }
 0x289   : > { %v1177_v36 = vsub.f32 %v903_v11, %v1161_v7  ;;  %v1209_v24 = vsub.f32 0.0, %v903_v11  ;;  %v5357_v59 = vpack.c.bf16 %v1253_v31, %v1251_v20  ;;  %v1239_v41 = vmax.f32 %v1223_v29, 0.0  ;;  %9088 = vst [vmem:[#allocation103_spill] sm:$0xff] %v7600_v48  ;;  %v1847_v31 = vld [vmem:[%s8713_s9 + $0x170] sm:$0xff]  ;;  %v1850_v29 = vld [vmem:[%s8713_s9 + $0x188] sm:$0xff] }
 0x28a   : > { %v1224_v25 = vsub.f32 %v1208_v30, %v1160_v12  ;;  %v1190_v52 = vmax.f32 %v1174_v1, 0.0  ;;  %v1192_v20 = vmax.f32 %v1176_v53, 0.0  ;;  %v1191_v30 = vmax.f32 %v1175_v17, 0.0  ;;  %5428 = vmatpush1.bf16.msra.mxu1 %v7600_v48  ;;  %v1849_v17 = vld [vmem:[%s8713_s9 + $0x180] sm:$0xff] }
 0x28b   : > { %v1225_v22 = vsub.f32 %v1209_v24, %v1161_v7  ;;  %v907_v43 = vpop.f32.mrb[36].mxu0  ;;  %5358 = vmatprep.subr.bf16.mxu0 %v5357_v59  ;;  %v7613_v7 = vpop.trf.xlu1  ;;  %v1193_v11 = vmax.f32 %v1177_v36, 0.0  ;;  %v1164_v24 = vld [vmem:[#allocation9 + $0x50] sm:$0xff]  ;;  %v7622_v13 = vpack.c.bf16 %v1852_v38, %v1850_v29  ;;  %5430 = vmatprep.subr.bf16.mxu1 %v7602_v55 }
 0x28c   : > { %v1240_v12 = vmax.f32 %v1224_v25, 0.0  ;;  %v1210_v58 = vsub.f32 0.0, %v907_v43  ;;  %v909_v16 = vpop.f32.mrb[37].mxu0  ;;  %5360 = vmatpush1.bf16.msra.mxu0 %v5359_v45  ;;  %v1254_v1 = vsub.f32 %v1190_v52, %v1238_v26  ;;  %v1163_v25 = vld [vmem:[#allocation9 + $0x48] sm:$0xff]  ;;  %v7619_v45 = vpack.c.bf16 %v1847_v31, %v1845_v23  ;;  %v1854_v23 = vld [vmem:[%s8713_s9 + $0x1a8] sm:$0xff] }
 0x28d   : > { %v1241_v61 = vmax.f32 %v1225_v22, 0.0  ;;  %v1211_v5 = vsub.f32 0.0, %v909_v16  ;;  %v1255_v46 = vsub.f32 %v1191_v30, %v1239_v41  ;;  %9091 = vst [vmem:[#allocation106_spill] sm:$0xff] %v7622_v13  ;;  %v1178_v26 = vsub.f32 %v907_v43, %v1162_v8  ;;  %v1851_v41 = vld [vmem:[%s8713_s9 + $0x190] sm:$0xff]  ;;  %v1856_v31 = vld [vmem:[%s8713_s9 + $0x1b8] sm:$0xff] }
 0x28e   : > { %v1256_v53 = vsub.f32 %v1192_v20, %v1240_v12  ;;  %v1226_v59 = vsub.f32 %v1210_v58, %v1162_v8  ;;  %9090 = vst [vmem:[#allocation105_spill] sm:$0xff] %v7619_v45  ;;  %v1179_v29 = vsub.f32 %v909_v16, %v1163_v25  ;;  %5432 = vmatpush1.bf16.msra.mxu1 %v7619_v45  ;;  %v1853_v16 = vld [vmem:[%s8713_s9 + $0x1a0] sm:$0xff]  ;;  %v7657_v45 = vpop.trf.xlu0 }
 0x28f   : > { %v1257_v15 = vsub.f32 %v1193_v11, %v1241_v61  ;;  %v1227_v44 = vsub.f32 %v1211_v5, %v1163_v25  ;;  %v913_v14 = vpop.f32.mrb[38].mxu0  ;;  %v7637_v30 = vpop.trf.xlu1  ;;  %v7640_v5 = vpack.c.bf16 %v1851_v41, %v1849_v17  ;;  %5434 = vmatprep.subr.bf16.mxu1 %v7622_v13  ;;  %v1860_v25 = vld [vmem:[%s8713_s9 + $0x1d8] sm:$0xff]  ;;  %v1166_v41 = vld [vmem:[#allocation9 + $0x60] sm:$0xff] }
 0x290   : > { %v5363_v36 = vpack.c.bf16 %v1256_v53, %v1254_v1  ;;  %v1180_v22 = vsub.f32 %v913_v14, %v1164_v24  ;;  %v1212_v52 = vsub.f32 0.0, %v913_v14  ;;  %v915_v20 = vpop.f32.mrb[39].mxu0  ;;  %v1242_v14 = vmax.f32 %v1226_v59, 0.0 }
 0x291   : > { %v1181_v12 = vsub.f32 %v915_v20, %v1165_v37  ;;  %v1213_v43 = vsub.f32 0.0, %v915_v20  ;;  %v5361_v58 = vpack.c.bf16 %v1257_v15, %v1255_v46  ;;  %v1243_v11 = vmax.f32 %v1227_v44, 0.0  ;;  %9092 = vst [vmem:[#allocation107_spill] sm:$0xff] %v7640_v5  ;;  %v1855_v46 = vld [vmem:[%s8713_s9 + $0x1b0] sm:$0xff] }
 0x292   : > { %v1228_v38 = vsub.f32 %v1212_v52, %v1164_v24  ;;  %v7642_v1 = vpack.c.bf16 %v1856_v31, %v1854_v23  ;;  %v1194_v15 = vmax.f32 %v1178_v26, 0.0  ;;  %v1196_v44 = vmax.f32 %v1180_v22, 0.0  ;;  %v1168_v31 = vld [vmem:[#allocation9 + $0x70] sm:$0xff]  ;;  %v1167_v22 = vld [vmem:[#allocation9 + $0x68] sm:$0xff]  ;;  %5436 = vmatpush1.bf16.msra.mxu1 %v7640_v5  ;;  %v1915_v5 = vld [vmem:[%s8713_s9 + $0x390] sm:$0xff] }
 0x293   : > { %v1229_v61 = vsub.f32 %v1213_v43, %v1165_v37  ;;  %v919_v8 = vpop.f32.mrb[40].mxu0  ;;  %5362 = vmatprep.subr.bf16.mxu0 %v5361_v58  ;;  %v1858_v37 = vld [vmem:[%s8713_s9 + $0x1c8] sm:$0xff]  ;;  %v1195_v17 = vmax.f32 %v1179_v29, 0.0  ;;  %v1197_v52 = vmax.f32 %v1181_v12, 0.0 }
 0x294   : > { %9093 = vst [vmem:[#allocation108_spill] sm:$0xff] %v7642_v1  ;;  %v1244_v24 = vmax.f32 %v1228_v38, 0.0  ;;  %v1214_v53 = vsub.f32 0.0, %v919_v8  ;;  %v921_v59 = vpop.f32.mrb[41].mxu0  ;;  %5364 = vmatpush1.bf16.msra.mxu0 %v5363_v36  ;;  %v1258_v43 = vsub.f32 %v1194_v15, %v1242_v14  ;;  %v1169_v38 = vld [vmem:[#allocation9 + $0x78] sm:$0xff]  ;;  %v7659_v36 = vpack.c.bf16 %v1855_v46, %v1853_v16  ;;  %5438 = vmatprep.subr.bf16.mxu1 %v7642_v1  ;;  %v1859_v16 = vld [vmem:[%s8713_s9 + $0x1d0] sm:$0xff] }
 0x295   : > { %v1245_v20 = vmax.f32 %v1229_v61, 0.0  ;;  %v1215_v23 = vsub.f32 0.0, %v921_v59  ;;  %v1259_v13 = vsub.f32 %v1195_v17, %v1243_v11  ;;  %v7662_v29 = vpack.c.bf16 %v1860_v25, %v1858_v37  ;;  %v1857_v11 = vld [vmem:[%s8713_s9 + $0x1c0] sm:$0xff] }
 0x296   : > { %v1260_v58 = vsub.f32 %v1196_v44, %v1244_v24  ;;  %v1230_v26 = vsub.f32 %v1214_v53, %v1166_v41  ;;  %9094 = vst [vmem:[#allocation109_spill] sm:$0xff] %v7659_v36  ;;  %v1182_v61 = vsub.f32 %v919_v8, %v1166_v41  ;;  %v7664_v44 = vpop.trf.xlu1  ;;  %v1183_v46 = vsub.f32 %v921_v59, %v1167_v22  ;;  %v1864_v8 = vld [vmem:[%s8713_s9 + $0x1f8] sm:$0xff] }
 0x297   : > { %v1261_v55 = vsub.f32 %v1197_v52, %v1245_v20  ;;  %v1231_v48 = vsub.f32 %v1215_v23, %v1167_v22  ;;  %v925_v4 = vpop.f32.mrb[42].mxu0  ;;  %9095 = vst [vmem:[#allocation110_spill] sm:$0xff] %v7662_v29  ;;  %5440 = vmatpush1.bf16.msra.mxu1 %v7659_v36  ;;  %v7680_v59 = vpack.c.bf16 %v1859_v16, %v1857_v11 }
 0x298   : > { %v5367_v12 = vpack.c.bf16 %v1260_v58, %v1258_v43  ;;  %v1184_v6 = vsub.f32 %v925_v4, %v1168_v31  ;;  %v1216_v14 = vsub.f32 0.0, %v925_v4  ;;  %v927_v15 = vpop.f32.mrb[43].mxu0  ;;  %v1862_v4 = vld [vmem:[%s8713_s9 + $0x1e8] sm:$0xff]  ;;  %v1246_v25 = vmax.f32 %v1230_v26, 0.0  ;;  %v7691_v26 = vpop.trf.xlu0  ;;  %5442 = vmatprep.subr.bf16.mxu1 %v7662_v29 }
 0x299   : > { %v1185_v37 = vsub.f32 %v927_v15, %v1169_v38  ;;  %v1217_v24 = vsub.f32 0.0, %v927_v15  ;;  %v5365_v53 = vpack.c.bf16 %v1261_v55, %v1259_v13  ;;  %v1247_v52 = vmax.f32 %v1231_v48, 0.0  ;;  %9096 = vst [vmem:[#allocation111_spill] sm:$0xff] %v7680_v59  ;;  %v1861_v13 = vld [vmem:[%s8713_s9 + $0x1e0] sm:$0xff]  ;;  %v1863_v55 = vld [vmem:[%s8713_s9 + $0x1f0] sm:$0xff] }
 0x29a   : > { %v1232_v17 = vsub.f32 %v1216_v14, %v1168_v31  ;;  %v1198_v23 = vmax.f32 %v1182_v61, 0.0  ;;  %v1200_v43 = vmax.f32 %v1184_v6, 0.0  ;;  %v1435_v31 = vld [vmem:[%s8711_s7] sm:$0xff]  ;;  %v7694_v22 = vpack.c.bf16 %v1864_v8, %v1862_v4  ;;  %v7696_v6 = vpop.trf.xlu1 }
 0x29b   : > { %v1233_v20 = vsub.f32 %v1217_v24, %v1169_v38  ;;  %5366 = vmatprep.subr.bf16.mxu0 %v5365_v53  ;;  %v4825_v41 = vpop.f32.mrb[44].mxu0  ;;  %v1199_v38 = vmax.f32 %v1183_v46, 0.0  ;;  %v1201_v14 = vmax.f32 %v1185_v37, 0.0  ;;  %5444 = vmatpush1.bf16.msra.mxu1 %v7680_v59  ;;  %v1436_v46 = vld [vmem:[%s8711_s7 + $0x8] sm:$0xff] }
 0x29c   : > { %v1248_v58 = vmax.f32 %v1232_v17, 0.0  ;;  %5368 = vmatpush1.bf16.msra.mxu0 %v5367_v12  ;;  %v4826_v48 = vpop.f32.mrb[45].mxu0  ;;  %9097 = vst [vmem:[#allocation112_spill] sm:$0xff] %v7694_v22  ;;  %v1262_v16 = vsub.f32 %v1198_v23, %v1246_v25  ;;  %v7698_v12 = vpack.c.bf16 %v1863_v55, %v1861_v13  ;;  %5446 = vmatprep.subr.bf16.mxu1 %v7694_v22  ;;  %v1875_v22 = vld [vmem:[%s8713_s9 + $0x250] sm:$0xff] }
 0x29d   : > { %v1249_v15 = vmax.f32 %v1233_v20, 0.0  ;;  %v4827_v11 = vadd.f32 %v4826_v48, %v4825_v41  ;;  %v1263_v24 = vsub.f32 %v1199_v38, %v1247_v52  ;;  %v7705_v20 = vpop.trf.xlu0 }
 0x29e   : > { %v1264_v61 = vsub.f32 %v1200_v43, %v1248_v58  ;;  %9098 = vst [vmem:[#allocation113_spill] sm:$0xff] %v7698_v12  ;;  %v1437_v58 = vld [vmem:[%s8711_s7 + $0x10] sm:$0xff]  ;;  %v7711_v48 = vpop.trf.xlu1 }
 0x29f   : > { %v1265_v53 = vsub.f32 %v1201_v14, %v1249_v15  ;;  %v1439_v17 = vsub.f32 %v4827_v11, %v1435_v31  ;;  %v1447_v36 = vsub.f32 0.0, %v4827_v11  ;;  %v4828_v1 = vpop.f32.mrb[46].mxu0  ;;  %5448 = vmatpush1.bf16.msra.mxu1 %v7698_v12  ;;  %v1874_v12 = vld [vmem:[%s8713_s9 + $0x248] sm:$0xff] }
 0x2a0   : > { %v5371_v29 = vpack.c.bf16 %v1264_v61, %v1262_v16  ;;  %v4829_v4 = vpop.f32.mrb[47].mxu0 }
 0x2a1   : > { %v1451_v37 = vsub.f32 %v1447_v36, %v1435_v31  ;;  %v4830_v8 = vadd.f32 %v4829_v4, %v4828_v1  ;;  %v5369_v25 = vpack.c.bf16 %v1265_v53, %v1263_v24  ;;  %v1443_v52 = vmax.f32 %v1439_v17, 0.0  ;;  %v1438_v24 = vld [vmem:[%s8711_s7 + $0x18] sm:$0xff] }
 0x2a3   : > { %v1455_v41 = vmax.f32 %v1451_v37, 0.0  ;;  %v1440_v13 = vsub.f32 %v4830_v8, %v1436_v46  ;;  %v1448_v55 = vsub.f32 0.0, %v4830_v8  ;;  %5370 = vmatprep.subr.bf16.mxu0 %v5369_v25  ;;  %v4831_v23 = vpop.f32.mrb[48].mxu0  ;;  %v7721_v37 = vpop.trf.xlu1 }
 0x2a4   : > { %5372 = vmatpush1.bf16.msra.mxu0 %v5371_v29  ;;  %v4832_v43 = vpop.f32.mrb[49].mxu0  ;;  %v7716_v29 = vpop.trf.xlu0  ;;  %9099 = vst [vmem:[#allocation114_spill] sm:$0xff] %v7721_v37 }
 0x2a5   : > { %v1444_v1 = vmax.f32 %v1440_v13, 0.0  ;;  %v1452_v36 = vsub.f32 %v1448_v55, %v1436_v46  ;;  %v4833_v31 = vadd.f32 %v4832_v43, %v4831_v23  ;;  %v1459_v38 = vsub.f32 %v1443_v52, %v1455_v41  ;;  %v1625_v23 = vld [vmem:[#allocation10] sm:$0xff] }
 0x2a7   : > { %v1456_v14 = vmax.f32 %v1452_v36, 0.0  ;;  %4682 = vmatmul.mubr.msk.f32.vlgmr.msra.gmra.mrb[52].mxu0 %vm561_vm0, %v7657_v45  ;;  %v1441_v15 = vsub.f32 %v4833_v31, %v1437_v58  ;;  %v1449_v11 = vsub.f32 0.0, %v4833_v31  ;;  %v4834_v16 = vpop.f32.mrb[50].mxu0 }
 0x2a8   : > { %1392 = vmatprep.mubr.f32.mxu0 %v9065_v34  ;;  %v4835_v61 = vpop.f32.mrb[51].mxu0  ;;  %v7726_v36 = vpop.trf.xlu0 }
 0x2a9   : > { %v1460_v53 = vsub.f32 %v1444_v1, %v1456_v14  ;;  %v1453_v17 = vsub.f32 %v1449_v11, %v1437_v58  ;;  %v4836_v4 = vadd.f32 %v4835_v61, %v4834_v16  ;;  %v1445_v46 = vmax.f32 %v1441_v15, 0.0  ;;  %v1626_v61 = vld [vmem:[#allocation10 + $0x8] sm:$0xff] }
 0x2ab   : > { %4683 = vmatmul.mubr.msk.f32.gmra.mrb[54].mxu0 %vm561_vm0, %v7691_v26  ;;  %v5373_v8 = vpack.c.bf16 %v1460_v53, %v1459_v38  ;;  %v1457_v25 = vmax.f32 %v1453_v17, 0.0  ;;  %v1442_v52 = vsub.f32 %v4836_v4, %v1438_v24  ;;  %v1450_v41 = vsub.f32 0.0, %v4836_v4  ;;  %v4869_v13 = vpop.f32.mrb[0].mxu1  ;;  %v7731_v53 = vpop.trf.xlu1 }
 0x2ac   : > { %1398 = vmatprep.mubr.f32.mxu0 %v9065_v34  ;;  %v4870_v55 = vpop.f32.mrb[1].mxu1  ;;  %9100 = vst [vmem:[#allocation115_spill] sm:$0xff] %v7731_v53 }
 0x2ad   : > { %5374 = vmatprep.subr.bf16.mxu0 %v5373_v8  ;;  %v1446_v43 = vmax.f32 %v1442_v52, 0.0  ;;  %v1454_v1 = vsub.f32 %v1450_v41, %v1438_v24  ;;  %v4871_v58 = vadd.f32 %v4870_v55, %v4869_v13  ;;  %v1461_v31 = vsub.f32 %v1445_v46, %v1457_v25  ;;  %v7736_v13 = vpop.trf.xlu0 }
 0x2ae   : > { %5376 = vmatpush3.bf16.msra.mxu0 %v5373_v8 }
 0x2af   : > { %4684 = vmatmul.mubr.msk.f32.gmra.mrb[56].mxu0 %vm561_vm0, %v7705_v20  ;;  %v1458_v38 = vmax.f32 %v1454_v1, 0.0  ;;  %v1627_v14 = vsub.f32 %v4871_v58, %v1625_v23  ;;  %v1631_v15 = vsub.f32 0.0, %v4871_v58  ;;  %v4872_v11 = vpop.f32.mrb[2].mxu1  ;;  %v7738_v58 = vpop.trf.xlu1 }
 0x2b0   : > { %1404 = vmatprep.mubr.f32.mxu0 %v9065_v34  ;;  %v4873_v16 = vpop.f32.mrb[3].mxu1  ;;  %9101 = vst [vmem:[#allocation116_spill] sm:$0xff] %v7738_v58 }
 0x2b1   : > { %v1462_v17 = vsub.f32 %v1446_v43, %v1458_v38  ;;  %v1633_v24 = vsub.f32 %v1631_v15, %v1625_v23  ;;  %v4874_v4 = vadd.f32 %v4873_v16, %v4872_v11  ;;  %v1629_v8 = vmax.f32 %v1627_v14, 0.0  ;;  %v7743_v38 = vpop.trf.xlu0 }
 0x2b3   : > { %4685 = vmatmul.mubr.msk.f32.gmra.mrb[58].mxu0 %vm561_vm0, %v7716_v29  ;;  %v5377_v52 = vpack.c.bf16 %v1462_v17, %v1461_v31  ;;  %v1635_v41 = vmax.f32 %v1633_v24, 0.0  ;;  %v1628_v46 = vsub.f32 %v4874_v4, %v1626_v61  ;;  %v1632_v25 = vsub.f32 0.0, %v4874_v4  ;;  %v7748_v15 = vpop.trf.xlu1 }
 0x2b4   : > { %1410 = vmatprep.mubr.f32.mxu0 %v9065_v34  ;;  %9102 = vst [vmem:[#allocation117_spill] sm:$0xff] %v7748_v15 }
 0x2b5   : > { %5378 = vmatprep.subr.bf16.mxu0 %v5377_v52  ;;  %v1630_v55 = vmax.f32 %v1628_v46, 0.0  ;;  %v1634_v1 = vsub.f32 %v1632_v25, %v1626_v61  ;;  %v1637_v23 = vsub.f32 %v1629_v8, %v1635_v41  ;;  %v7752_v11 = vpop.trf.xlu0  ;;  %v1868_v41 = vld [vmem:[%s8713_s9 + $0x218] sm:$0xff]  ;;  %v1865_v25 = vld [vmem:[%s8713_s9 + $0x200] sm:$0xff] }
 0x2b6   : > { %5380 = vmatpush3.bf16.msra.mxu0 %v5377_v52  ;;  %9103 = vst [vmem:[#allocation118_spill] sm:$0xff] %v7752_v11  ;;  %v1866_v52 = vld [vmem:[%s8713_s9 + $0x208] sm:$0xff] }
 0x2b7   : > { %4686 = vmatmul.mubr.msk.f32.gmra.mrb[60].mxu0 %vm561_vm0, %v7726_v36  ;;  %v1636_v43 = vmax.f32 %v1634_v1, 0.0  ;;  %v7755_v16 = vpop.trf.xlu1  ;;  %v7808_v46 = vpack.c.bf16 %v1868_v41, %v1866_v52  ;;  %v1870_v1 = vld [vmem:[%s8713_s9 + $0x228] sm:$0xff]  ;;  %v1869_v41 = vld [vmem:[%s8713_s9 + $0x220] sm:$0xff] }
 0x2b8   : > { %1416 = vmatprep.mubr.f32.mxu0 %v9065_v34  ;;  %9104 = vst [vmem:[#allocation119_spill] sm:$0xff] %v7755_v16 }
 0x2b9   : > { %v1638_v31 = vsub.f32 %v1630_v55, %v1636_v43  ;;  %9110 = vst [vmem:[#allocation125_spill] sm:$0xff] %v7808_v46  ;;  %5450 = vmatprep.subr.bf16.mxu1 %v7808_v46  ;;  %v1867_v55 = vld [vmem:[%s8713_s9 + $0x210] sm:$0xff] }
 0x2ba   : > { %v1871_v46 = vld [vmem:[%s8713_s9 + $0x230] sm:$0xff] }
 0x2bb   : > { %4687 = vmatmul.mubr.msk.f32.gmra.mrb[62].mxu0 %vm561_vm0, %v7736_v13  ;;  %v5381_v14 = vpack.c.bf16 %v1638_v31, %v1637_v23  ;;  %v7765_v61 = vpop.trf.xlu1  ;;  %v1872_v23 = vld [vmem:[%s8713_s9 + $0x238] sm:$0xff]  ;;  %v7823_v31 = vpack.c.bf16 %v1867_v55, %v1865_v25  ;;  %v7840_v55 = vpack.c.bf16 %v1871_v46, %v1869_v41 }
 0x2bc   : > { %1422 = vmatprep.mubr.f32.mxu0 %v9065_v34  ;;  %9105 = vst [vmem:[#allocation120_spill] sm:$0xff] %v7765_v61  ;;  %v7825_v52 = vpack.c.bf16 %v1872_v23, %v1870_v1  ;;  %v1876_v25 = vld [vmem:[%s8713_s9 + $0x258] sm:$0xff] }
 0x2bd   : > { %5382 = vmatprep.subr.bf16.mxu0 %v5381_v14  ;;  %9111 = vst [vmem:[#allocation126_spill] sm:$0xff] %v7823_v31  ;;  %9113 = vst [vmem:[#allocation128_spill] sm:$0xff] %v7840_v55  ;;  %v7843_v23 = vpack.c.bf16 %v1876_v25, %v1874_v12  ;;  %v1880_v46 = vld [vmem:[%s8713_s9 + $0x278] sm:$0xff] }
 0x2be   : > { %9112 = vst [vmem:[#allocation127_spill] sm:$0xff] %v7825_v52 }
 0x2bf   : > { %4688 = vmatmul.mubr.msk.f32.gmra.mrb[64].mxu0 %vm561_vm0, %v7743_v38  ;;  %v7771_v17 = vpop.trf.xlu1  ;;  %9114 = vst [vmem:[#allocation129_spill] sm:$0xff] %v7843_v23 }
 0x2c0   : > { %1428 = vmatprep.mubr.f32.mxu0 %v9065_v34  ;;  %9106 = vst [vmem:[#allocation121_spill] sm:$0xff] %v7771_v17 }
 0x2c3   : > { %4689 = vmatmul.mubr.msk.f32.gmra.mrb[66].mxu0 %vm561_vm0, %v7752_v11  ;;  %v7781_v24 = vpop.trf.xlu1 }
 0x2c4   : > { %5113 = vmatprep.mubr.msk.f32.mxu0 %vm1495_vm1, %v7579_v32  ;;  %9107 = vst [vmem:[#allocation122_spill] sm:$0xff] %v7781_v24 }
 0x2c7   : > { %5114 = vmatmul.mubr.msk.f32.vlgmr.msra.gmra.mrb[68].mxu0 %vm1495_vm1, %v7613_v7  ;;  %v7787_v4 = vpop.trf.xlu1 }
 0x2c8   : > { %5116 = vmatprep.mubr.msk.f32.mxu0 %vm1495_vm1, %v7637_v30  ;;  %5384 = vmatpush3.bf16.msra.mxu0 %v5381_v14  ;;  %9108 = vst [vmem:[#allocation123_spill] sm:$0xff] %v7787_v4 }
 0x2cb   : > { %5117 = vmatmul.mubr.msk.f32.gmra.mrb[70].mxu0 %vm1495_vm1, %v7664_v44  ;;  %v7797_v8 = vpop.trf.xlu1 }
 0x2cc   : > { %5119 = vmatprep.mubr.msk.f32.mxu0 %vm1495_vm1, %v7696_v6  ;;  %9109 = vst [vmem:[#allocation124_spill] sm:$0xff] %v7797_v8 }
 0x2cf   : > { %5120 = vmatmul.mubr.msk.f32.gmra.mrb[72].mxu0 %vm1495_vm1, %v7711_v48 }
 0x2d0   : > { %5122 = vmatprep.mubr.msk.f32.mxu0 %vm1495_vm1, %v7721_v37 }
 0x2d3   : > { %5123 = vmatmul.mubr.msk.f32.gmra.mrb[74].mxu0 %vm1495_vm1, %v7731_v53 }
 0x2d4   : > { %5129 = vmatprep.mubr.msk.f32.mxu0 %vm1671_vm2, %v7738_v58 }
 0x2d7   : > { %5130 = vmatmul.mubr.msk.f32.vlgmr.msra.gmra.mrb[76].mxu0 %vm1671_vm2, %v7748_v15  ;;  %v1923_v15 = vld [vmem:[%s8713_s9 + $0x3d0] sm:$0xff] }
 0x2d8   : > { %5132 = vmatprep.mubr.msk.f32.mxu0 %vm1671_vm2, %v7755_v16 }
 0x2db   : > { %5133 = vmatmul.mubr.msk.f32.gmra.mrb[78].mxu0 %vm1671_vm2, %v7765_v61  ;;  %v1919_v61 = vld [vmem:[%s8713_s9 + $0x3b0] sm:$0xff] }
 0x2dc   : > { %5135 = vmatprep.mubr.msk.f32.mxu0 %vm1671_vm2, %v7771_v17 }
 0x2df   : > { %5136 = vmatmul.mubr.msk.f32.gmra.mrb[80].mxu0 %vm1671_vm2, %v7781_v24  ;;  %v1911_v24 = vld [vmem:[%s8713_s9 + $0x370] sm:$0xff] }
 0x2e0   : > { %5138 = vmatprep.mubr.msk.f32.mxu0 %vm1671_vm2, %v7787_v4  ;;  %v1909_v4 = vld [vmem:[%s8713_s9 + $0x360] sm:$0xff] }
 0x2e3   : > { %5139 = vmatmul.mubr.msk.f32.gmra.mrb[82].mxu0 %vm1671_vm2, %v7797_v8 }
 0x2e4   : > { %2271 = vmatprep.mubr.f32.mxu0 %v9065_v34 }
 0x37a   : > { %v1388_v43 = vpop.f32.mrb[52].mxu0 }
 0x37b   : > { %v1390_v14 = vpop.f32.mrb[53].mxu0 }
 0x37c   : > { %1993 = vmatprep.mubr.f32.mxu1 %v1390_v14  ;;  %v1873_v14 = vld [vmem:[%s8713_s9 + $0x240] sm:$0xff] }
 0x37d   : > { %1994 = vmatmul.mubr.f32.vlgmr.msra.gmra.mrb[4].mxu1 %v1388_v43  ;;  %v1878_v43 = vld [vmem:[%s8713_s9 + $0x268] sm:$0xff]  ;;  %v7858_v12 = vpack.c.bf16 %v1875_v22, %v1873_v14  ;;  %v1884_v22 = vld [vmem:[%s8713_s9 + $0x298] sm:$0xff] }
 0x37e   : > { %5452 = vmatpush1.bf16.msra.mxu1 %v7823_v31  ;;  %v1394_v1 = vpop.f32.mrb[54].mxu0  ;;  %v7861_v25 = vpack.c.bf16 %v1880_v46, %v1878_v43  ;;  %v1879_v31 = vld [vmem:[%s8713_s9 + $0x270] sm:$0xff]  ;;  %v1881_v46 = vld [vmem:[%s8713_s9 + $0x280] sm:$0xff] }
 0x37f   : > { %5454 = vmatprep.subr.bf16.mxu1 %v7825_v52  ;;  %v1396_v59 = vpop.f32.mrb[55].mxu0  ;;  %9115 = vst [vmem:[#allocation130_spill] sm:$0xff] %v7858_v12  ;;  %v1877_v52 = vld [vmem:[%s8713_s9 + $0x260] sm:$0xff] }
 0x380   : > { %1999 = vmatprep.mubr.f32.mxu1 %v1396_v59  ;;  %9116 = vst [vmem:[#allocation131_spill] sm:$0xff] %v7861_v25  ;;  %v1882_v59 = vld [vmem:[%s8713_s9 + $0x288] sm:$0xff] }
 0x381   : > { %2000 = vmatmul.mubr.f32.gmra.mrb[6].mxu1 %v1394_v1  ;;  %v7876_v1 = vpack.c.bf16 %v1879_v31, %v1877_v52  ;;  %v7879_v43 = vpack.c.bf16 %v1884_v22, %v1882_v59  ;;  %v1888_v31 = vld [vmem:[%s8713_s9 + $0x2b8] sm:$0xff]  ;;  %v1885_v22 = vld [vmem:[%s8713_s9 + $0x2a0] sm:$0xff] }
 0x382   : > { %5456 = vmatpush1.bf16.msra.mxu1 %v7840_v55  ;;  %v1400_v41 = vpop.f32.mrb[56].mxu0 }
 0x383   : > { %5458 = vmatprep.subr.bf16.mxu1 %v7843_v23  ;;  %v1402_v8 = vpop.f32.mrb[57].mxu0  ;;  %9117 = vst [vmem:[#allocation132_spill] sm:$0xff] %v7876_v1  ;;  %9118 = vst [vmem:[#allocation133_spill] sm:$0xff] %v7879_v43  ;;  %v1883_v23 = vld [vmem:[%s8713_s9 + $0x290] sm:$0xff] }
 0x384   : > { %2005 = vmatprep.mubr.f32.mxu1 %v1402_v8  ;;  %v1886_v8 = vld [vmem:[%s8713_s9 + $0x2a8] sm:$0xff]  ;;  %v7894_v52 = vpack.c.bf16 %v1883_v23, %v1881_v46  ;;  %v1892_v23 = vld [vmem:[%s8713_s9 + $0x2d8] sm:$0xff] }
 0x385   : > { %2006 = vmatmul.mubr.f32.gmra.mrb[8].mxu1 %v1400_v41  ;;  %v7897_v59 = vpack.c.bf16 %v1888_v31, %v1886_v8 }
 0x386   : > { %5460 = vmatpush1.bf16.msra.mxu1 %v7858_v12  ;;  %v1406_v14 = vpop.f32.mrb[58].mxu0  ;;  %9119 = vst [vmem:[#allocation134_spill] sm:$0xff] %v7894_v52 }
 0x387   : > { %5462 = vmatprep.subr.bf16.mxu1 %v7861_v25  ;;  %v1408_v55 = vpop.f32.mrb[59].mxu0  ;;  %9120 = vst [vmem:[#allocation135_spill] sm:$0xff] %v7897_v59  ;;  %v1887_v25 = vld [vmem:[%s8713_s9 + $0x2b0] sm:$0xff] }
 0x388   : > { %2011 = vmatprep.mubr.f32.mxu1 %v1408_v55  ;;  %v1890_v55 = vld [vmem:[%s8713_s9 + $0x2c8] sm:$0xff] }
 0x389   : > { %2012 = vmatmul.mubr.f32.gmra.mrb[10].mxu1 %v1406_v14  ;;  %v7912_v14 = vpack.c.bf16 %v1887_v25, %v1885_v22  ;;  %v7915_v8 = vpack.c.bf16 %v1892_v23, %v1890_v55  ;;  %v1896_v25 = vld [vmem:[%s8713_s9 + $0x2f8] sm:$0xff] }
 0x38a   : > { %5464 = vmatpush1.bf16.msra.mxu1 %v7876_v1  ;;  %v1412_v41 = vpop.f32.mrb[60].mxu0  ;;  %v1891_v1 = vld [vmem:[%s8713_s9 + $0x2d0] sm:$0xff] }
 0x38b   : > { %5466 = vmatprep.subr.bf16.mxu1 %v7879_v43  ;;  %v1414_v12 = vpop.f32.mrb[61].mxu0  ;;  %9121 = vst [vmem:[#allocation136_spill] sm:$0xff] %v7912_v14  ;;  %9122 = vst [vmem:[#allocation137_spill] sm:$0xff] %v7915_v8  ;;  %v1889_v43 = vld [vmem:[%s8713_s9 + $0x2c0] sm:$0xff] }
 0x38c   : > { %2017 = vmatprep.mubr.f32.mxu1 %v1414_v12  ;;  %v1894_v12 = vld [vmem:[%s8713_s9 + $0x2e8] sm:$0xff] }
 0x38d   : > { %2018 = vmatmul.mubr.f32.gmra.mrb[12].mxu1 %v1412_v41  ;;  %v7930_v41 = vpack.c.bf16 %v1891_v1, %v1889_v43  ;;  %v7933_v23 = vpack.c.bf16 %v1896_v25, %v1894_v12  ;;  %v1900_v1 = vld [vmem:[%s8713_s9 + $0x318] sm:$0xff] }
 0x38e   : > { %5468 = vmatpush1.bf16.msra.mxu1 %v7894_v52  ;;  %v1418_v46 = vpop.f32.mrb[62].mxu0  ;;  %v1895_v52 = vld [vmem:[%s8713_s9 + $0x2f0] sm:$0xff] }
 0x38f   : > { %5470 = vmatprep.subr.bf16.mxu1 %v7897_v59  ;;  %v1420_v31 = vpop.f32.mrb[63].mxu0  ;;  %9123 = vst [vmem:[#allocation138_spill] sm:$0xff] %v7930_v41  ;;  %9124 = vst [vmem:[#allocation139_spill] sm:$0xff] %v7933_v23  ;;  %v1893_v59 = vld [vmem:[%s8713_s9 + $0x2e0] sm:$0xff] }
 0x390   : > { %2023 = vmatprep.mubr.f32.mxu1 %v1420_v31  ;;  %v7948_v31 = vpack.c.bf16 %v1895_v52, %v1893_v59  ;;  %v1904_v52 = vld [vmem:[%s8713_s9 + $0x338] sm:$0xff] }
 0x391   : > { %2024 = vmatmul.mubr.f32.gmra.mrb[14].mxu1 %v1418_v46  ;;  %v1898_v46 = vld [vmem:[%s8713_s9 + $0x308] sm:$0xff] }
 0x392   : > { %5472 = vmatpush1.bf16.msra.mxu1 %v7912_v14  ;;  %v1424_v22 = vpop.f32.mrb[64].mxu0  ;;  %9125 = vst [vmem:[#allocation140_spill] sm:$0xff] %v7948_v31  ;;  %v7951_v25 = vpack.c.bf16 %v1900_v1, %v1898_v46  ;;  %v1899_v14 = vld [vmem:[%s8713_s9 + $0x310] sm:$0xff] }
 0x393   : > { %5474 = vmatprep.subr.bf16.mxu1 %v7915_v8  ;;  %v1426_v55 = vpop.f32.mrb[65].mxu0  ;;  %v1897_v8 = vld [vmem:[%s8713_s9 + $0x300] sm:$0xff] }
 0x394   : > { %2029 = vmatprep.mubr.f32.mxu1 %v1426_v55  ;;  %9126 = vst [vmem:[#allocation141_spill] sm:$0xff] %v7951_v25  ;;  %v7968_v55 = vpack.c.bf16 %v1899_v14, %v1897_v8  ;;  %v1908_v14 = vld [vmem:[%s8713_s9 + $0x358] sm:$0xff] }
 0x395   : > { %2030 = vmatmul.mubr.f32.gmra.mrb[16].mxu1 %v1424_v22  ;;  %v1902_v22 = vld [vmem:[%s8713_s9 + $0x328] sm:$0xff] }
 0x396   : > { %5476 = vmatpush1.bf16.msra.mxu1 %v7930_v41  ;;  %v1430_v43 = vpop.f32.mrb[66].mxu0  ;;  %9127 = vst [vmem:[#allocation142_spill] sm:$0xff] %v7968_v55  ;;  %v7973_v1 = vpack.c.bf16 %v1904_v52, %v1902_v22  ;;  %v1907_v41 = vld [vmem:[%s8713_s9 + $0x350] sm:$0xff] }
 0x397   : > { %5478 = vmatprep.subr.bf16.mxu1 %v7933_v23  ;;  %v1432_v12 = vpop.f32.mrb[67].mxu0  ;;  %v1901_v23 = vld [vmem:[%s8713_s9 + $0x320] sm:$0xff] }
 0x398   : > { %2035 = vmatprep.mubr.f32.mxu1 %v1432_v12  ;;  %9128 = vst [vmem:[#allocation143_spill] sm:$0xff] %v7973_v1  ;;  %v1906_v12 = vld [vmem:[%s8713_s9 + $0x348] sm:$0xff] }
 0x399   : > { %2036 = vmatmul.mubr.f32.gmra.mrb[18].mxu1 %v1430_v43  ;;  %v1903_v43 = vld [vmem:[%s8713_s9 + $0x330] sm:$0xff] }
 0x39a   : > { %5480 = vmatpush1.bf16.msra.mxu1 %v7948_v31  ;;  %v7966_v59 = vpop.f32.mrb[68].mxu0  ;;  %v7990_v22 = vpack.c.bf16 %v1903_v43, %v1901_v23  ;;  %v1905_v31 = vld [vmem:[%s8713_s9 + $0x340] sm:$0xff]  ;;  %v1912_v23 = vld [vmem:[%s8713_s9 + $0x378] sm:$0xff] }
 0x39b   : > { %v7970_v46 = vpop.f32.mrb[69].mxu0  ;;  %5482 = vmatprep.subr.bf16.mxu1 %v7951_v25  ;;  %v7995_v25 = vpack.c.bf16 %v1908_v14, %v1906_v12  ;;  %v8010_v43 = vpack.c.bf16 %v1907_v41, %v1905_v31  ;;  %v1916_v41 = vld [vmem:[%s8713_s9 + $0x398] sm:$0xff]  ;;  %v8028_v31 = vpack.c.bf16 %v1911_v24, %v1909_v4 }
 0x39c   : > { %9129 = vst [vmem:[#allocation144_spill] sm:$0xff] %v7990_v22  ;;  %v1920_v24 = vld [vmem:[%s8713_s9 + $0x3b8] sm:$0xff] }
 0x39d   : > { %9130 = vst [vmem:[#allocation145_spill] sm:$0xff] %v7995_v25  ;;  %9131 = vst [vmem:[#allocation146_spill] sm:$0xff] %v8010_v43 }
 0x39e   : > { %5484 = vmatpush1.bf16.msra.mxu1 %v7968_v55  ;;  %v7988_v8 = vpop.f32.mrb[70].mxu0  ;;  %v1910_v55 = vld [vmem:[%s8713_s9 + $0x368] sm:$0xff]  ;;  %9133 = vst [vmem:[#allocation148_spill] sm:$0xff] %v8028_v31 }
 0x39f   : > { %5486 = vmatprep.subr.bf16.mxu1 %v7973_v1  ;;  %v7993_v52 = vpop.f32.mrb[71].mxu0  ;;  %v8013_v14 = vpack.c.bf16 %v1912_v23, %v1910_v55 }
 0x3a1   : > { %9132 = vst [vmem:[#allocation147_spill] sm:$0xff] %v8013_v14 }
 0x3a2   : > { %5488 = vmatpush1.bf16.msra.mxu1 %v7990_v22  ;;  %v5121_v12 = vpop.f32.mrb[72].mxu0  ;;  %v1914_v22 = vld [vmem:[%s8713_s9 + $0x388] sm:$0xff] }
 0x3a3   : > { %5490 = vmatprep.subr.bf16.mxu1 %v7995_v25  ;;  %v1606_v1 = vpop.f32.mrb[73].mxu0  ;;  %v8031_v23 = vpack.c.bf16 %v1916_v41, %v1914_v22  ;;  %v1913_v25 = vld [vmem:[%s8713_s9 + $0x380] sm:$0xff] }
 0x3a4   : > { %v8046_v4 = vpack.c.bf16 %v1915_v5, %v1913_v25  ;;  %v1924_v5 = vld [vmem:[%s8713_s9 + $0x3d8] sm:$0xff] }
 0x3a5   : > { %9134 = vst [vmem:[#allocation149_spill] sm:$0xff] %v8031_v23 }
 0x3a6   : > { %5492 = vmatpush1.bf16.msra.mxu1 %v8010_v43  ;;  %v5124_v55 = vpop.f32.mrb[74].mxu0  ;;  %v1918_v43 = vld [vmem:[%s8713_s9 + $0x3a8] sm:$0xff]  ;;  %9135 = vst [vmem:[#allocation150_spill] sm:$0xff] %v8046_v4 }
 0x3a7   : > { %5494 = vmatprep.subr.bf16.mxu1 %v8013_v14  ;;  %v1616_v17 = vpop.f32.mrb[75].mxu0  ;;  %v8049_v41 = vpack.c.bf16 %v1920_v24, %v1918_v43  ;;  %v1917_v14 = vld [vmem:[%s8713_s9 + $0x3a0] sm:$0xff] }
 0x3a8   : > { %v8064_v25 = vpack.c.bf16 %v1919_v61, %v1917_v14  ;;  %v1928_v61 = vld [vmem:[%s8713_s9 + $0x3f8] sm:$0xff] }
 0x3a9   : > { %9136 = vst [vmem:[#allocation151_spill] sm:$0xff] %v8049_v41 }
 0x3aa   : > { %5496 = vmatpush1.bf16.msra.mxu1 %v8028_v31  ;;  %v5131_v22 = vpop.f32.mrb[76].mxu0  ;;  %v1922_v31 = vld [vmem:[%s8713_s9 + $0x3c8] sm:$0xff]  ;;  %9137 = vst [vmem:[#allocation152_spill] sm:$0xff] %v8064_v25 }
 0x3ab   : > { %5498 = vmatprep.subr.bf16.mxu1 %v8031_v23  ;;  %v1762_v16 = vpop.f32.mrb[77].mxu0  ;;  %v8067_v24 = vpack.c.bf16 %v1924_v5, %v1922_v31  ;;  %v1921_v23 = vld [vmem:[%s8713_s9 + $0x3c0] sm:$0xff] }
 0x3ac   : > { %2106 = vmatprep.mubr.f32.mxu1 %v1762_v16  ;;  %v1926_v16 = vld [vmem:[%s8713_s9 + $0x3e8] sm:$0xff]  ;;  %v8082_v14 = vpack.c.bf16 %v1923_v15, %v1921_v23 }
 0x3ad   : > { %9138 = vst [vmem:[#allocation153_spill] sm:$0xff] %v8067_v24  ;;  %v8085_v5 = vpack.c.bf16 %v1928_v61, %v1926_v16 }
 0x3ae   : > { %5500 = vmatpush1.bf16.msra.mxu1 %v8046_v4  ;;  %v5134_v43 = vpop.f32.mrb[78].mxu0  ;;  %9139 = vst [vmem:[#allocation154_spill] sm:$0xff] %v8082_v14  ;;  %v1927_v4 = vld [vmem:[%s8713_s9 + $0x3f0] sm:$0xff] }
 0x3af   : > { %5502 = vmatprep.subr.bf16.mxu1 %v8049_v41  ;;  %v1772_v58 = vpop.f32.mrb[79].mxu0  ;;  %9140 = vst [vmem:[#allocation155_spill] sm:$0xff] %v8085_v5  ;;  %v1925_v41 = vld [vmem:[%s8713_s9 + $0x3e0] sm:$0xff] }
 0x3b0   : > { %v8094_v11 = vpack.c.bf16 %v1927_v4, %v1925_v41  ;;  %v6243_v4 = vld [vmem:[%s6771_s20 + $0x8] sm:$0xff] }
 0x3b2   : > { %5504 = vmatpush1.bf16.msra.mxu1 %v8064_v25  ;;  %v5137_v31 = vpop.f32.mrb[80].mxu0  ;;  %9141 = vst [vmem:[#allocation156_spill] sm:$0xff] %v8094_v11  ;;  %v6246_v25 = vld [vmem:[%s6771_s20 + $0x30] sm:$0xff] }
 0x3b3   : > { %5506 = vmatprep.subr.bf16.mxu1 %v8067_v24  ;;  %v1782_v53 = vpop.f32.mrb[81].mxu0  ;;  %v6245_v24 = vld [vmem:[%s6771_s20 + $0x20] sm:$0xff] }
 0x3b6   : > { %5508 = vmatpush1.bf16.msra.mxu1 %v8082_v14  ;;  %v5140_v15 = vpop.f32.mrb[82].mxu0 }
 0x3b7   : > { %5510 = vmatprep.subr.bf16.mxu1 %v8085_v5  ;;  %v1792_v23 = vpop.f32.mrb[83].mxu0 }
 0x3ba   : > { %5512 = vmatpush1.bf16.msra.mxu1 %v8094_v11 }
 0x3bd   : > { %2107 = vmatmul.mubr.f32.vlgmr.msra.gmra.mrb[4].mxu1 %v7970_v46  ;;  %v8105_v46 = vstv %s4707_s15 }
 0x3be   : > { %2112 = vmatprep.mubr.f32.mxu1 %v5131_v22  ;;  %v2176_v22 = vmul.f32 %v6243_v4, %v8105_v46 }
 0x3c1   : > { %2113 = vmatmul.mubr.f32.gmra.mrb[6].mxu1 %v7966_v59  ;;  %v8103_v59 = vstv %s4706_s21  ;;  %s4792_s21 = sshll.u32 (%p9361_p9), %s6593_s16, 4 }
 0x3c2   : > { %2118 = vmatprep.mubr.f32.mxu1 %v1772_v58  ;;  %s4490_s30 = scalar_lea.vmem (%p9361_p9), %s9362_s23, %s4792_s21 }
 0x3c5   : > { %2119 = vmatmul.mubr.f32.gmra.mrb[8].mxu1 %v7993_v52 }
 0x3c6   : > { %2124 = vmatprep.mubr.f32.mxu1 %v5134_v43  ;;  %v6244_v43 = vld [vmem:[%s6771_s20 + $0x18] sm:$0xff] }
 0x3c7   : > { %v2178_v16 = vmul.f32 %v6244_v43, %v8105_v46  ;;  %v2179_v43 = vmul.f32 %v6245_v24, %v8105_v46 }
 0x3c9   : > { %2125 = vmatmul.mubr.f32.gmra.mrb[10].mxu1 %v7988_v8  ;;  %v6241_v8 = vld [vmem:[%s6771_s20] sm:$0xff] }
 0x3ca   : > { %2130 = vmatprep.mubr.f32.mxu1 %v1782_v53  ;;  %v2175_v52 = vmul.f32 %v6241_v8, %v8105_v46 }
 0x3cd   : > { %2131 = vmatmul.mubr.f32.gmra.mrb[12].mxu1 %v1606_v1 }
 0x3ce   : > { %2136 = vmatprep.mubr.f32.mxu1 %v5137_v31 }
 0x3d1   : > { %2137 = vmatmul.mubr.f32.gmra.mrb[14].mxu1 %v5121_v12 }
 0x3d2   : > { %2142 = vmatprep.mubr.f32.mxu1 %v1792_v23 }
 0x3d5   : > { %2143 = vmatmul.mubr.f32.gmra.mrb[16].mxu1 %v1616_v17  ;;  %v6242_v17 = vld [vmem:[%s6771_s20 + $0x10] sm:$0xff] }
 0x3d6   : > { %2148 = vmatprep.mubr.f32.mxu1 %v5140_v15  ;;  %v2177_v12 = vmul.f32 %v6242_v17, %v8105_v46 }
 0x3d9   : > { %2149 = vmatmul.mubr.f32.gmra.mrb[18].mxu1 %v5124_v55 }
 0x3da   : > { %2789 = vmatprep.mubr.f32.mxu1 %v9065_v34 }
 0x490   : > { %v2108_v58 = vpop.f32.mrb[4].mxu1 }
 0x491   : > { %v2110_v53 = vpop.f32.mrb[5].mxu1  ;;  %v2158_v1 = vmul.f32 %v8103_v59, %v2108_v58 }
 0x492   : > { %v2159_v55 = vmul.f32 %v8103_v59, %v2110_v53 }
 0x493   : > { %v2191_v23 = vadd.f32 %v2175_v52, %v2158_v1 }
 0x494   : > { %v2114_v41 = vpop.f32.mrb[6].mxu1  ;;  %v2192_v8 = vadd.f32 %v2176_v22, %v2159_v55 }
 0x495   : > { %v2160_v61 = vmul.f32 %v8103_v59, %v2114_v41  ;;  %v2116_v31 = vpop.f32.mrb[7].mxu1  ;;  %v2181_v41 = vmul.f32 %v6246_v25, %v8105_v46 }
 0x496   : > { %v2161_v15 = vmul.f32 %v8103_v59, %v2116_v31  ;;  %v6247_v31 = vld [vmem:[%s6771_s20 + $0x28] sm:$0xff] }
 0x497   : > { %v2193_v58 = vadd.f32 %v2177_v12, %v2160_v61  ;;  %v2180_v1 = vmul.f32 %v6247_v31, %v8105_v46  ;;  %v6248_v12 = vld [vmem:[%s6771_s20 + $0x38] sm:$0xff] }
 0x498   : > { %v2194_v53 = vadd.f32 %v2178_v16, %v2161_v15  ;;  %v2120_v17 = vpop.f32.mrb[8].mxu1  ;;  %v2182_v55 = vmul.f32 %v6248_v12, %v8105_v46 }
 0x499   : > { %v5515_v11 = vpack.c.bf16 %v2193_v58, %v2191_v23  ;;  %v2122_v4 = vpop.f32.mrb[9].mxu1  ;;  %v2162_v14 = vmul.f32 %v8103_v59, %v2120_v17 }
 0x49a   : > { %v5513_v5 = vpack.c.bf16 %v2194_v53, %v2192_v8  ;;  %v2163_v37 = vmul.f32 %v8103_v59, %v2122_v4  ;;  %v6249_v4 = vld [vmem:[%s6771_s20 + $0x40] sm:$0xff] }
 0x49b   : > { %v2195_v25 = vadd.f32 %v2179_v43, %v2162_v14  ;;  %v2183_v31 = vmul.f32 %v6249_v4, %v8105_v46  ;;  %v6252_v43 = vld [vmem:[%s6771_s20 + $0x58] sm:$0xff] }
 0x49c   : > { %v2126_v52 = vpop.f32.mrb[10].mxu1  ;;  %5514 = vmatprep.subr.bf16.mxu0 %v5513_v5  ;;  %v2196_v15 = vadd.f32 %v2180_v1, %v2163_v37 }
 0x49d   : > { %v2164_v22 = vmul.f32 %v8103_v59, %v2126_v52  ;;  %v2128_v16 = vpop.f32.mrb[11].mxu1  ;;  %5516 = vmatpush1.bf16.msra.mxu0 %v5515_v11  ;;  %v6250_v52 = vld [vmem:[%s6771_s20 + $0x50] sm:$0xff] }
 0x49e   : > { %v2165_v24 = vmul.f32 %v8103_v59, %v2128_v16  ;;  %v2185_v11 = vmul.f32 %v6250_v52, %v8105_v46  ;;  %v6251_v16 = vld [vmem:[%s6771_s20 + $0x48] sm:$0xff]  ;;  %v6253_v52 = vld [vmem:[%s6771_s20 + $0x60] sm:$0xff] }
 0x49f   : > { %v2197_v61 = vadd.f32 %v2181_v41, %v2164_v22  ;;  %v2184_v14 = vmul.f32 %v6251_v16, %v8105_v46  ;;  %v2186_v41 = vmul.f32 %v6252_v43, %v8105_v46  ;;  %v2187_v16 = vmul.f32 %v6253_v52, %v8105_v46  ;;  %v6263_v52 = vld [vmem:[#allocation6 + $0x30] sm:$0xff] }
 0x4a0   : > { %v2198_v23 = vadd.f32 %v2182_v55, %v2165_v24  ;;  %v2132_v58 = vpop.f32.mrb[12].mxu1 }
 0x4a1   : > { %v5519_v8 = vpack.c.bf16 %v2197_v61, %v2195_v25  ;;  %v2134_v5 = vpop.f32.mrb[13].mxu1  ;;  %v2166_v17 = vmul.f32 %v8103_v59, %v2132_v58 }
 0x4a2   : > { %v5517_v53 = vpack.c.bf16 %v2198_v23, %v2196_v15  ;;  %v2167_v12 = vmul.f32 %v8103_v59, %v2134_v5 }
 0x4a3   : > { %v2199_v24 = vadd.f32 %v2183_v31, %v2166_v17 }
 0x4a4   : > { %v2138_v37 = vpop.f32.mrb[14].mxu1  ;;  %5518 = vmatprep.subr.bf16.mxu0 %v5517_v53  ;;  %v2200_v61 = vadd.f32 %v2184_v14, %v2167_v12 }
 0x4a5   : > { %v2168_v1 = vmul.f32 %v8103_v59, %v2138_v37  ;;  %v2140_v55 = vpop.f32.mrb[15].mxu1  ;;  %5520 = vmatpush1.bf16.msra.mxu0 %v5519_v8  ;;  %v6254_v37 = vld [vmem:[%s6771_s20 + $0x70] sm:$0xff] }
 0x4a6   : > { %v2169_v22 = vmul.f32 %v8103_v59, %v2140_v55  ;;  %v2189_v8 = vmul.f32 %v6254_v37, %v8105_v46  ;;  %v6255_v55 = vld [vmem:[%s6771_s20 + $0x68] sm:$0xff]  ;;  %v6265_v37 = vld [vmem:[#allocation6 + $0x40] sm:$0xff] }
 0x4a7   : > { %v2201_v25 = vadd.f32 %v2185_v11, %v2168_v1  ;;  %v2188_v17 = vmul.f32 %v6255_v55, %v8105_v46  ;;  %v6256_v11 = vld [vmem:[%s6771_s20 + $0x78] sm:$0xff] }
 0x4a8   : > { %v2202_v15 = vadd.f32 %v2186_v41, %v2169_v22  ;;  %v2144_v23 = vpop.f32.mrb[16].mxu1  ;;  %v2190_v12 = vmul.f32 %v6256_v11, %v8105_v46  ;;  %v6259_v46 = vld [vmem:[#allocation6 + $0x10] sm:$0xff]  ;;  %v6268_v55 = vld [vmem:[#allocation6 + $0x58] sm:$0xff] }
 0x4a9   : > { %v5523_v58 = vpack.c.bf16 %v2201_v25, %v2199_v24  ;;  %v2146_v5 = vpop.f32.mrb[17].mxu1  ;;  %v2170_v4 = vmul.f32 %v8103_v59, %v2144_v23  ;;  %v9143_v11 = vld [vmem:[#allocation43_spill] sm:$0xff] }
 0x4aa   : > { %v5521_v53 = vpack.c.bf16 %v2202_v15, %v2200_v61  ;;  %v2171_v43 = vmul.f32 %v8103_v59, %v2146_v5  ;;  %v6257_v5 = vld [vmem:[#allocation6] sm:$0xff] }
 0x4ab   : > { %v2203_v22 = vadd.f32 %v2187_v16, %v2170_v4  ;;  %v6262_v4 = vld [vmem:[#allocation6 + $0x28] sm:$0xff]  ;;  %v6264_v16 = vld [vmem:[#allocation6 + $0x38] sm:$0xff] }
 0x4ac   : > { %v2150_v31 = vpop.f32.mrb[18].mxu1  ;;  %5522 = vmatprep.subr.bf16.mxu0 %v5521_v53  ;;  %v2204_v25 = vadd.f32 %v2188_v17, %v2171_v43  ;;  %v6261_v53 = vld [vmem:[#allocation6 + $0x20] sm:$0xff]  ;;  %v6267_v43 = vld [vmem:[#allocation6 + $0x50] sm:$0xff] }
 0x4ad   : > { %v2172_v14 = vmul.f32 %v8103_v59, %v2150_v31  ;;  %v2152_v41 = vpop.f32.mrb[19].mxu1  ;;  %5524 = vmatpush1.bf16.msra.mxu0 %v5523_v58  ;;  %v6260_v58 = vld [vmem:[#allocation6 + $0x18] sm:$0xff]  ;;  %v6269_v17 = vld [vmem:[#allocation6 + $0x60] sm:$0xff]  ;;  %v9142_v31 = vld [vmem:[#allocation42_spill] sm:$0xff] }
 0x4ae   : > { %v2173_v1 = vmul.f32 %v8103_v59, %v2152_v41  ;;  %v6258_v59 = vld [vmem:[#allocation6 + $0x8] sm:$0xff] }
 0x4af   : > { %v2205_v24 = vadd.f32 %v2189_v8, %v2172_v14  ;;  %v6266_v8 = vld [vmem:[#allocation6 + $0x48] sm:$0xff]  ;;  %v9144_v14 = vld [vmem:[#allocation44_spill] sm:$0xff] }
 0x4b0   : > { %v2206_v61 = vadd.f32 %v2190_v12, %v2173_v1  ;;  %v6270_v12 = vld [vmem:[#allocation6 + $0x68] sm:$0xff]  ;;  %v9146_v1 = vld [vmem:[#allocation46_spill] sm:$0xff] }
 0x4b1   : > { %v5527_v15 = vpack.c.bf16 %v2205_v24, %v2203_v22  ;;  %v9145_v41 = vld [vmem:[#allocation45_spill] sm:$0xff]  ;;  %v9147_v22 = vld [vmem:[#allocation47_spill] sm:$0xff]  ;;  %v9148_v24 = vld [vmem:[#allocation48_spill] sm:$0xff] }
 0x4b2   : > { %v5525_v23 = vpack.c.bf16 %v2206_v61, %v2204_v25  ;;  %v9149_v25 = vld [vmem:[#allocation49_spill] sm:$0xff] }
 0x4b4   : > { %5526 = vmatprep.subr.bf16.mxu0 %v5525_v23  ;;  %v9150_v23 = vld [vmem:[#allocation66_spill] sm:$0xff] }
 0x4b5   : > { %5528 = vmatpush1.bf16.msra.mxu0 %v5527_v15 }
 0x4b6   : > { %5530 = vmatprep.subr.bf16.mxu0 %v6867_v40 }
 0x4b8   : > { %4708 = vmatmul.mubr.msk.f32.vlgmr.msra.gmra.mrb[84].mxu0 %vm561_vm0, %v6257_v5 }
 0x4b9   : > { %2277 = vmatprep.mubr.f32.mxu0 %v9065_v34  ;;  %5532 = vmatpush1.bf16.msra.mxu0 %v6885_v47 }
 0x4ba   : > { %5534 = vmatprep.subr.bf16.mxu0 %v6890_v49 }
 0x4bc   : > { %4709 = vmatmul.mubr.msk.f32.gmra.mrb[86].mxu0 %vm561_vm0, %v6258_v59 }
 0x4bd   : > { %2283 = vmatprep.mubr.f32.mxu0 %v9065_v34  ;;  %5536 = vmatpush1.bf16.msra.mxu0 %v6909_v54 }
 0x4be   : > { %5538 = vmatprep.subr.bf16.mxu0 %v6914_v56 }
 0x4c0   : > { %4710 = vmatmul.mubr.msk.f32.gmra.mrb[88].mxu0 %vm561_vm0, %v6259_v46  ;;  %v9151_v46 = vld [vmem:[#allocation67_spill] sm:$0xff] }
 0x4c1   : > { %2289 = vmatprep.mubr.f32.mxu0 %v9065_v34  ;;  %5540 = vmatpush1.bf16.msra.mxu0 %v6933_v60 }
 0x4c2   : > { %5542 = vmatprep.subr.bf16.mxu0 %v6936_v62 }
 0x4c4   : > { %4711 = vmatmul.mubr.msk.f32.gmra.mrb[90].mxu0 %vm561_vm0, %v6260_v58  ;;  %v9152_v58 = vld [vmem:[#allocation68_spill] sm:$0xff] }
 0x4c5   : > { %2295 = vmatprep.mubr.f32.mxu0 %v9065_v34  ;;  %5544 = vmatpush1.bf16.msra.mxu0 %v6954_v2 }
 0x4c6   : > { %5546 = vmatprep.subr.bf16.mxu0 %v6957_v3 }
 0x4c8   : > { %4712 = vmatmul.mubr.msk.f32.gmra.mrb[92].mxu0 %vm561_vm0, %v6261_v53 }
 0x4c9   : > { %2301 = vmatprep.mubr.f32.mxu0 %v9065_v34  ;;  %5548 = vmatpush1.bf16.msra.mxu0 %v6977_v9 }
 0x4ca   : > { %5550 = vmatprep.subr.bf16.mxu0 %v6980_v10 }
 0x4cc   : > { %4713 = vmatmul.mubr.msk.f32.gmra.mrb[94].mxu0 %vm561_vm0, %v6262_v4 }
 0x4cd   : > { %2307 = vmatprep.mubr.f32.mxu0 %v9065_v34  ;;  %5552 = vmatpush1.bf16.msra.mxu0 %v7001_v18 }
 0x4ce   : > { %5554 = vmatprep.subr.bf16.mxu0 %v7004_v19 }
 0x4d0   : > { %4714 = vmatmul.mubr.msk.f32.gmra.mrb[96].mxu0 %vm561_vm0, %v6263_v52  ;;  %v9153_v52 = vld [vmem:[#allocation69_spill] sm:$0xff] }
 0x4d1   : > { %2313 = vmatprep.mubr.f32.mxu0 %v9065_v34  ;;  %5556 = vmatpush1.bf16.msra.mxu0 %v7023_v27 }
 0x4d2   : > { %5558 = vmatprep.subr.bf16.mxu0 %v7026_v28 }
 0x4d4   : > { %4715 = vmatmul.mubr.msk.f32.gmra.mrb[98].mxu0 %vm561_vm0, %v6264_v16  ;;  %v9154_v16 = vld [vmem:[#allocation70_spill] sm:$0xff] }
 0x4d5   : > { %2319 = vmatprep.mubr.f32.mxu0 %v9065_v34  ;;  %5560 = vmatpush1.bf16.msra.mxu0 %v7044_v33 }
 0x4d6   : > { %5562 = vmatprep.subr.bf16.mxu0 %v7047_v35 }
 0x4d8   : > { %4716 = vmatmul.mubr.msk.f32.gmra.mrb[100].mxu0 %vm561_vm0, %v6265_v37 }
 0x4d9   : > { %2325 = vmatprep.mubr.f32.mxu0 %v9065_v34  ;;  %5564 = vmatpush1.bf16.msra.mxu0 %v7064_v39 }
 0x4da   : > { %5566 = vmatprep.subr.bf16.mxu0 %v7067_v42 }
 0x4dc   : > { %4717 = vmatmul.mubr.msk.f32.gmra.mrb[102].mxu0 %vm561_vm0, %v6266_v8 }
 0x4dd   : > { %2331 = vmatprep.mubr.f32.mxu0 %v9065_v34  ;;  %5568 = vmatpush1.bf16.msra.mxu0 %v7085_v50 }
 0x4de   : > { %5570 = vmatprep.subr.bf16.mxu0 %v7088_v51  ;;  %v6273_v51 = vld [vmem:[#allocation9 + $0x10] sm:$0xff] }
 0x4e0   : > { %4718 = vmatmul.mubr.msk.f32.gmra.mrb[104].mxu0 %vm561_vm0, %v6267_v43  ;;  %v9155_v43 = vld [vmem:[#allocation71_spill] sm:$0xff] }
 0x4e1   : > { %2337 = vmatprep.mubr.f32.mxu0 %v9065_v34  ;;  %5572 = vmatpush1.bf16.msra.mxu0 %v7106_v57 }
 0x4e2   : > { %5574 = vmatprep.subr.bf16.mxu0 %v7109_v21 }
 0x4e4   : > { %4719 = vmatmul.mubr.msk.f32.gmra.mrb[106].mxu0 %vm561_vm0, %v6268_v55  ;;  %v9156_v55 = vld [vmem:[#allocation72_spill] sm:$0xff] }
 0x4e5   : > { %2343 = vmatprep.mubr.f32.mxu0 %v9065_v34  ;;  %5576 = vmatpush1.bf16.msra.mxu0 %v7127_v63 }
 0x4e6   : > { %5578 = vmatprep.subr.bf16.mxu0 %v7130_v0  ;;  %v6272_v0 = vld [vmem:[#allocation9 + $0x8] sm:$0xff] }
 0x4e8   : > { %4720 = vmatmul.mubr.msk.f32.gmra.mrb[108].mxu0 %vm561_vm0, %v6269_v17 }
 0x4e9   : > { %2349 = vmatprep.mubr.f32.mxu0 %v9065_v34  ;;  %5580 = vmatpush1.bf16.msra.mxu0 %v9142_v31 }
 0x4ea   : > { %5582 = vmatprep.subr.bf16.mxu0 %v9143_v11  ;;  %v6271_v11 = vld [vmem:[#allocation9] sm:$0xff] }
 0x4ec   : > { %4721 = vmatmul.mubr.msk.f32.gmra.mrb[110].mxu0 %vm561_vm0, %v6270_v12 }
 0x4ed   : > { %5584 = vmatpush1.bf16.msra.mxu0 %v9144_v14 }
 0x4ee   : > { %5586 = vmatprep.subr.bf16.mxu0 %v9145_v41 }
 0x4f1   : > { %5588 = vmatpush1.bf16.msra.mxu0 %v9146_v1 }
 0x4f2   : > { %5590 = vmatprep.subr.bf16.mxu0 %v9147_v22  ;;  %v9178_v22 = vld [vmem:[#allocation63_spill] sm:$0xff] }
 0x4f5   : > { %5592 = vmatpush1.bf16.msra.mxu0 %v9148_v24  ;;  %v9177_v24 = vld [vmem:[#allocation62_spill] sm:$0xff] }
 0x4f6   : > { %5594 = vmatprep.subr.bf16.mxu0 %v9149_v25  ;;  %v9176_v25 = vld [vmem:[#allocation61_spill] sm:$0xff] }
 0x58b   : > { %v2273_v61 = vpop.f32.mrb[84].mxu0 }
 0x58c   : > { %v2275_v15 = vpop.f32.mrb[85].mxu0 }
 0x58d   : > { %2420 = vmatprep.mubr.f32.mxu0 %v2275_v15  ;;  %v9158_v15 = vld [vmem:[#allocation74_spill] sm:$0xff] }
 0x58e   : > { %2421 = vmatmul.mubr.f32.vlgmr.msra.gmra.mrb[112].mxu0 %v2273_v61  ;;  %v9157_v61 = vld [vmem:[#allocation73_spill] sm:$0xff] }
 0x58f   : > { %5596 = vmatpush3.bf16.msra.mxu0 %v9150_v23  ;;  %v2279_v5 = vpop.f32.mrb[86].mxu0 }
 0x590   : > { %v2281_v59 = vpop.f32.mrb[87].mxu0  ;;  %5598 = vmatprep.subr.bf16.mxu0 %v9151_v46  ;;  %v9174_v46 = vld [vmem:[#allocation59_spill] sm:$0xff] }
 0x591   : > { %2426 = vmatprep.mubr.f32.mxu0 %v2281_v59 }
 0x592   : > { %2427 = vmatmul.mubr.f32.gmra.mrb[114].mxu0 %v2279_v5 }
 0x593   : > { %5600 = vmatpush3.bf16.msra.mxu0 %v9152_v58  ;;  %v2285_v53 = vpop.f32.mrb[88].mxu0 }
 0x594   : > { %v2287_v4 = vpop.f32.mrb[89].mxu0  ;;  %5602 = vmatprep.subr.bf16.mxu0 %v9153_v52  ;;  %v9172_v52 = vld [vmem:[#allocation57_spill] sm:$0xff] }
 0x595   : > { %2432 = vmatprep.mubr.f32.mxu0 %v2287_v4  ;;  %v9160_v4 = vld [vmem:[#allocation76_spill] sm:$0xff] }
 0x596   : > { %2433 = vmatmul.mubr.f32.gmra.mrb[116].mxu0 %v2285_v53  ;;  %v9159_v53 = vld [vmem:[#allocation75_spill] sm:$0xff] }
 0x597   : > { %5604 = vmatpush3.bf16.msra.mxu0 %v9154_v16  ;;  %v2291_v37 = vpop.f32.mrb[90].mxu0  ;;  %v9171_v16 = vld [vmem:[#allocation56_spill] sm:$0xff] }
 0x598   : > { %v2293_v8 = vpop.f32.mrb[91].mxu0  ;;  %5606 = vmatprep.subr.bf16.mxu0 %v9155_v43  ;;  %v9161_v43 = vld [vmem:[#allocation77_spill] sm:$0xff] }
 0x599   : > { %2438 = vmatprep.mubr.f32.mxu0 %v2293_v8 }
 0x59a   : > { %2439 = vmatmul.mubr.f32.gmra.mrb[118].mxu0 %v2291_v37 }
 0x59b   : > { %5608 = vmatpush3.bf16.msra.mxu0 %v9156_v55  ;;  %v2297_v17 = vpop.f32.mrb[92].mxu0  ;;  %v9162_v55 = vld [vmem:[#allocation78_spill] sm:$0xff] }
 0x59c   : > { %v2299_v12 = vpop.f32.mrb[93].mxu0  ;;  %5610 = vmatprep.subr.bf16.mxu0 %v9157_v61  ;;  %v9163_v61 = vld [vmem:[#allocation79_spill] sm:$0xff] }
 0x59d   : > { %2444 = vmatprep.mubr.f32.mxu0 %v2299_v12 }
 0x59e   : > { %2445 = vmatmul.mubr.f32.gmra.mrb[120].mxu0 %v2297_v17 }
 0x59f   : > { %5612 = vmatpush3.bf16.msra.mxu0 %v9158_v15  ;;  %v2303_v5 = vpop.f32.mrb[94].mxu0  ;;  %v9164_v15 = vld [vmem:[#allocation80_spill] sm:$0xff] }
 0x5a0   : > { %v2305_v59 = vpop.f32.mrb[95].mxu0  ;;  %5614 = vmatprep.subr.bf16.mxu0 %v9159_v53  ;;  %v9165_v53 = vld [vmem:[#allocation50_spill] sm:$0xff] }
 0x5a1   : > { %2450 = vmatprep.mubr.f32.mxu0 %v2305_v59 }
 0x5a2   : > { %2451 = vmatmul.mubr.f32.gmra.mrb[122].mxu0 %v2303_v5 }
 0x5a3   : > { %5616 = vmatpush3.bf16.msra.mxu0 %v9160_v4  ;;  %v2309_v8 = vpop.f32.mrb[96].mxu0  ;;  %v9166_v4 = vld [vmem:[#allocation51_spill] sm:$0xff] }
 0x5a4   : > { %v2311_v37 = vpop.f32.mrb[97].mxu0  ;;  %5618 = vmatprep.subr.bf16.mxu0 %v9161_v43  ;;  %v9167_v43 = vld [vmem:[#allocation52_spill] sm:$0xff] }
 0x5a5   : > { %2456 = vmatprep.mubr.f32.mxu0 %v2311_v37 }
 0x5a6   : > { %2457 = vmatmul.mubr.f32.gmra.mrb[124].mxu0 %v2309_v8 }
 0x5a7   : > { %5620 = vmatpush3.bf16.msra.mxu0 %v9162_v55  ;;  %v2315_v12 = vpop.f32.mrb[98].mxu0  ;;  %v9168_v55 = vld [vmem:[#allocation53_spill] sm:$0xff] }
 0x5a8   : > { %v2317_v17 = vpop.f32.mrb[99].mxu0  ;;  %5622 = vmatprep.subr.bf16.mxu0 %v9163_v61  ;;  %v9169_v61 = vld [vmem:[#allocation54_spill] sm:$0xff] }
 0x5a9   : > { %2462 = vmatprep.mubr.f32.mxu0 %v2317_v17 }
 0x5aa   : > { %2463 = vmatmul.mubr.f32.gmra.mrb[126].mxu0 %v2315_v12 }
 0x5ab   : > { %5624 = vmatpush3.bf16.msra.mxu0 %v9164_v15  ;;  %v2321_v59 = vpop.f32.mrb[100].mxu0  ;;  %v9170_v15 = vld [vmem:[#allocation55_spill] sm:$0xff] }
 0x5ac   : > { %v2323_v5 = vpop.f32.mrb[101].mxu0  ;;  %5626 = vmatprep.subr.bf16.mxu0 %v9165_v53 }
 0x5ad   : > { %2533 = vmatprep.mubr.f32.mxu0 %v2323_v5 }
 0x5ae   : > { %2534 = vmatmul.mubr.f32.vlgmr.msra.gmra.mrb[128].mxu0 %v2321_v59 }
 0x5af   : > { %5628 = vmatpush3.bf16.msra.mxu0 %v9166_v4  ;;  %v2327_v37 = vpop.f32.mrb[102].mxu0 }
 0x5b0   : > { %v2329_v8 = vpop.f32.mrb[103].mxu0  ;;  %5630 = vmatprep.subr.bf16.mxu0 %v9167_v43 }
 0x5b1   : > { %2538 = vmatprep.mubr.f32.mxu0 %v2329_v8 }
 0x5b2   : > { %2539 = vmatmul.mubr.f32.gmra.mrb[130].mxu0 %v2327_v37  ;;  %v9173_v37 = vld [vmem:[#allocation58_spill] sm:$0xff] }
 0x5b3   : > { %5632 = vmatpush3.bf16.msra.mxu0 %v9168_v55  ;;  %v2333_v17 = vpop.f32.mrb[104].mxu0 }
 0x5b4   : > { %v2335_v12 = vpop.f32.mrb[105].mxu0  ;;  %5634 = vmatprep.subr.bf16.mxu0 %v9169_v61 }
 0x5b5   : > { %2543 = vmatprep.mubr.f32.mxu0 %v2335_v12  ;;  %v9175_v12 = vld [vmem:[#allocation60_spill] sm:$0xff] }
 0x5b6   : > { %2544 = vmatmul.mubr.f32.gmra.mrb[132].mxu0 %v2333_v17 }
 0x5b7   : > { %5636 = vmatpush3.bf16.msra.mxu0 %v9170_v15  ;;  %v2339_v5 = vpop.f32.mrb[106].mxu0 }
 0x5b8   : > { %v2341_v59 = vpop.f32.mrb[107].mxu0  ;;  %5638 = vmatprep.subr.bf16.mxu0 %v9171_v16 }
 0x5b9   : > { %2548 = vmatprep.mubr.f32.mxu0 %v2341_v59  ;;  %v9180_v59 = vld [vmem:[#allocation65_spill] sm:$0xff] }
 0x5ba   : > { %2549 = vmatmul.mubr.f32.gmra.mrb[134].mxu0 %v2339_v5  ;;  %v9179_v5 = vld [vmem:[#allocation64_spill] sm:$0xff] }
 0x5bb   : > { %5640 = vmatpush3.bf16.msra.mxu0 %v9172_v52  ;;  %v2345_v8 = vpop.f32.mrb[108].mxu0 }
 0x5bc   : > { %5642 = vmatprep.subr.bf16.mxu0 %v9173_v37  ;;  %v2347_v58 = vpop.f32.mrb[109].mxu0 }
 0x5bd   : > { %2618 = vmatprep.mubr.f32.mxu0 %v2347_v58 }
 0x5bf   : > { %5644 = vmatpush3.bf16.msra.mxu0 %v9174_v46  ;;  %v2351_v23 = vpop.f32.mrb[110].mxu0 }
 0x5c0   : > { %5646 = vmatprep.subr.bf16.mxu0 %v9175_v12  ;;  %v2353_v17 = vpop.f32.mrb[111].mxu0 }
 0x5c3   : > { %5648 = vmatpush3.bf16.msra.mxu0 %v9176_v25 }
 0x5c4   : > { %5650 = vmatprep.subr.bf16.mxu0 %v9177_v24 }
 0x5c7   : > { %5652 = vmatpush3.bf16.msra.mxu0 %v9178_v22 }
 0x5c8   : > { %5654 = vmatprep.subr.bf16.mxu0 %v9179_v5 }
 0x5cb   : > { %5656 = vmatpush3.bf16.msra.mxu0 %v9180_v59 }
 0x5ce   : > { %2619 = vmatmul.mubr.f32.vlgmr.msra.gmra.mrb[136].mxu0 %v2345_v8 }
 0x5cf   : > { %2623 = vmatprep.mubr.f32.mxu0 %v2353_v17  ;;  %v6274_v17 = vld [vmem:[#allocation9 + $0x18] sm:$0xff] }
 0x5d2   : > { %2624 = vmatmul.mubr.f32.gmra.mrb[138].mxu0 %v2351_v23 }
 0x5d3   : > { %5149 = vmatprep.mubr.msk.f32.mxu0 %vm1495_vm1, %v7579_v32 }
 0x661   : > { %v2422_v58 = vpop.f32.mrb[112].mxu0 }
 0x662   : > { %v2661_v1 = vsub.f32 0.0, %v2422_v58  ;;  %v2424_v41 = vpop.f32.mrb[113].mxu0  ;;  %v2629_v57 = vsub.f32 %v2422_v58, %v6271_v11 }
 0x663   : > { %v2662_v14 = vsub.f32 0.0, %v2424_v41  ;;  %v2630_v8 = vsub.f32 %v2424_v41, %v6272_v0 }
 0x664   : > { %v2677_v31 = vsub.f32 %v2661_v1, %v6271_v11  ;;  %v2645_v18 = vmax.f32 %v2629_v57, 0.0  ;;  %v6277_v57 = vld [vmem:[#allocation9 + $0x30] sm:$0xff] }
 0x665   : > { %v2678_v63 = vsub.f32 %v2662_v14, %v6272_v0  ;;  %v2428_v21 = vpop.f32.mrb[114].mxu0  ;;  %v2646_v3 = vmax.f32 %v2630_v8, 0.0  ;;  %v6275_v0 = vld [vmem:[#allocation9 + $0x20] sm:$0xff]  ;;  %v6278_v8 = vld [vmem:[#allocation9 + $0x38] sm:$0xff] }
 0x666   : > { %v2631_v50 = vsub.f32 %v2428_v21, %v6273_v51  ;;  %v2663_v42 = vsub.f32 0.0, %v2428_v21  ;;  %v2430_v39 = vpop.f32.mrb[115].mxu0  ;;  %v2693_v33 = vmax.f32 %v2677_v31, 0.0  ;;  %v6276_v31 = vld [vmem:[#allocation9 + $0x28] sm:$0xff] }
 0x667   : > { %v2632_v23 = vsub.f32 %v2430_v39, %v6274_v17  ;;  %v2664_v35 = vsub.f32 0.0, %v2430_v39  ;;  %v2694_v28 = vmax.f32 %v2678_v63, 0.0 }
 0x668   : > { %v2679_v32 = vsub.f32 %v2663_v42, %v6273_v51  ;;  %v2647_v10 = vmax.f32 %v2631_v50, 0.0  ;;  %v2709_v21 = vsub.f32 %v2645_v18, %v2693_v33 }
 0x669   : > { %v2680_v27 = vsub.f32 %v2664_v35, %v6274_v17  ;;  %v2434_v19 = vpop.f32.mrb[116].mxu0  ;;  %v2648_v11 = vmax.f32 %v2632_v23, 0.0  ;;  %v2710_v60 = vsub.f32 %v2646_v3, %v2694_v28 }
 0x66a   : > { %v2695_v1 = vmax.f32 %v2679_v32, 0.0  ;;  %v2665_v9 = vsub.f32 0.0, %v2434_v19  ;;  %v2436_v14 = vpop.f32.mrb[117].mxu0  ;;  %v2633_v63 = vsub.f32 %v2434_v19, %v6275_v0 }
 0x66b   : > { %v2696_v58 = vmax.f32 %v2680_v27, 0.0  ;;  %v2666_v2 = vsub.f32 0.0, %v2436_v14  ;;  %v2634_v56 = vsub.f32 %v2436_v14, %v6276_v31 }
 0x66c   : > { %v2711_v62 = vsub.f32 %v2647_v10, %v2695_v1  ;;  %v2681_v41 = vsub.f32 %v2665_v9, %v6275_v0  ;;  %v2649_v28 = vmax.f32 %v2633_v63, 0.0 }
 0x66d   : > { %v2712_v39 = vsub.f32 %v2648_v11, %v2696_v58  ;;  %v2682_v42 = vsub.f32 %v2666_v2, %v6276_v31  ;;  %v2440_v51 = vpop.f32.mrb[118].mxu0  ;;  %v2650_v11 = vmax.f32 %v2634_v56, 0.0  ;;  %v6282_v56 = vld [vmem:[#allocation9 + $0x58] sm:$0xff] }
 0x66e   : > { %v5659_v35 = vpack.c.bf16 %v2711_v62, %v2709_v21  ;;  %v2635_v50 = vsub.f32 %v2440_v51, %v6277_v57  ;;  %v2667_v32 = vsub.f32 0.0, %v2440_v51  ;;  %v2442_v17 = vpop.f32.mrb[119].mxu0  ;;  %v2697_v18 = vmax.f32 %v2681_v41, 0.0  ;;  %v6279_v51 = vld [vmem:[#allocation9 + $0x40] sm:$0xff] }
 0x66f   : > { %v2636_v23 = vsub.f32 %v2442_v17, %v6278_v8  ;;  %v2668_v27 = vsub.f32 0.0, %v2442_v17  ;;  %v5657_v54 = vpack.c.bf16 %v2712_v39, %v2710_v60  ;;  %v2698_v33 = vmax.f32 %v2682_v42, 0.0  ;;  %v6280_v42 = vld [vmem:[#allocation9 + $0x48] sm:$0xff] }
 0x670   : > { %v2683_v10 = vsub.f32 %v2667_v32, %v6277_v57  ;;  %v2651_v2 = vmax.f32 %v2635_v50, 0.0  ;;  %v2713_v0 = vsub.f32 %v2649_v28, %v2697_v18  ;;  %v6281_v50 = vld [vmem:[#allocation9 + $0x50] sm:$0xff] }
 0x671   : > { %v2684_v9 = vsub.f32 %v2668_v27, %v6278_v8  ;;  %v2446_v3 = vpop.f32.mrb[120].mxu0  ;;  %5658 = vmatprep.subr.bf16.mxu1 %v5657_v54  ;;  %v2652_v58 = vmax.f32 %v2636_v23, 0.0  ;;  %v2714_v41 = vsub.f32 %v2650_v11, %v2698_v33 }
 0x672   : > { %v2699_v1 = vmax.f32 %v2683_v10, 0.0  ;;  %v2669_v62 = vsub.f32 0.0, %v2446_v3  ;;  %v2448_v19 = vpop.f32.mrb[121].mxu0  ;;  %5660 = vmatpush1.bf16.msra.mxu1 %v5659_v35  ;;  %v2637_v63 = vsub.f32 %v2446_v3, %v6279_v51 }
 0x673   : > { %v2700_v21 = vmax.f32 %v2684_v9, 0.0  ;;  %v2670_v14 = vsub.f32 0.0, %v2448_v19  ;;  %v2638_v35 = vsub.f32 %v2448_v19, %v6280_v42 }
 0x674   : > { %v2715_v31 = vsub.f32 %v2651_v2, %v2699_v1  ;;  %v2685_v60 = vsub.f32 %v2669_v62, %v6279_v51  ;;  %v2653_v62 = vmax.f32 %v2637_v63, 0.0 }
 0x675   : > { %v2716_v39 = vsub.f32 %v2652_v58, %v2700_v21  ;;  %v2686_v57 = vsub.f32 %v2670_v14, %v6280_v42  ;;  %v2452_v32 = vpop.f32.mrb[122].mxu0  ;;  %v2654_v14 = vmax.f32 %v2638_v35, 0.0  ;;  %v6286_v35 = vld [vmem:[#allocation9 + $0x78] sm:$0xff] }
 0x676   : > { %v5663_v54 = vpack.c.bf16 %v2715_v31, %v2713_v0  ;;  %v2639_v17 = vsub.f32 %v2452_v32, %v6281_v50  ;;  %v2671_v8 = vsub.f32 0.0, %v2452_v32  ;;  %v2454_v27 = vpop.f32.mrb[123].mxu0  ;;  %v2701_v18 = vmax.f32 %v2685_v60, 0.0  ;;  %v6283_v32 = vld [vmem:[#allocation9 + $0x60] sm:$0xff] }
 0x677   : > { %v2640_v23 = vsub.f32 %v2454_v27, %v6282_v56  ;;  %v2672_v10 = vsub.f32 0.0, %v2454_v27  ;;  %v5661_v9 = vpack.c.bf16 %v2716_v39, %v2714_v41  ;;  %v2702_v2 = vmax.f32 %v2686_v57, 0.0  ;;  %v6284_v57 = vld [vmem:[#allocation9 + $0x68] sm:$0xff] }
 0x678   : > { %v2687_v28 = vsub.f32 %v2671_v8, %v6281_v50  ;;  %v2655_v11 = vmax.f32 %v2639_v17, 0.0  ;;  %v2717_v51 = vsub.f32 %v2653_v62, %v2701_v18  ;;  %v6285_v17 = vld [vmem:[#allocation9 + $0x70] sm:$0xff] }
 0x679   : > { %v2688_v1 = vsub.f32 %v2672_v10, %v6282_v56  ;;  %v2458_v33 = vpop.f32.mrb[124].mxu0  ;;  %5662 = vmatprep.subr.bf16.mxu1 %v5661_v9  ;;  %v2656_v0 = vmax.f32 %v2640_v23, 0.0  ;;  %v2718_v60 = vsub.f32 %v2654_v14, %v2702_v2 }
 0x67a   : > { %v2703_v58 = vmax.f32 %v2687_v28, 0.0  ;;  %v2673_v21 = vsub.f32 0.0, %v2458_v33  ;;  %v2460_v3 = vpop.f32.mrb[125].mxu0  ;;  %5664 = vmatpush1.bf16.msra.mxu1 %v5663_v54  ;;  %v2641_v63 = vsub.f32 %v2458_v33, %v6283_v32 }
 0x67b   : > { %v2704_v31 = vmax.f32 %v2688_v1, 0.0  ;;  %v2674_v19 = vsub.f32 0.0, %v2460_v3  ;;  %v2642_v54 = vsub.f32 %v2460_v3, %v6284_v57 }
 0x67c   : > { %v2719_v42 = vsub.f32 %v2655_v11, %v2703_v58  ;;  %v2689_v41 = vsub.f32 %v2673_v21, %v6283_v32  ;;  %v2657_v21 = vmax.f32 %v2641_v63, 0.0 }
 0x67d   : > { %v2720_v39 = vsub.f32 %v2656_v0, %v2704_v31  ;;  %v2690_v50 = vsub.f32 %v2674_v19, %v6284_v57  ;;  %v2464_v8 = vpop.f32.mrb[126].mxu0  ;;  %v2658_v31 = vmax.f32 %v2642_v54, 0.0 }
 0x67e   : > { %v5667_v27 = vpack.c.bf16 %v2719_v42, %v2717_v51  ;;  %v2643_v56 = vsub.f32 %v2464_v8, %v6285_v17  ;;  %v2675_v10 = vsub.f32 0.0, %v2464_v8  ;;  %v2466_v9 = vpop.f32.mrb[127].mxu0  ;;  %v2705_v18 = vmax.f32 %v2689_v41, 0.0  ;;  %v6287_v41 = vld [vmem:[%s8711_s7] sm:$0xff] }
 0x67f   : > { %v2644_v23 = vsub.f32 %v2466_v9, %v6286_v35  ;;  %v2676_v28 = vsub.f32 0.0, %v2466_v9  ;;  %v5665_v1 = vpack.c.bf16 %v2720_v39, %v2718_v60  ;;  %v2706_v11 = vmax.f32 %v2690_v50, 0.0 }
 0x680   : > { %v2691_v62 = vsub.f32 %v2675_v10, %v6285_v17  ;;  %v2659_v14 = vmax.f32 %v2643_v56, 0.0  ;;  %v2721_v3 = vsub.f32 %v2657_v21, %v2705_v18 }
 0x681   : > { %v2692_v58 = vsub.f32 %v2676_v28, %v6286_v35  ;;  %5666 = vmatprep.subr.bf16.mxu1 %v5665_v1  ;;  %v4929_v2 = vpop.f32.mrb[128].mxu0  ;;  %v2660_v19 = vmax.f32 %v2644_v23, 0.0  ;;  %v2722_v57 = vsub.f32 %v2658_v31, %v2706_v11  ;;  %v6288_v35 = vld [vmem:[%s8711_s7 + $0x8] sm:$0xff] }
 0x682   : > { %v2707_v0 = vmax.f32 %v2691_v62, 0.0  ;;  %5668 = vmatpush1.bf16.msra.mxu1 %v5667_v27  ;;  %v4930_v33 = vpop.f32.mrb[129].mxu0 }
 0x683   : > { %v2708_v51 = vmax.f32 %v2692_v58, 0.0  ;;  %v4931_v42 = vadd.f32 %v4930_v33, %v4929_v2  ;;  %v9181_v2 = vld [vmem:[#allocation81_spill] sm:$0xff] }
 0x684   : > { %v2723_v32 = vsub.f32 %v2659_v14, %v2707_v0  ;;  %v6289_v0 = vld [vmem:[%s8711_s7 + $0x10] sm:$0xff] }
 0x685   : > { %v2724_v8 = vsub.f32 %v2660_v19, %v2708_v51  ;;  %v2838_v60 = vsub.f32 %v4931_v42, %v6287_v41  ;;  %v2846_v39 = vsub.f32 0.0, %v4931_v42  ;;  %v4932_v50 = vpop.f32.mrb[130].mxu0  ;;  %v9182_v42 = vld [vmem:[#allocation82_spill] sm:$0xff] }
 0x686   : > { %v5671_v63 = vpack.c.bf16 %v2723_v32, %v2721_v3  ;;  %v4933_v17 = vpop.f32.mrb[131].mxu0 }
 0x687   : > { %v2850_v56 = vsub.f32 %v2846_v39, %v6287_v41  ;;  %v5669_v27 = vpack.c.bf16 %v2724_v8, %v2722_v57  ;;  %v4934_v10 = vadd.f32 %v4933_v17, %v4932_v50  ;;  %v2842_v9 = vmax.f32 %v2838_v60, 0.0  ;;  %v9183_v8 = vld [vmem:[#allocation83_spill] sm:$0xff] }
 0x688   : > { %v6290_v39 = vld [vmem:[%s8711_s7 + $0x18] sm:$0xff] }
 0x689   : > { %v2854_v54 = vmax.f32 %v2850_v56, 0.0  ;;  %5670 = vmatprep.subr.bf16.mxu1 %v5669_v27  ;;  %v2839_v23 = vsub.f32 %v4934_v10, %v6288_v35  ;;  %v2847_v28 = vsub.f32 0.0, %v4934_v10  ;;  %v4935_v1 = vpop.f32.mrb[132].mxu0  ;;  %v9184_v56 = vld [vmem:[#allocation84_spill] sm:$0xff] }
 0x68a   : > { %5672 = vmatpush1.bf16.msra.mxu1 %v5671_v63  ;;  %v4936_v18 = vpop.f32.mrb[133].mxu0 }
 0x68b   : > { %v2843_v62 = vmax.f32 %v2839_v23, 0.0  ;;  %v2851_v11 = vsub.f32 %v2847_v28, %v6288_v35  ;;  %v4937_v58 = vadd.f32 %v4936_v18, %v4935_v1  ;;  %5686 = vmatprep.subr.bf16.mxu1 %v9181_v2  ;;  %v2858_v21 = vsub.f32 %v2842_v9, %v2854_v54  ;;  %v9185_v9 = vld [vmem:[#allocation85_spill] sm:$0xff]  ;;  %v9186_v23 = vld [vmem:[#allocation86_spill] sm:$0xff]  ;;  %v9187_v1 = vld [vmem:[#allocation87_spill] sm:$0xff] }
 0x68d   : > { %v2855_v14 = vmax.f32 %v2851_v11, 0.0  ;;  %v2840_v33 = vsub.f32 %v4937_v58, %v6289_v0  ;;  %v2848_v31 = vsub.f32 0.0, %v4937_v58  ;;  %v4938_v19 = vpop.f32.mrb[134].mxu0  ;;  %4722 = vmatmul.mubr.msk.f32.vlgmr.msra.gmra.mrb[20].mxu1 %vm561_vm0, %v7657_v45  ;;  %v9189_v11 = vld [vmem:[#allocation89_spill] sm:$0xff]  ;;  %v9190_v58 = vld [vmem:[#allocation90_spill] sm:$0xff] }
 0x68e   : > { %v4939_v51 = vpop.f32.mrb[135].mxu0  ;;  %2795 = vmatprep.mubr.f32.mxu1 %v9065_v34  ;;  %5688 = vmatpush1.bf16.msra.mxu1 %v9182_v42 }
 0x68f   : > { %v2859_v3 = vsub.f32 %v2843_v62, %v2855_v14  ;;  %v2852_v32 = vsub.f32 %v2848_v31, %v6289_v0  ;;  %v4940_v57 = vadd.f32 %v4939_v51, %v4938_v19  ;;  %5690 = vmatprep.subr.bf16.mxu1 %v9183_v8  ;;  %v2844_v41 = vmax.f32 %v2840_v33, 0.0  ;;  %v9188_v62 = vld [vmem:[#allocation88_spill] sm:$0xff]  ;;  %v9193_v19 = vld [vmem:[#allocation93_spill] sm:$0xff]  ;;  %v6291_v51 = vld [vmem:[#allocation10] sm:$0xff] }
 0x690   : > { %v9192_v33 = vld [vmem:[#allocation92_spill] sm:$0xff] }
 0x691   : > { %v2856_v60 = vmax.f32 %v2852_v32, 0.0  ;;  %v2841_v50 = vsub.f32 %v4940_v57, %v6290_v39  ;;  %v2849_v63 = vsub.f32 0.0, %v4940_v57  ;;  %4723 = vmatmul.mubr.msk.f32.gmra.mrb[22].mxu1 %vm561_vm0, %v7691_v26  ;;  %v5673_v17 = vpack.c.bf16 %v2859_v3, %v2858_v21  ;;  %v9191_v21 = vld [vmem:[#allocation91_spill] sm:$0xff] }
 0x692   : > { %2801 = vmatprep.mubr.f32.mxu1 %v9065_v34  ;;  %5692 = vmatpush1.bf16.msra.mxu1 %v9184_v56 }
 0x693   : > { %v2845_v27 = vmax.f32 %v2841_v50, 0.0  ;;  %v2853_v10 = vsub.f32 %v2849_v63, %v6290_v39  ;;  %5674 = vmatprep.subr.bf16.mxu0 %v5673_v17  ;;  %5694 = vmatprep.subr.bf16.mxu1 %v9185_v9  ;;  %v2860_v54 = vsub.f32 %v2844_v41, %v2856_v60  ;;  %v9194_v60 = vld [vmem:[#allocation94_spill] sm:$0xff]  ;;  %v9195_v63 = vld [vmem:[#allocation95_spill] sm:$0xff] }
 0x694   : > { %5676 = vmatpush3.bf16.msra.mxu0 %v5673_v17  ;;  %v9196_v17 = vld [vmem:[#allocation114_spill] sm:$0xff] }
 0x695   : > { %v2857_v35 = vmax.f32 %v2853_v10, 0.0  ;;  %4724 = vmatmul.mubr.msk.f32.gmra.mrb[24].mxu1 %vm561_vm0, %v7705_v20 }
 0x696   : > { %2807 = vmatprep.mubr.f32.mxu1 %v9065_v34  ;;  %5696 = vmatpush1.bf16.msra.mxu1 %v9186_v23 }
 0x697   : > { %v2861_v28 = vsub.f32 %v2845_v27, %v2857_v35  ;;  %5698 = vmatprep.subr.bf16.mxu1 %v9187_v1  ;;  %v9251_v1 = vld [vmem:[#allocation152_spill] sm:$0xff] }
 0x699   : > { %4725 = vmatmul.mubr.msk.f32.gmra.mrb[26].mxu1 %vm561_vm0, %v7716_v29  ;;  %v5677_v18 = vpack.c.bf16 %v2861_v28, %v2860_v54  ;;  %v6292_v54 = vld [vmem:[#allocation10 + $0x8] sm:$0xff] }
 0x69a   : > { %2813 = vmatprep.mubr.f32.mxu1 %v9065_v34  ;;  %5700 = vmatpush1.bf16.msra.mxu1 %v9188_v62  ;;  %v9245_v62 = vld [vmem:[#allocation146_spill] sm:$0xff] }
 0x69b   : > { %5678 = vmatprep.subr.bf16.mxu0 %v5677_v18  ;;  %5702 = vmatprep.subr.bf16.mxu1 %v9189_v11  ;;  %v9241_v11 = vld [vmem:[#allocation142_spill] sm:$0xff] }
 0x69c   : > { %5680 = vmatpush3.bf16.msra.mxu0 %v5677_v18  ;;  %v9197_v18 = vld [vmem:[#allocation118_spill] sm:$0xff] }
 0x69d   : > { %4726 = vmatmul.mubr.msk.f32.gmra.mrb[28].mxu1 %vm561_vm0, %v7726_v36 }
 0x69e   : > { %2819 = vmatprep.mubr.f32.mxu1 %v9065_v34  ;;  %5704 = vmatpush1.bf16.msra.mxu1 %v9190_v58 }
 0x69f   : > { %5150 = vmatmul.mubr.msk.f32.vlgmr.msra.gmra.mrb[140].mxu0 %vm1495_vm1, %v7613_v7  ;;  %5706 = vmatprep.subr.bf16.mxu1 %v9191_v21 }
 0x6a0   : > { %5152 = vmatprep.mubr.msk.f32.mxu0 %vm1495_vm1, %v7637_v30 }
 0x6a1   : > { %4727 = vmatmul.mubr.msk.f32.gmra.mrb[30].mxu1 %vm561_vm0, %v7736_v13  ;;  %v4973_v14 = vpop.f32.mrb[136].mxu0 }
 0x6a2   : > { %v4974_v0 = vpop.f32.mrb[137].mxu0  ;;  %2825 = vmatprep.mubr.f32.mxu1 %v9065_v34  ;;  %5708 = vmatpush1.bf16.msra.mxu1 %v9192_v33  ;;  %v9228_v33 = vld [vmem:[#allocation129_spill] sm:$0xff] }
 0x6a3   : > { %v4975_v31 = vadd.f32 %v4974_v0, %v4973_v14  ;;  %5153 = vmatmul.mubr.msk.f32.gmra.mrb[142].mxu0 %vm1495_vm1, %v7664_v44  ;;  %5710 = vmatprep.subr.bf16.mxu1 %v9193_v19  ;;  %v9198_v14 = vld [vmem:[#allocation96_spill] sm:$0xff]  ;;  %v9204_v19 = vld [vmem:[#allocation101_spill] sm:$0xff] }
 0x6a4   : > { %5155 = vmatprep.mubr.msk.f32.mxu0 %vm1495_vm1, %v7696_v6 }
 0x6a5   : > { %v2967_v3 = vsub.f32 %v4975_v31, %v6291_v51  ;;  %v2971_v32 = vsub.f32 0.0, %v4975_v31  ;;  %v4976_v57 = vpop.f32.mrb[138].mxu0  ;;  %4728 = vmatmul.mubr.msk.f32.gmra.mrb[32].mxu1 %vm561_vm0, %v7743_v38 }
 0x6a6   : > { %v4977_v41 = vpop.f32.mrb[139].mxu0  ;;  %2831 = vmatprep.mubr.f32.mxu1 %v9065_v34  ;;  %5712 = vmatpush1.bf16.msra.mxu1 %v9194_v60 }
 0x6a7   : > { %v2973_v39 = vsub.f32 %v2971_v32, %v6291_v51  ;;  %v4978_v50 = vadd.f32 %v4977_v41, %v4976_v57  ;;  %5156 = vmatmul.mubr.msk.f32.gmra.mrb[144].mxu0 %vm1495_vm1, %v7711_v48  ;;  %5714 = vmatprep.subr.bf16.mxu1 %v9195_v63  ;;  %v2969_v27 = vmax.f32 %v2967_v3, 0.0  ;;  %v9199_v51 = vld [vmem:[#allocation115_spill] sm:$0xff]  ;;  %v9200_v32 = vld [vmem:[#allocation97_spill] sm:$0xff]  ;;  %v9201_v57 = vld [vmem:[#allocation116_spill] sm:$0xff] }
 0x6a8   : > { %5158 = vmatprep.mubr.msk.f32.mxu0 %vm1495_vm1, %v9196_v17  ;;  %v9203_v63 = vld [vmem:[#allocation99_spill] sm:$0xff] }
 0x6a9   : > { %v2975_v10 = vmax.f32 %v2973_v39, 0.0  ;;  %v2968_v35 = vsub.f32 %v4978_v50, %v6292_v54  ;;  %v2972_v28 = vsub.f32 0.0, %v4978_v50  ;;  %4729 = vmatmul.mubr.msk.f32.gmra.mrb[34].mxu1 %vm561_vm0, %v9197_v18  ;;  %v9202_v39 = vld [vmem:[#allocation98_spill] sm:$0xff] }
 0x6aa   : > { %5716 = vmatpush1.bf16.msra.mxu1 %v9198_v14 }
 0x6ab   : > { %v2970_v0 = vmax.f32 %v2968_v35, 0.0  ;;  %v2974_v31 = vsub.f32 %v2972_v28, %v6292_v54  ;;  %5159 = vmatmul.mubr.msk.f32.gmra.mrb[146].mxu0 %vm1495_vm1, %v9199_v51  ;;  %5718 = vmatprep.subr.bf16.mxu1 %v9200_v32  ;;  %v2977_v3 = vsub.f32 %v2969_v27, %v2975_v10  ;;  %v9205_v54 = vld [vmem:[#allocation102_spill] sm:$0xff]  ;;  %v9206_v35 = vld [vmem:[#allocation103_spill] sm:$0xff]  ;;  %v9207_v28 = vld [vmem:[#allocation117_spill] sm:$0xff] }
 0x6ac   : > { %5165 = vmatprep.mubr.msk.f32.mxu0 %vm1671_vm2, %v9201_v57  ;;  %v9208_v32 = vld [vmem:[#allocation104_spill] sm:$0xff]  ;;  %v9209_v27 = vld [vmem:[#allocation119_spill] sm:$0xff]  ;;  %v9210_v10 = vld [vmem:[#allocation105_spill] sm:$0xff] }
 0x6ad   : > { %v2976_v41 = vmax.f32 %v2974_v31, 0.0  ;;  %v9212_v31 = vld [vmem:[#allocation106_spill] sm:$0xff]  ;;  %v9255_v57 = vld [vmem:[#allocation156_spill] sm:$0xff] }
 0x6ae   : > { %5720 = vmatpush1.bf16.msra.mxu1 %v9202_v39 }
 0x6af   : > { %v2978_v50 = vsub.f32 %v2970_v0, %v2976_v41  ;;  %5722 = vmatprep.subr.bf16.mxu1 %v9203_v63  ;;  %v9211_v0 = vld [vmem:[#allocation120_spill] sm:$0xff]  ;;  %v9215_v41 = vld [vmem:[#allocation122_spill] sm:$0xff]  ;;  %v9224_v63 = vld [vmem:[#allocation125_spill] sm:$0xff] }
 0x6b1   : > { %v5681_v60 = vpack.c.bf16 %v2978_v50, %v2977_v3  ;;  %v9213_v3 = vld [vmem:[#allocation121_spill] sm:$0xff]  ;;  %v9216_v50 = vld [vmem:[#allocation108_spill] sm:$0xff] }
 0x6b2   : > { %5724 = vmatpush1.bf16.msra.mxu1 %v9204_v19  ;;  %v9223_v19 = vld [vmem:[#allocation113_spill] sm:$0xff] }
 0x6b3   : > { %5682 = vmatprep.subr.bf16.mxu0 %v5681_v60  ;;  %5726 = vmatprep.subr.bf16.mxu1 %v9205_v54  ;;  %v9220_v54 = vld [vmem:[#allocation110_spill] sm:$0xff] }
 0x6b4   : > { %5684 = vmatpush3.bf16.msra.mxu0 %v5681_v60  ;;  %v9214_v60 = vld [vmem:[#allocation107_spill] sm:$0xff] }
 0x6b6   : > { %5728 = vmatpush1.bf16.msra.mxu1 %v9206_v35  ;;  %v9218_v35 = vld [vmem:[#allocation109_spill] sm:$0xff] }
 0x6b7   : > { %5166 = vmatmul.mubr.msk.f32.vlgmr.msra.gmra.mrb[148].mxu0 %vm1671_vm2, %v9207_v28  ;;  %5730 = vmatprep.subr.bf16.mxu1 %v9208_v32  ;;  %v9217_v32 = vld [vmem:[#allocation123_spill] sm:$0xff] }
 0x6b8   : > { %5168 = vmatprep.mubr.msk.f32.mxu0 %vm1671_vm2, %v9209_v27 }
 0x6ba   : > { %5732 = vmatpush1.bf16.msra.mxu1 %v9210_v10  ;;  %v9219_v10 = vld [vmem:[#allocation124_spill] sm:$0xff] }
 0x6bb   : > { %5169 = vmatmul.mubr.msk.f32.gmra.mrb[150].mxu0 %vm1671_vm2, %v9211_v0  ;;  %5734 = vmatprep.subr.bf16.mxu1 %v9212_v31  ;;  %v9221_v31 = vld [vmem:[#allocation111_spill] sm:$0xff] }
 0x6bc   : > { %5171 = vmatprep.mubr.msk.f32.mxu0 %vm1671_vm2, %v9213_v3  ;;  %v9236_v3 = vld [vmem:[#allocation137_spill] sm:$0xff]  ;;  %v9238_v0 = vld [vmem:[#allocation139_spill] sm:$0xff] }
 0x6be   : > { %5736 = vmatpush1.bf16.msra.mxu1 %v9214_v60  ;;  %v9222_v60 = vld [vmem:[#allocation112_spill] sm:$0xff] }
 0x6bf   : > { %5172 = vmatmul.mubr.msk.f32.gmra.mrb[152].mxu0 %vm1671_vm2, %v9215_v41  ;;  %5738 = vmatprep.subr.bf16.mxu1 %v9216_v50 }
 0x6c0   : > { %5174 = vmatprep.mubr.msk.f32.mxu0 %vm1671_vm2, %v9217_v32  ;;  %v9226_v32 = vld [vmem:[#allocation127_spill] sm:$0xff] }
 0x6c2   : > { %5740 = vmatpush1.bf16.msra.mxu1 %v9218_v35  ;;  %v9225_v35 = vld [vmem:[#allocation126_spill] sm:$0xff] }
 0x6c3   : > { %5175 = vmatmul.mubr.msk.f32.gmra.mrb[154].mxu0 %vm1671_vm2, %v9219_v10  ;;  %5742 = vmatprep.subr.bf16.mxu1 %v9220_v54  ;;  %v9227_v54 = vld [vmem:[#allocation128_spill] sm:$0xff] }
 0x6c4   : > { %3426 = vmatprep.mubr.f32.mxu0 %v9065_v34 }
 0x6c6   : > { %5744 = vmatpush1.bf16.msra.mxu1 %v9221_v31 }
 0x6c7   : > { %5746 = vmatprep.subr.bf16.mxu1 %v9222_v60 }
 0x6ca   : > { %5748 = vmatpush1.bf16.msra.mxu1 %v9223_v19  ;;  %v9230_v19 = vld [vmem:[#allocation131_spill] sm:$0xff] }
 0x6cb   : > { %5750 = vmatprep.subr.bf16.mxu1 %v9224_v63  ;;  %v9229_v63 = vld [vmem:[#allocation130_spill] sm:$0xff] }
 0x760   : > { %v2791_v50 = vpop.f32.mrb[20].mxu1 }
 0x761   : > { %v2793_v39 = vpop.f32.mrb[21].mxu1 }
 0x762   : > { %3148 = vmatprep.mubr.f32.mxu1 %v2793_v39 }
 0x763   : > { %3149 = vmatmul.mubr.f32.vlgmr.msra.gmra.mrb[36].mxu1 %v2791_v50 }
 0x764   : > { %5752 = vmatpush1.bf16.msra.mxu1 %v9225_v35  ;;  %v2797_v14 = vpop.f32.mrb[22].mxu1  ;;  %v9231_v35 = vld [vmem:[#allocation132_spill] sm:$0xff] }
 0x765   : > { %v2799_v10 = vpop.f32.mrb[23].mxu1  ;;  %5754 = vmatprep.subr.bf16.mxu1 %v9226_v32  ;;  %v9232_v32 = vld [vmem:[#allocation133_spill] sm:$0xff] }
 0x766   : > { %3154 = vmatprep.mubr.f32.mxu1 %v2799_v10 }
 0x767   : > { %3155 = vmatmul.mubr.f32.gmra.mrb[38].mxu1 %v2797_v14 }
 0x768   : > { %5756 = vmatpush1.bf16.msra.mxu1 %v9227_v54  ;;  %v2803_v31 = vpop.f32.mrb[24].mxu1 }
 0x769   : > { %v2805_v60 = vpop.f32.mrb[25].mxu1  ;;  %5758 = vmatprep.subr.bf16.mxu1 %v9228_v33  ;;  %v9234_v33 = vld [vmem:[#allocation135_spill] sm:$0xff] }
 0x76a   : > { %3160 = vmatprep.mubr.f32.mxu1 %v2805_v60  ;;  %v9233_v60 = vld [vmem:[#allocation134_spill] sm:$0xff] }
 0x76b   : > { %3161 = vmatmul.mubr.f32.gmra.mrb[40].mxu1 %v2803_v31 }
 0x76c   : > { %5760 = vmatpush1.bf16.msra.mxu1 %v9229_v63  ;;  %v2809_v39 = vpop.f32.mrb[26].mxu1 }
 0x76d   : > { %v2811_v50 = vpop.f32.mrb[27].mxu1  ;;  %5762 = vmatprep.subr.bf16.mxu1 %v9230_v19 }
 0x76e   : > { %3166 = vmatprep.mubr.f32.mxu1 %v2811_v50 }
 0x76f   : > { %3167 = vmatmul.mubr.f32.gmra.mrb[42].mxu1 %v2809_v39  ;;  %v9235_v39 = vld [vmem:[#allocation136_spill] sm:$0xff] }
 0x770   : > { %5764 = vmatpush1.bf16.msra.mxu1 %v9231_v35  ;;  %v2815_v10 = vpop.f32.mrb[28].mxu1 }
 0x771   : > { %v2817_v14 = vpop.f32.mrb[29].mxu1  ;;  %5766 = vmatprep.subr.bf16.mxu1 %v9232_v32 }
 0x772   : > { %v5151_v54 = vpop.f32.mrb[140].mxu0  ;;  %3172 = vmatprep.mubr.f32.mxu1 %v2817_v14 }
 0x773   : > { %v2928_v41 = vpop.f32.mrb[141].mxu0  ;;  %3173 = vmatmul.mubr.f32.gmra.mrb[44].mxu1 %v2815_v10  ;;  %v9237_v10 = vld [vmem:[#allocation138_spill] sm:$0xff] }
 0x774   : > { %5768 = vmatpush1.bf16.msra.mxu1 %v9233_v60  ;;  %v2821_v31 = vpop.f32.mrb[30].mxu1 }
 0x775   : > { %v2823_v63 = vpop.f32.mrb[31].mxu1  ;;  %5770 = vmatprep.subr.bf16.mxu1 %v9234_v33 }
 0x776   : > { %v5154_v21 = vpop.f32.mrb[142].mxu0  ;;  %3178 = vmatprep.mubr.f32.mxu1 %v2823_v63 }
 0x777   : > { %v2938_v50 = vpop.f32.mrb[143].mxu0  ;;  %3179 = vmatmul.mubr.f32.gmra.mrb[46].mxu1 %v2821_v31  ;;  %v9239_v31 = vld [vmem:[#allocation140_spill] sm:$0xff] }
 0x778   : > { %5772 = vmatpush1.bf16.msra.mxu1 %v9235_v39  ;;  %v2827_v35 = vpop.f32.mrb[32].mxu1  ;;  %v9240_v39 = vld [vmem:[#allocation141_spill] sm:$0xff] }
 0x779   : > { %v2829_v19 = vpop.f32.mrb[33].mxu1  ;;  %5774 = vmatprep.subr.bf16.mxu1 %v9236_v3  ;;  %v9242_v3 = vld [vmem:[#allocation143_spill] sm:$0xff] }
 0x77a   : > { %v5157_v32 = vpop.f32.mrb[144].mxu0  ;;  %3184 = vmatprep.mubr.f32.mxu1 %v2829_v19  ;;  %v9243_v19 = vld [vmem:[#allocation144_spill] sm:$0xff] }
 0x77b   : > { %v2948_v14 = vpop.f32.mrb[145].mxu0  ;;  %3185 = vmatmul.mubr.f32.gmra.mrb[48].mxu1 %v2827_v35  ;;  %v9244_v35 = vld [vmem:[#allocation145_spill] sm:$0xff] }
 0x77c   : > { %5776 = vmatpush1.bf16.msra.mxu1 %v9237_v10  ;;  %v2833_v60 = vpop.f32.mrb[34].mxu1 }
 0x77d   : > { %v2835_v58 = vpop.f32.mrb[35].mxu1  ;;  %5778 = vmatprep.subr.bf16.mxu1 %v9238_v0 }
 0x77e   : > { %v5160_v33 = vpop.f32.mrb[146].mxu0  ;;  %3190 = vmatprep.mubr.f32.mxu1 %v2835_v58  ;;  %v9246_v58 = vld [vmem:[#allocation147_spill] sm:$0xff] }
 0x77f   : > { %v2958_v63 = vpop.f32.mrb[147].mxu0  ;;  %3191 = vmatmul.mubr.f32.gmra.mrb[50].mxu1 %v2833_v60 }
 0x780   : > { %5780 = vmatpush1.bf16.msra.mxu1 %v9239_v31  ;;  %v9247_v31 = vld [vmem:[#allocation148_spill] sm:$0xff] }
 0x781   : > { %5782 = vmatprep.subr.bf16.mxu1 %v9240_v39  ;;  %v9248_v39 = vld [vmem:[#allocation149_spill] sm:$0xff] }
 0x784   : > { %5784 = vmatpush1.bf16.msra.mxu1 %v9241_v11 }
 0x785   : > { %5786 = vmatprep.subr.bf16.mxu1 %v9242_v3  ;;  %v9249_v3 = vld [vmem:[#allocation150_spill] sm:$0xff] }
 0x788   : > { %5788 = vmatpush1.bf16.msra.mxu1 %v9243_v19  ;;  %v9250_v19 = vld [vmem:[#allocation151_spill] sm:$0xff] }
 0x789   : > { %5790 = vmatprep.subr.bf16.mxu1 %v9244_v35 }
 0x78a   : > { %v5167_v10 = vpop.f32.mrb[148].mxu0 }
 0x78b   : > { %v3045_v27 = vpop.f32.mrb[149].mxu0 }
 0x78c   : > { %5792 = vmatpush1.bf16.msra.mxu1 %v9245_v62  ;;  %3261 = vmatprep.mubr.f32.mxu1 %v3045_v27  ;;  %v9252_v62 = vld [vmem:[#allocation153_spill] sm:$0xff]  ;;  %v9253_v27 = vld [vmem:[#allocation154_spill] sm:$0xff] }
 0x78d   : > { %5794 = vmatprep.subr.bf16.mxu1 %v9246_v58  ;;  %v9254_v58 = vld [vmem:[#allocation155_spill] sm:$0xff] }
 0x78e   : > { %v5170_v60 = vpop.f32.mrb[150].mxu0 }
 0x78f   : > { %v3055_v0 = vpop.f32.mrb[151].mxu0 }
 0x790   : > { %5796 = vmatpush1.bf16.msra.mxu1 %v9247_v31 }
 0x791   : > { %5798 = vmatprep.subr.bf16.mxu1 %v9248_v39 }
 0x792   : > { %v5173_v11 = vpop.f32.mrb[152].mxu0 }
 0x793   : > { %v3065_v28 = vpop.f32.mrb[153].mxu0 }
 0x794   : > { %5800 = vmatpush1.bf16.msra.mxu1 %v9249_v3 }
 0x795   : > { %5802 = vmatprep.subr.bf16.mxu1 %v9250_v19 }
 0x796   : > { %v5176_v35 = vpop.f32.mrb[154].mxu0 }
 0x797   : > { %v3075_v51 = vpop.f32.mrb[155].mxu0 }
 0x798   : > { %5804 = vmatpush1.bf16.msra.mxu1 %v9251_v1 }
 0x799   : > { %5806 = vmatprep.subr.bf16.mxu1 %v9252_v62 }
 0x79c   : > { %5808 = vmatpush1.bf16.msra.mxu1 %v9253_v27 }
 0x79d   : > { %5810 = vmatprep.subr.bf16.mxu1 %v9254_v58 }
 0x7a0   : > { %5812 = vmatpush1.bf16.msra.mxu1 %v9255_v57 }
 0x7a1   : > { %5926 = vmatprep.subr.bf16.mxu1 %v9165_v53  ;;  %v6295_v53 = vld [vmem:[%s6771_s20 + $0x8] sm:$0xff] }
 0x7a3   : > { %3262 = vmatmul.mubr.f32.vlgmr.msra.gmra.mrb[36].mxu1 %v2928_v41 }
 0x7a4   : > { %3267 = vmatprep.mubr.f32.mxu1 %v5167_v10  ;;  %5928 = vmatpush3.bf16.msra.mxu1 %v9166_v4  ;;  %v6297_v10 = vld [vmem:[%s6771_s20 + $0x20] sm:$0xff] }
 0x7a5   : > { %5930 = vmatprep.subr.bf16.mxu1 %v9167_v43  ;;  %v6293_v43 = vld [vmem:[%s6771_s20] sm:$0xff] }
 0x7a7   : > { %3268 = vmatmul.mubr.f32.gmra.mrb[38].mxu1 %v5151_v54 }
 0x7a8   : > { %3273 = vmatprep.mubr.f32.mxu1 %v3055_v0  ;;  %5932 = vmatpush3.bf16.msra.mxu1 %v9168_v55  ;;  %v6294_v55 = vld [vmem:[%s6771_s20 + $0x10] sm:$0xff] }
 0x7a9   : > { %5934 = vmatprep.subr.bf16.mxu1 %v9169_v61 }
 0x7ab   : > { %3274 = vmatmul.mubr.f32.gmra.mrb[40].mxu1 %v2938_v50 }
 0x7ac   : > { %3279 = vmatprep.mubr.f32.mxu1 %v5170_v60  ;;  %5936 = vmatpush3.bf16.msra.mxu1 %v9170_v15 }
 0x7ad   : > { %5938 = vmatprep.subr.bf16.mxu1 %v9171_v16 }
 0x7af   : > { %3280 = vmatmul.mubr.f32.gmra.mrb[42].mxu1 %v5154_v21 }
 0x7b0   : > { %3285 = vmatprep.mubr.f32.mxu1 %v3065_v28  ;;  %5940 = vmatpush3.bf16.msra.mxu1 %v9172_v52  ;;  %v8394_v52 = vstv %s4746_s11 }
 0x7b1   : > { %5942 = vmatprep.subr.bf16.mxu1 %v9173_v37 }
 0x7b3   : > { %3286 = vmatmul.mubr.f32.gmra.mrb[44].mxu1 %v2948_v14 }
 0x7b4   : > { %3291 = vmatprep.mubr.f32.mxu1 %v5173_v11  ;;  %5944 = vmatpush3.bf16.msra.mxu1 %v9174_v46 }
 0x7b5   : > { %5946 = vmatprep.subr.bf16.mxu1 %v9175_v12  ;;  %v6296_v12 = vld [vmem:[%s6771_s20 + $0x18] sm:$0xff] }
 0x7b7   : > { %3292 = vmatmul.mubr.f32.gmra.mrb[46].mxu1 %v5157_v32 }
 0x7b8   : > { %3297 = vmatprep.mubr.f32.mxu1 %v3075_v51  ;;  %5948 = vmatpush3.bf16.msra.mxu1 %v9176_v25  ;;  %v8396_v25 = vstv %s4747_s12 }
 0x7b9   : > { %5950 = vmatprep.subr.bf16.mxu1 %v9177_v24  ;;  %v3332_v61 = vmul.f32 %v6294_v55, %v8396_v25  ;;  %v3331_v4 = vmul.f32 %v6295_v53, %v8396_v25 }
 0x7bb   : > { %3298 = vmatmul.mubr.f32.gmra.mrb[48].mxu1 %v2958_v63  ;;  %v3334_v63 = vmul.f32 %v6297_v10, %v8396_v25 }
 0x7bc   : > { %3303 = vmatprep.mubr.f32.mxu1 %v5176_v35  ;;  %5952 = vmatpush3.bf16.msra.mxu1 %v9178_v22  ;;  %v3330_v22 = vmul.f32 %v6293_v43, %v8396_v25  ;;  %v6298_v35 = vld [vmem:[%s6771_s20 + $0x30] sm:$0xff] }
 0x7bd   : > { %5954 = vmatprep.subr.bf16.mxu1 %v9179_v5  ;;  %v3333_v5 = vmul.f32 %v6296_v12, %v8396_v25  ;;  %v3336_v60 = vmul.f32 %v6298_v35, %v8396_v25 }
 0x7bf   : > { %3304 = vmatmul.mubr.f32.gmra.mrb[50].mxu1 %v5160_v33 }
 0x7c0   : > { %5956 = vmatpush3.bf16.msra.mxu1 %v9180_v59 }
 0x876   : > { %v3263_v46 = vpop.f32.mrb[36].mxu1 }
 0x877   : > { %v3265_v24 = vpop.f32.mrb[37].mxu1  ;;  %v3313_v16 = vmul.f32 %v8394_v52, %v3263_v46 }
 0x878   : > { %v3314_v15 = vmul.f32 %v8394_v52, %v3265_v24  ;;  %v6299_v24 = vld [vmem:[%s6771_s20 + $0x28] sm:$0xff] }
 0x879   : > { %v3346_v33 = vadd.f32 %v3330_v22, %v3313_v16  ;;  %v3335_v16 = vmul.f32 %v6299_v24, %v8396_v25  ;;  %v6300_v22 = vld [vmem:[%s6771_s20 + $0x38] sm:$0xff] }
 0x87a   : > { %v3269_v37 = vpop.f32.mrb[38].mxu1  ;;  %v3347_v32 = vadd.f32 %v3331_v4, %v3314_v15  ;;  %v3337_v55 = vmul.f32 %v6300_v22, %v8396_v25 }
 0x87b   : > { %v3315_v59 = vmul.f32 %v8394_v52, %v3269_v37  ;;  %v3271_v11 = vpop.f32.mrb[39].mxu1 }
 0x87c   : > { %v3316_v21 = vmul.f32 %v8394_v52, %v3271_v11 }
 0x87d   : > { %v3348_v51 = vadd.f32 %v3332_v61, %v3315_v59 }
 0x87e   : > { %v3349_v54 = vadd.f32 %v3333_v5, %v3316_v21  ;;  %v3275_v28 = vpop.f32.mrb[40].mxu1 }
 0x87f   : > { %v5815_v0 = vpack.c.bf16 %v3348_v51, %v3346_v33  ;;  %v3277_v41 = vpop.f32.mrb[41].mxu1  ;;  %v3317_v14 = vmul.f32 %v8394_v52, %v3275_v28  ;;  %v6302_v28 = vld [vmem:[%s6771_s20 + $0x50] sm:$0xff] }
 0x880   : > { %v5813_v50 = vpack.c.bf16 %v3349_v54, %v3347_v32  ;;  %v3318_v46 = vmul.f32 %v8394_v52, %v3277_v41  ;;  %v6301_v32 = vld [vmem:[%s6771_s20 + $0x40] sm:$0xff] }
 0x881   : > { %v3350_v4 = vadd.f32 %v3334_v63, %v3317_v14  ;;  %v3338_v54 = vmul.f32 %v6301_v32, %v8396_v25  ;;  %v6304_v63 = vld [vmem:[%s6771_s20 + $0x58] sm:$0xff] }
 0x882   : > { %v3281_v43 = vpop.f32.mrb[42].mxu1  ;;  %5814 = vmatprep.subr.bf16.mxu0 %v5813_v50  ;;  %v3351_v12 = vadd.f32 %v3335_v16, %v3318_v46  ;;  %v6303_v50 = vld [vmem:[%s6771_s20 + $0x48] sm:$0xff]  ;;  %v3341_v35 = vmul.f32 %v6304_v63, %v8396_v25 }
 0x883   : > { %v3319_v61 = vmul.f32 %v8394_v52, %v3281_v43  ;;  %v3283_v15 = vpop.f32.mrb[43].mxu1  ;;  %5816 = vmatpush1.bf16.msra.mxu0 %v5815_v0  ;;  %v3340_v0 = vmul.f32 %v6302_v28, %v8396_v25  ;;  %v3339_v14 = vmul.f32 %v6303_v50, %v8396_v25 }
 0x884   : > { %v3320_v53 = vmul.f32 %v8394_v52, %v3283_v15 }
 0x885   : > { %v3352_v37 = vadd.f32 %v3336_v60, %v3319_v61 }
 0x886   : > { %v3353_v5 = vadd.f32 %v3337_v55, %v3320_v53  ;;  %v3287_v59 = vpop.f32.mrb[44].mxu1 }
 0x887   : > { %v5819_v11 = vpack.c.bf16 %v3352_v37, %v3350_v4  ;;  %v3289_v21 = vpop.f32.mrb[45].mxu1  ;;  %v3321_v51 = vmul.f32 %v8394_v52, %v3287_v59  ;;  %v6306_v59 = vld [vmem:[%s6771_s20 + $0x70] sm:$0xff] }
 0x888   : > { %v5817_v33 = vpack.c.bf16 %v3353_v5, %v3351_v12  ;;  %v3322_v41 = vmul.f32 %v8394_v52, %v3289_v21  ;;  %v6305_v12 = vld [vmem:[%s6771_s20 + $0x60] sm:$0xff] }
 0x889   : > { %v3354_v16 = vadd.f32 %v3338_v54, %v3321_v51  ;;  %v3342_v5 = vmul.f32 %v6305_v12, %v8396_v25  ;;  %v6308_v54 = vld [vmem:[%s6771_s20 + $0x78] sm:$0xff]  ;;  %v9265_v12 = vld [vmem:[#allocation29_spill] sm:$0xff] }
 0x88a   : > { %v3293_v10 = vpop.f32.mrb[46].mxu1  ;;  %5818 = vmatprep.subr.bf16.mxu0 %v5817_v33  ;;  %v3355_v22 = vadd.f32 %v3339_v14, %v3322_v41  ;;  %v6307_v33 = vld [vmem:[%s6771_s20 + $0x68] sm:$0xff]  ;;  %v3345_v28 = vmul.f32 %v6308_v54, %v8396_v25  ;;  %v9270_v54 = vld [vmem:[#allocation34_spill] sm:$0xff] }
 0x88b   : > { %v3323_v60 = vmul.f32 %v8394_v52, %v3293_v10  ;;  %v3295_v46 = vpop.f32.mrb[47].mxu1  ;;  %5820 = vmatpush1.bf16.msra.mxu0 %v5819_v11  ;;  %v3344_v11 = vmul.f32 %v6306_v59, %v8396_v25  ;;  %v3343_v51 = vmul.f32 %v6307_v33, %v8396_v25  ;;  %v9256_v25 = vld [vmem:[#allocation20_spill] sm:$0xff]  ;;  %v9266_v59 = vld [vmem:[#allocation30_spill] sm:$0xff] }
 0x88c   : > { %v3324_v24 = vmul.f32 %v8394_v52, %v3295_v46  ;;  %v9268_v33 = vld [vmem:[#allocation32_spill] sm:$0xff] }
 0x88d   : > { %v3356_v43 = vadd.f32 %v3340_v0, %v3323_v60 }
 0x88e   : > { %v3357_v55 = vadd.f32 %v3341_v35, %v3324_v24  ;;  %v3299_v61 = vpop.f32.mrb[48].mxu1  ;;  %v6309_v24 = vld [vmem:[#allocation6] sm:$0xff] }
 0x88f   : > { %v5823_v15 = vpack.c.bf16 %v3356_v43, %v3354_v16  ;;  %v3301_v53 = vpop.f32.mrb[49].mxu1  ;;  %v3325_v37 = vmul.f32 %v8394_v52, %v3299_v61  ;;  %v9257_v16 = vld [vmem:[#allocation21_spill] sm:$0xff]  ;;  %v6311_v43 = vld [vmem:[#allocation6 + $0x10] sm:$0xff]  ;;  %v6313_v61 = vld [vmem:[#allocation6 + $0x20] sm:$0xff] }
 0x890   : > { %v5821_v4 = vpack.c.bf16 %v3357_v55, %v3355_v22  ;;  %v3326_v21 = vmul.f32 %v8394_v52, %v3301_v53  ;;  %v9259_v22 = vld [vmem:[#allocation23_spill] sm:$0xff]  ;;  %v9261_v55 = vld [vmem:[#allocation25_spill] sm:$0xff] }
 0x891   : > { %v3358_v14 = vadd.f32 %v3342_v5, %v3325_v37  ;;  %v9263_v53 = vld [vmem:[#allocation27_spill] sm:$0xff]  ;;  %v9264_v37 = vld [vmem:[#allocation28_spill] sm:$0xff]  ;;  %v6315_v5 = vld [vmem:[#allocation6 + $0x30] sm:$0xff] }
 0x892   : > { %v3305_v32 = vpop.f32.mrb[50].mxu1  ;;  %5822 = vmatprep.subr.bf16.mxu0 %v5821_v4  ;;  %v3359_v63 = vadd.f32 %v3343_v51, %v3326_v21  ;;  %v6314_v4 = vld [vmem:[#allocation6 + $0x28] sm:$0xff]  ;;  %v6316_v21 = vld [vmem:[#allocation6 + $0x38] sm:$0xff] }
 0x893   : > { %v3327_v0 = vmul.f32 %v8394_v52, %v3305_v32  ;;  %v3307_v41 = vpop.f32.mrb[51].mxu1  ;;  %5824 = vmatpush1.bf16.msra.mxu0 %v5823_v15  ;;  %v9262_v15 = vld [vmem:[#allocation26_spill] sm:$0xff]  ;;  %v9269_v51 = vld [vmem:[#allocation33_spill] sm:$0xff]  ;;  %v6317_v32 = vld [vmem:[#allocation6 + $0x40] sm:$0xff] }
 0x894   : > { %v3328_v50 = vmul.f32 %v8394_v52, %v3307_v41  ;;  %v6310_v52 = vld [vmem:[#allocation6 + $0x8] sm:$0xff]  ;;  %v9272_v41 = vld [vmem:[#allocation36_spill] sm:$0xff] }
 0x895   : > { %v3360_v10 = vadd.f32 %v3344_v11, %v3327_v0  ;;  %v9267_v11 = vld [vmem:[#allocation31_spill] sm:$0xff]  ;;  %v6318_v0 = vld [vmem:[#allocation6 + $0x48] sm:$0xff] }
 0x896   : > { %v3361_v35 = vadd.f32 %v3345_v28, %v3328_v50  ;;  %v9271_v28 = vld [vmem:[#allocation35_spill] sm:$0xff]  ;;  %v9273_v50 = vld [vmem:[#allocation37_spill] sm:$0xff] }
 0x897   : > { %v5827_v60 = vpack.c.bf16 %v3360_v10, %v3358_v14  ;;  %v6319_v14 = vld [vmem:[#allocation6 + $0x50] sm:$0xff] }
 0x898   : > { %v5825_v46 = vpack.c.bf16 %v3361_v35, %v3359_v63  ;;  %v9274_v10 = vld [vmem:[#allocation38_spill] sm:$0xff]  ;;  %v9275_v63 = vld [vmem:[#allocation39_spill] sm:$0xff] }
 0x899   : > { %v6320_v35 = vld [vmem:[#allocation6 + $0x58] sm:$0xff] }
 0x89a   : > { %5826 = vmatprep.subr.bf16.mxu0 %v5825_v46  ;;  %v9277_v46 = vld [vmem:[#allocation41_spill] sm:$0xff] }
 0x89b   : > { %5828 = vmatpush1.bf16.msra.mxu0 %v5827_v60  ;;  %v9276_v60 = vld [vmem:[#allocation40_spill] sm:$0xff] }
 0x89c   : > { %5830 = vmatprep.subr.bf16.mxu0 %v6867_v40  ;;  %v9258_v40 = vld [vmem:[#allocation22_spill] sm:$0xff] }
 0x89e   : > { %4748 = vmatmul.mubr.msk.f32.vlgmr.msra.gmra.mrb[156].mxu0 %vm561_vm0, %v6309_v24  ;;  %v6321_v24 = vld [vmem:[#allocation6 + $0x60] sm:$0xff] }
 0x89f   : > { %3432 = vmatprep.mubr.f32.mxu0 %v9065_v34  ;;  %5832 = vmatpush1.bf16.msra.mxu0 %v6885_v47  ;;  %v6312_v47 = vld [vmem:[#allocation6 + $0x18] sm:$0xff] }
 0x8a0   : > { %5834 = vmatprep.subr.bf16.mxu0 %v6890_v49  ;;  %v9260_v49 = vld [vmem:[#allocation24_spill] sm:$0xff] }
 0x8a2   : > { %4749 = vmatmul.mubr.msk.f32.gmra.mrb[158].mxu0 %vm561_vm0, %v6310_v52  ;;  %v9278_v52 = vld [vmem:[#allocation42_spill] sm:$0xff] }
 0x8a3   : > { %3438 = vmatprep.mubr.f32.mxu0 %v9065_v34  ;;  %5836 = vmatpush1.bf16.msra.mxu0 %v9256_v25  ;;  %v9279_v25 = vld [vmem:[#allocation43_spill] sm:$0xff] }
 0x8a4   : > { %5838 = vmatprep.subr.bf16.mxu0 %v9257_v16  ;;  %v6322_v16 = vld [vmem:[#allocation6 + $0x68] sm:$0xff] }
 0x8a6   : > { %4750 = vmatmul.mubr.msk.f32.gmra.mrb[160].mxu0 %vm561_vm0, %v6311_v43  ;;  %v9280_v43 = vld [vmem:[#allocation44_spill] sm:$0xff] }
 0x8a7   : > { %3444 = vmatprep.mubr.f32.mxu0 %v9065_v34  ;;  %5840 = vmatpush1.bf16.msra.mxu0 %v9258_v40  ;;  %v9281_v40 = vld [vmem:[#allocation45_spill] sm:$0xff] }
 0x8a8   : > { %5842 = vmatprep.subr.bf16.mxu0 %v9259_v22  ;;  %v9282_v22 = vld [vmem:[#allocation46_spill] sm:$0xff] }
 0x8aa   : > { %4751 = vmatmul.mubr.msk.f32.gmra.mrb[162].mxu0 %vm561_vm0, %v6312_v47  ;;  %v9283_v47 = vld [vmem:[#allocation47_spill] sm:$0xff] }
 0x8ab   : > { %3450 = vmatprep.mubr.f32.mxu0 %v9065_v34  ;;  %5844 = vmatpush1.bf16.msra.mxu0 %v9260_v49  ;;  %v9284_v49 = vld [vmem:[#allocation48_spill] sm:$0xff] }
 0x8ac   : > { %5846 = vmatprep.subr.bf16.mxu0 %v9261_v55  ;;  %v9285_v55 = vld [vmem:[#allocation49_spill] sm:$0xff] }
 0x8ae   : > { %4752 = vmatmul.mubr.msk.f32.gmra.mrb[164].mxu0 %vm561_vm0, %v6313_v61 }
 0x8af   : > { %3456 = vmatprep.mubr.f32.mxu0 %v9065_v34  ;;  %5848 = vmatpush1.bf16.msra.mxu0 %v9262_v15 }
 0x8b0   : > { %5850 = vmatprep.subr.bf16.mxu0 %v9263_v53 }
 0x8b2   : > { %4753 = vmatmul.mubr.msk.f32.gmra.mrb[166].mxu0 %vm561_vm0, %v6314_v4  ;;  %v9286_v4 = vld [vmem:[#allocation66_spill] sm:$0xff] }
 0x8b3   : > { %3462 = vmatprep.mubr.f32.mxu0 %v9065_v34  ;;  %5852 = vmatpush1.bf16.msra.mxu0 %v9264_v37 }
 0x8b4   : > { %5854 = vmatprep.subr.bf16.mxu0 %v9265_v12  ;;  %v9287_v12 = vld [vmem:[#allocation67_spill] sm:$0xff] }
 0x8b6   : > { %4754 = vmatmul.mubr.msk.f32.gmra.mrb[168].mxu0 %vm561_vm0, %v6315_v5 }
 0x8b7   : > { %3468 = vmatprep.mubr.f32.mxu0 %v9065_v34  ;;  %5856 = vmatpush1.bf16.msra.mxu0 %v9266_v59  ;;  %v9288_v59 = vld [vmem:[#allocation68_spill] sm:$0xff] }
 0x8b8   : > { %5858 = vmatprep.subr.bf16.mxu0 %v9267_v11 }
 0x8ba   : > { %4755 = vmatmul.mubr.msk.f32.gmra.mrb[170].mxu0 %vm561_vm0, %v6316_v21  ;;  %v9289_v21 = vld [vmem:[#allocation69_spill] sm:$0xff] }
 0x8bb   : > { %3474 = vmatprep.mubr.f32.mxu0 %v9065_v34  ;;  %5860 = vmatpush1.bf16.msra.mxu0 %v9268_v33 }
 0x8bc   : > { %5862 = vmatprep.subr.bf16.mxu0 %v9269_v51  ;;  %v9290_v51 = vld [vmem:[#allocation70_spill] sm:$0xff] }
 0x8be   : > { %4756 = vmatmul.mubr.msk.f32.gmra.mrb[172].mxu0 %vm561_vm0, %v6317_v32 }
 0x8bf   : > { %3480 = vmatprep.mubr.f32.mxu0 %v9065_v34  ;;  %5864 = vmatpush1.bf16.msra.mxu0 %v9270_v54  ;;  %v9291_v54 = vld [vmem:[#allocation71_spill] sm:$0xff] }
 0x8c0   : > { %5866 = vmatprep.subr.bf16.mxu0 %v9271_v28 }
 0x8c2   : > { %4757 = vmatmul.mubr.msk.f32.gmra.mrb[174].mxu0 %vm561_vm0, %v6318_v0  ;;  %v9292_v0 = vld [vmem:[#allocation72_spill] sm:$0xff] }
 0x8c3   : > { %3486 = vmatprep.mubr.f32.mxu0 %v9065_v34  ;;  %5868 = vmatpush1.bf16.msra.mxu0 %v9272_v41 }
 0x8c4   : > { %5870 = vmatprep.subr.bf16.mxu0 %v9273_v50  ;;  %v9293_v50 = vld [vmem:[#allocation73_spill] sm:$0xff] }
 0x8c6   : > { %4758 = vmatmul.mubr.msk.f32.gmra.mrb[176].mxu0 %vm561_vm0, %v6319_v14 }
 0x8c7   : > { %3492 = vmatprep.mubr.f32.mxu0 %v9065_v34  ;;  %5872 = vmatpush1.bf16.msra.mxu0 %v9274_v10  ;;  %v9294_v10 = vld [vmem:[#allocation74_spill] sm:$0xff] }
 0x8c8   : > { %5874 = vmatprep.subr.bf16.mxu0 %v9275_v63 }
 0x8ca   : > { %4759 = vmatmul.mubr.msk.f32.gmra.mrb[178].mxu0 %vm561_vm0, %v6320_v35  ;;  %v9295_v35 = vld [vmem:[#allocation75_spill] sm:$0xff] }
 0x8cb   : > { %3498 = vmatprep.mubr.f32.mxu0 %v9065_v34  ;;  %5876 = vmatpush1.bf16.msra.mxu0 %v9276_v60 }
 0x8cc   : > { %5878 = vmatprep.subr.bf16.mxu0 %v9277_v46  ;;  %v9296_v46 = vld [vmem:[#allocation76_spill] sm:$0xff] }
 0x8ce   : > { %4760 = vmatmul.mubr.msk.f32.gmra.mrb[180].mxu0 %vm561_vm0, %v6321_v24 }
 0x8cf   : > { %3504 = vmatprep.mubr.f32.mxu0 %v9065_v34  ;;  %5880 = vmatpush1.bf16.msra.mxu0 %v9278_v52  ;;  %v9297_v52 = vld [vmem:[#allocation77_spill] sm:$0xff] }
 0x8d0   : > { %5882 = vmatprep.subr.bf16.mxu0 %v9279_v25 }
 0x8d2   : > { %4761 = vmatmul.mubr.msk.f32.gmra.mrb[182].mxu0 %vm561_vm0, %v6322_v16  ;;  %v9298_v16 = vld [vmem:[#allocation78_spill] sm:$0xff] }
 0x8d3   : > { %5884 = vmatpush1.bf16.msra.mxu0 %v9280_v43 }
 0x8d4   : > { %5886 = vmatprep.subr.bf16.mxu0 %v9281_v40  ;;  %v9299_v40 = vld [vmem:[#allocation79_spill] sm:$0xff] }
 0x8d7   : > { %5888 = vmatpush1.bf16.msra.mxu0 %v9282_v22 }
 0x8d8   : > { %5890 = vmatprep.subr.bf16.mxu0 %v9283_v47  ;;  %v9300_v47 = vld [vmem:[#allocation80_spill] sm:$0xff] }
 0x8db   : > { %5892 = vmatpush1.bf16.msra.mxu0 %v9284_v49 }
 0x8dc   : > { %5894 = vmatprep.subr.bf16.mxu0 %v9285_v55 }
 0x971   : > { %v3428_v61 = vpop.f32.mrb[156].mxu0 }
 0x972   : > { %v3430_v15 = vpop.f32.mrb[157].mxu0 }
 0x973   : > { %3575 = vmatprep.mubr.f32.mxu0 %v3430_v15 }
 0x974   : > { %3576 = vmatmul.mubr.f32.vlgmr.msra.gmra.mrb[184].mxu0 %v3428_v61 }
 0x975   : > { %v3434_v53 = vpop.f32.mrb[158].mxu0  ;;  %5896 = vmatpush3.bf16.msra.mxu0 %v9286_v4 }
 0x976   : > { %v3436_v37 = vpop.f32.mrb[159].mxu0  ;;  %5898 = vmatprep.subr.bf16.mxu0 %v9287_v12 }
 0x977   : > { %3581 = vmatprep.mubr.f32.mxu0 %v3436_v37 }
 0x978   : > { %3582 = vmatmul.mubr.f32.gmra.mrb[186].mxu0 %v3434_v53 }
 0x979   : > { %v3440_v5 = vpop.f32.mrb[160].mxu0  ;;  %5900 = vmatpush3.bf16.msra.mxu0 %v9288_v59 }
 0x97a   : > { %v3442_v11 = vpop.f32.mrb[161].mxu0  ;;  %5902 = vmatprep.subr.bf16.mxu0 %v9289_v21  ;;  %v9301_v21 = vld [vmem:[#allocation100_spill] sm:$0xff] }
 0x97b   : > { %3587 = vmatprep.mubr.f32.mxu0 %v3442_v11 }
 0x97c   : > { %3588 = vmatmul.mubr.f32.gmra.mrb[188].mxu0 %v3440_v5 }
 0x97d   : > { %v3446_v33 = vpop.f32.mrb[162].mxu0  ;;  %5904 = vmatpush3.bf16.msra.mxu0 %v9290_v51 }
 0x97e   : > { %v3448_v32 = vpop.f32.mrb[163].mxu0  ;;  %5906 = vmatprep.subr.bf16.mxu0 %v9291_v54 }
 0x97f   : > { %3593 = vmatprep.mubr.f32.mxu0 %v3448_v32 }
 0x980   : > { %3594 = vmatmul.mubr.f32.gmra.mrb[190].mxu0 %v3446_v33 }
 0x981   : > { %v3452_v28 = vpop.f32.mrb[164].mxu0  ;;  %5908 = vmatpush3.bf16.msra.mxu0 %v9292_v0 }
 0x982   : > { %v3454_v41 = vpop.f32.mrb[165].mxu0  ;;  %5910 = vmatprep.subr.bf16.mxu0 %v9293_v50 }
 0x983   : > { %3599 = vmatprep.mubr.f32.mxu0 %v3454_v41  ;;  %v6324_v41 = vld [vmem:[#allocation9 + $0x8] sm:$0xff] }
 0x984   : > { %3600 = vmatmul.mubr.f32.gmra.mrb[192].mxu0 %v3452_v28  ;;  %v6323_v28 = vld [vmem:[#allocation9] sm:$0xff] }
 0x985   : > { %v3458_v14 = vpop.f32.mrb[166].mxu0  ;;  %5912 = vmatpush3.bf16.msra.mxu0 %v9294_v10 }
 0x986   : > { %v3460_v63 = vpop.f32.mrb[167].mxu0  ;;  %5914 = vmatprep.subr.bf16.mxu0 %v9295_v35 }
 0x987   : > { %3605 = vmatprep.mubr.f32.mxu0 %v3460_v63  ;;  %v6325_v63 = vld [vmem:[#allocation9 + $0x10] sm:$0xff] }
 0x988   : > { %3606 = vmatmul.mubr.f32.gmra.mrb[194].mxu0 %v3458_v14 }
 0x989   : > { %v3464_v60 = vpop.f32.mrb[168].mxu0  ;;  %5916 = vmatpush3.bf16.msra.mxu0 %v9296_v46 }
 0x98a   : > { %v3466_v24 = vpop.f32.mrb[169].mxu0  ;;  %5918 = vmatprep.subr.bf16.mxu0 %v9297_v52  ;;  %v6326_v52 = vld [vmem:[#allocation9 + $0x18] sm:$0xff] }
 0x98b   : > { %3611 = vmatprep.mubr.f32.mxu0 %v3466_v24 }
 0x98c   : > { %3612 = vmatmul.mubr.f32.gmra.mrb[196].mxu0 %v3464_v60 }
 0x98d   : > { %v3470_v25 = vpop.f32.mrb[170].mxu0  ;;  %5920 = vmatpush3.bf16.msra.mxu0 %v9298_v16 }
 0x98e   : > { %v3472_v43 = vpop.f32.mrb[171].mxu0  ;;  %5922 = vmatprep.subr.bf16.mxu0 %v9299_v40 }
 0x98f   : > { %3617 = vmatprep.mubr.f32.mxu0 %v3472_v43 }
 0x990   : > { %3618 = vmatmul.mubr.f32.gmra.mrb[198].mxu0 %v3470_v25 }
 0x991   : > { %v3476_v22 = vpop.f32.mrb[172].mxu0  ;;  %5924 = vmatpush3.bf16.msra.mxu0 %v9300_v47 }
 0x992   : > { %v3478_v49 = vpop.f32.mrb[173].mxu0 }
 0x993   : > { %3688 = vmatprep.mubr.f32.mxu0 %v3478_v49 }
 0x994   : > { %3689 = vmatmul.mubr.f32.vlgmr.msra.gmra.mrb[200].mxu0 %v3476_v22 }
 0x995   : > { %v3482_v55 = vpop.f32.mrb[174].mxu0 }
 0x996   : > { %v3484_v61 = vpop.f32.mrb[175].mxu0 }
 0x997   : > { %3693 = vmatprep.mubr.f32.mxu0 %v3484_v61 }
 0x998   : > { %3694 = vmatmul.mubr.f32.gmra.mrb[202].mxu0 %v3482_v55 }
 0x999   : > { %v3488_v15 = vpop.f32.mrb[176].mxu0 }
 0x99a   : > { %v3490_v53 = vpop.f32.mrb[177].mxu0 }
 0x99b   : > { %3698 = vmatprep.mubr.f32.mxu0 %v3490_v53 }
 0x99c   : > { %3699 = vmatmul.mubr.f32.gmra.mrb[204].mxu0 %v3488_v15 }
 0x99d   : > { %v3494_v4 = vpop.f32.mrb[178].mxu0 }
 0x99e   : > { %v3496_v37 = vpop.f32.mrb[179].mxu0 }
 0x99f   : > { %3703 = vmatprep.mubr.f32.mxu0 %v3496_v37 }
 0x9a0   : > { %3704 = vmatmul.mubr.f32.gmra.mrb[206].mxu0 %v3494_v4 }
 0x9a1   : > { %v3500_v12 = vpop.f32.mrb[180].mxu0  ;;  %3944 = vmatprep.mubr.f32.mxu0 %v9065_v34 }
 0x9a2   : > { %v3502_v5 = vpop.f32.mrb[181].mxu0 }
 0x9a3   : > { %3773 = vmatprep.mubr.f32.mxu1 %v3502_v5 }
 0x9a4   : > { %3774 = vmatmul.mubr.f32.vlgmr.msra.gmra.mrb[52].mxu1 %v3500_v12 }
 0x9a5   : > { %v3506_v59 = vpop.f32.mrb[182].mxu0 }
 0x9a6   : > { %v3508_v11 = vpop.f32.mrb[183].mxu0 }
 0x9a7   : > { %3778 = vmatprep.mubr.f32.mxu1 %v3508_v11 }
 0x9a8   : > { %3779 = vmatmul.mubr.f32.gmra.mrb[54].mxu1 %v3506_v59 }
 0x9a9   : > { %5185 = vmatprep.mubr.msk.f32.mxu1 %vm1495_vm1, %v9301_v21 }
 0xa47   : > { %v3577_v33 = vpop.f32.mrb[184].mxu0 }
 0xa48   : > { %v3816_v51 = vsub.f32 0.0, %v3577_v33  ;;  %v3579_v32 = vpop.f32.mrb[185].mxu0  ;;  %v3784_v10 = vsub.f32 %v3577_v33, %v6323_v28  ;;  %v6327_v33 = vld [vmem:[#allocation9 + $0x20] sm:$0xff] }
 0xa49   : > { %v3817_v54 = vsub.f32 0.0, %v3579_v32  ;;  %v3785_v24 = vsub.f32 %v3579_v32, %v6324_v41 }
 0xa4a   : > { %v3832_v0 = vsub.f32 %v3816_v51, %v6323_v28  ;;  %v3800_v55 = vmax.f32 %v3784_v10, 0.0  ;;  %v6328_v28 = vld [vmem:[#allocation9 + $0x28] sm:$0xff]  ;;  %v6329_v10 = vld [vmem:[#allocation9 + $0x30] sm:$0xff] }
 0xa4b   : > { %v3833_v50 = vsub.f32 %v3817_v54, %v6324_v41  ;;  %v3583_v14 = vpop.f32.mrb[186].mxu0  ;;  %v3801_v37 = vmax.f32 %v3785_v24, 0.0  ;;  %v6330_v24 = vld [vmem:[#allocation9 + $0x38] sm:$0xff] }
 0xa4c   : > { %v3786_v35 = vsub.f32 %v3583_v14, %v6325_v63  ;;  %v3818_v60 = vsub.f32 0.0, %v3583_v14  ;;  %v3585_v46 = vpop.f32.mrb[187].mxu0  ;;  %v3848_v43 = vmax.f32 %v3832_v0, 0.0 }
 0xa4d   : > { %v3787_v25 = vsub.f32 %v3585_v46, %v6326_v52  ;;  %v3819_v16 = vsub.f32 0.0, %v3585_v46  ;;  %v3849_v22 = vmax.f32 %v3833_v50, 0.0 }
 0xa4e   : > { %v3834_v40 = vsub.f32 %v3818_v60, %v6325_v63  ;;  %v3802_v61 = vmax.f32 %v3786_v35, 0.0  ;;  %v3864_v11 = vsub.f32 %v3800_v55, %v3848_v43 }
 0xa4f   : > { %v3835_v47 = vsub.f32 %v3819_v16, %v6326_v52  ;;  %v3589_v49 = vpop.f32.mrb[188].mxu0  ;;  %v3803_v12 = vmax.f32 %v3787_v25, 0.0  ;;  %v3865_v32 = vsub.f32 %v3801_v37, %v3849_v22 }
 0xa50   : > { %v3850_v15 = vmax.f32 %v3834_v40, 0.0  ;;  %v3820_v53 = vsub.f32 0.0, %v3589_v49  ;;  %v3591_v4 = vpop.f32.mrb[189].mxu0  ;;  %v3788_v14 = vsub.f32 %v3589_v49, %v6327_v33 }
 0xa51   : > { %v3851_v5 = vmax.f32 %v3835_v47, 0.0  ;;  %v3821_v59 = vsub.f32 0.0, %v3591_v4  ;;  %v3789_v46 = vsub.f32 %v3591_v4, %v6328_v28 }
 0xa52   : > { %v3866_v21 = vsub.f32 %v3802_v61, %v3850_v15  ;;  %v3836_v51 = vsub.f32 %v3820_v53, %v6327_v33  ;;  %v3804_v61 = vmax.f32 %v3788_v14, 0.0  ;;  %v6331_v33 = vld [vmem:[#allocation9 + $0x40] sm:$0xff] }
 0xa53   : > { %v3867_v54 = vsub.f32 %v3803_v12, %v3851_v5  ;;  %v3837_v0 = vsub.f32 %v3821_v59, %v6328_v28  ;;  %v3595_v41 = vpop.f32.mrb[190].mxu0  ;;  %v3805_v12 = vmax.f32 %v3789_v46, 0.0  ;;  %v6332_v28 = vld [vmem:[#allocation9 + $0x48] sm:$0xff]  ;;  %v6334_v46 = vld [vmem:[#allocation9 + $0x58] sm:$0xff] }
 0xa54   : > { %v5959_v50 = vpack.c.bf16 %v3866_v21, %v3864_v11  ;;  %v3790_v63 = vsub.f32 %v3595_v41, %v6329_v10  ;;  %v3822_v35 = vsub.f32 0.0, %v3595_v41  ;;  %v3597_v60 = vpop.f32.mrb[191].mxu0  ;;  %v3852_v43 = vmax.f32 %v3836_v51, 0.0 }
 0xa55   : > { %v3791_v52 = vsub.f32 %v3597_v60, %v6330_v24  ;;  %v3823_v25 = vsub.f32 0.0, %v3597_v60  ;;  %v5957_v16 = vpack.c.bf16 %v3867_v54, %v3865_v32  ;;  %v3853_v47 = vmax.f32 %v3837_v0, 0.0 }
 0xa56   : > { %v3838_v40 = vsub.f32 %v3822_v35, %v6329_v10  ;;  %v3806_v15 = vmax.f32 %v3790_v63, 0.0  ;;  %v3868_v11 = vsub.f32 %v3804_v61, %v3852_v43  ;;  %v6333_v63 = vld [vmem:[#allocation9 + $0x50] sm:$0xff] }
 0xa57   : > { %v3839_v55 = vsub.f32 %v3823_v25, %v6330_v24  ;;  %v3601_v22 = vpop.f32.mrb[192].mxu0  ;;  %5958 = vmatprep.subr.bf16.mxu0 %v5957_v16  ;;  %v3807_v5 = vmax.f32 %v3791_v52, 0.0  ;;  %v3869_v51 = vsub.f32 %v3805_v12, %v3853_v47 }
 0xa58   : > { %v3854_v53 = vmax.f32 %v3838_v40, 0.0  ;;  %v3824_v37 = vsub.f32 0.0, %v3601_v22  ;;  %v3603_v49 = vpop.f32.mrb[193].mxu0  ;;  %5960 = vmatpush1.bf16.msra.mxu0 %v5959_v50  ;;  %v3792_v14 = vsub.f32 %v3601_v22, %v6331_v33 }
 0xa59   : > { %v3855_v59 = vmax.f32 %v3839_v55, 0.0  ;;  %v3825_v4 = vsub.f32 0.0, %v3603_v49  ;;  %v3793_v50 = vsub.f32 %v3603_v49, %v6332_v28 }
 0xa5a   : > { %v3870_v21 = vsub.f32 %v3806_v15, %v3854_v53  ;;  %v3840_v32 = vsub.f32 %v3824_v37, %v6331_v33  ;;  %v3808_v15 = vmax.f32 %v3792_v14, 0.0  ;;  %v6335_v33 = vld [vmem:[#allocation9 + $0x60] sm:$0xff] }
 0xa5b   : > { %v3871_v54 = vsub.f32 %v3807_v5, %v3855_v59  ;;  %v3841_v0 = vsub.f32 %v3825_v4, %v6332_v28  ;;  %v3607_v41 = vpop.f32.mrb[194].mxu0  ;;  %v3809_v5 = vmax.f32 %v3793_v50, 0.0  ;;  %v6336_v28 = vld [vmem:[#allocation9 + $0x68] sm:$0xff]  ;;  %v6338_v50 = vld [vmem:[#allocation9 + $0x78] sm:$0xff] }
 0xa5c   : > { %v5963_v10 = vpack.c.bf16 %v3870_v21, %v3868_v11  ;;  %v3794_v35 = vsub.f32 %v3607_v41, %v6333_v63  ;;  %v3826_v60 = vsub.f32 0.0, %v3607_v41  ;;  %v3609_v24 = vpop.f32.mrb[195].mxu0  ;;  %v3856_v43 = vmax.f32 %v3840_v32, 0.0 }
 0xa5d   : > { %v3795_v52 = vsub.f32 %v3609_v24, %v6334_v46  ;;  %v3827_v25 = vsub.f32 0.0, %v3609_v24  ;;  %v5961_v16 = vpack.c.bf16 %v3871_v54, %v3869_v51  ;;  %v3857_v55 = vmax.f32 %v3841_v0, 0.0 }
 0xa5e   : > { %v3842_v40 = vsub.f32 %v3826_v60, %v6333_v63  ;;  %v3810_v53 = vmax.f32 %v3794_v35, 0.0  ;;  %v3872_v11 = vsub.f32 %v3808_v15, %v3856_v43  ;;  %v6337_v35 = vld [vmem:[#allocation9 + $0x70] sm:$0xff] }
 0xa5f   : > { %v3843_v61 = vsub.f32 %v3827_v25, %v6334_v46  ;;  %v3613_v47 = vpop.f32.mrb[196].mxu0  ;;  %5962 = vmatprep.subr.bf16.mxu0 %v5961_v16  ;;  %v3811_v59 = vmax.f32 %v3795_v52, 0.0  ;;  %v3873_v32 = vsub.f32 %v3809_v5, %v3857_v55 }
 0xa60   : > { %v3858_v37 = vmax.f32 %v3842_v40, 0.0  ;;  %v3828_v12 = vsub.f32 0.0, %v3613_v47  ;;  %v3615_v22 = vpop.f32.mrb[197].mxu0  ;;  %5964 = vmatpush1.bf16.msra.mxu0 %v5963_v10  ;;  %v3796_v14 = vsub.f32 %v3613_v47, %v6335_v33 }
 0xa61   : > { %v3859_v4 = vmax.f32 %v3843_v61, 0.0  ;;  %v3829_v49 = vsub.f32 0.0, %v3615_v22  ;;  %v3797_v10 = vsub.f32 %v3615_v22, %v6336_v28 }
 0xa62   : > { %v3874_v21 = vsub.f32 %v3810_v53, %v3858_v37  ;;  %v3844_v51 = vsub.f32 %v3828_v12, %v6335_v33  ;;  %v3812_v53 = vmax.f32 %v3796_v14, 0.0 }
 0xa63   : > { %v3875_v54 = vsub.f32 %v3811_v59, %v3859_v4  ;;  %v3845_v0 = vsub.f32 %v3829_v49, %v6336_v28  ;;  %v3619_v41 = vpop.f32.mrb[198].mxu0  ;;  %v3813_v5 = vmax.f32 %v3797_v10, 0.0 }
 0xa64   : > { %v5967_v63 = vpack.c.bf16 %v3874_v21, %v3872_v11  ;;  %v3798_v60 = vsub.f32 %v3619_v41, %v6337_v35  ;;  %v3830_v24 = vsub.f32 0.0, %v3619_v41  ;;  %v3621_v46 = vpop.f32.mrb[199].mxu0  ;;  %v3860_v43 = vmax.f32 %v3844_v51, 0.0  ;;  %v6339_v51 = vld [vmem:[%s8711_s7] sm:$0xff] }
 0xa65   : > { %v3799_v52 = vsub.f32 %v3621_v46, %v6338_v50  ;;  %v3831_v25 = vsub.f32 0.0, %v3621_v46  ;;  %v5965_v16 = vpack.c.bf16 %v3875_v54, %v3873_v32  ;;  %v3861_v61 = vmax.f32 %v3845_v0, 0.0  ;;  %v6340_v46 = vld [vmem:[%s8711_s7 + $0x8] sm:$0xff] }
 0xa66   : > { %v3846_v40 = vsub.f32 %v3830_v24, %v6337_v35  ;;  %v3814_v37 = vmax.f32 %v3798_v60, 0.0  ;;  %v3876_v22 = vsub.f32 %v3812_v53, %v3860_v43 }
 0xa67   : > { %v3847_v15 = vsub.f32 %v3831_v25, %v6338_v50  ;;  %5966 = vmatprep.subr.bf16.mxu0 %v5965_v16  ;;  %v5033_v55 = vpop.f32.mrb[200].mxu0  ;;  %v3815_v59 = vmax.f32 %v3799_v52, 0.0  ;;  %v3877_v21 = vsub.f32 %v3813_v5, %v3861_v61 }
 0xa68   : > { %v3862_v12 = vmax.f32 %v3846_v40, 0.0  ;;  %5968 = vmatpush1.bf16.msra.mxu0 %v5967_v63  ;;  %v5034_v47 = vpop.f32.mrb[201].mxu0 }
 0xa69   : > { %v3863_v4 = vmax.f32 %v3847_v15, 0.0  ;;  %v5035_v49 = vadd.f32 %v5034_v47, %v5033_v55  ;;  %v6341_v55 = vld [vmem:[%s8711_s7 + $0x10] sm:$0xff] }
 0xa6a   : > { %v3878_v11 = vsub.f32 %v3814_v37, %v3862_v12 }
 0xa6b   : > { %v3879_v33 = vsub.f32 %v3815_v59, %v3863_v4  ;;  %v3993_v32 = vsub.f32 %v5035_v49, %v6339_v51  ;;  %v4001_v54 = vsub.f32 0.0, %v5035_v49  ;;  %v5036_v28 = vpop.f32.mrb[202].mxu0 }
 0xa6c   : > { %v5971_v0 = vpack.c.bf16 %v3878_v11, %v3876_v22  ;;  %v5037_v41 = vpop.f32.mrb[203].mxu0  ;;  %v6342_v11 = vld [vmem:[%s8711_s7 + $0x18] sm:$0xff] }
 0xa6d   : > { %v4005_v14 = vsub.f32 %v4001_v54, %v6339_v51  ;;  %v5038_v63 = vadd.f32 %v5037_v41, %v5036_v28  ;;  %v5969_v35 = vpack.c.bf16 %v3879_v33, %v3877_v21  ;;  %v3997_v60 = vmax.f32 %v3993_v32, 0.0 }
 0xa6f   : > { %v4009_v24 = vmax.f32 %v4005_v14, 0.0  ;;  %v3994_v10 = vsub.f32 %v5038_v63, %v6340_v46  ;;  %v4002_v50 = vsub.f32 0.0, %v5038_v63  ;;  %5970 = vmatprep.subr.bf16.mxu0 %v5969_v35  ;;  %v5039_v52 = vpop.f32.mrb[204].mxu0  ;;  %v6343_v63 = vld [vmem:[#allocation10] sm:$0xff] }
 0xa70   : > { %5972 = vmatpush1.bf16.msra.mxu0 %v5971_v0  ;;  %v5040_v25 = vpop.f32.mrb[205].mxu0 }
 0xa71   : > { %v3998_v16 = vmax.f32 %v3994_v10, 0.0  ;;  %v4006_v43 = vsub.f32 %v4002_v50, %v6340_v46  ;;  %v5041_v40 = vadd.f32 %v5040_v25, %v5039_v52  ;;  %v4013_v61 = vsub.f32 %v3997_v60, %v4009_v24 }
 0xa73   : > { %v4010_v15 = vmax.f32 %v4006_v43, 0.0  ;;  %v3995_v53 = vsub.f32 %v5041_v40, %v6341_v55  ;;  %v4003_v37 = vsub.f32 0.0, %v5041_v40  ;;  %v5042_v12 = vpop.f32.mrb[206].mxu0  ;;  %4762 = vmatmul.mubr.msk.f32.vlgmr.msra.gmra.mrb[208].mxu0 %vm561_vm0, %v7657_v45 }
 0xa74   : > { %v5043_v47 = vpop.f32.mrb[207].mxu0  ;;  %3950 = vmatprep.mubr.f32.mxu0 %v9065_v34 }
 0xa75   : > { %v4014_v5 = vsub.f32 %v3998_v16, %v4010_v15  ;;  %v4007_v59 = vsub.f32 %v4003_v37, %v6341_v55  ;;  %v5044_v4 = vadd.f32 %v5043_v47, %v5042_v12  ;;  %v3999_v49 = vmax.f32 %v3995_v53, 0.0  ;;  %v6344_v16 = vld [vmem:[#allocation10 + $0x8] sm:$0xff]  ;;  %v9320_v47 = vld [vmem:[#allocation96_spill] sm:$0xff] }
 0xa76   : > { %v9319_v12 = vld [vmem:[#allocation95_spill] sm:$0xff] }
 0xa77   : > { %v4011_v22 = vmax.f32 %v4007_v59, 0.0  ;;  %v3996_v21 = vsub.f32 %v5044_v4, %v6342_v11  ;;  %v4004_v33 = vsub.f32 0.0, %v5044_v4  ;;  %4763 = vmatmul.mubr.msk.f32.gmra.mrb[210].mxu0 %vm561_vm0, %v7691_v26  ;;  %v5077_v51 = vpop.f32.mrb[52].mxu1  ;;  %v5973_v32 = vpack.c.bf16 %v4014_v5, %v4013_v61  ;;  %v9321_v5 = vld [vmem:[#allocation97_spill] sm:$0xff]  ;;  %v9322_v59 = vld [vmem:[#allocation98_spill] sm:$0xff]  ;;  %v9323_v4 = vld [vmem:[#allocation99_spill] sm:$0xff] }
 0xa78   : > { %3956 = vmatprep.mubr.f32.mxu0 %v9065_v34  ;;  %v5078_v45 = vpop.f32.mrb[53].mxu1 }
 0xa79   : > { %v4000_v54 = vmax.f32 %v3996_v21, 0.0  ;;  %v4008_v28 = vsub.f32 %v4004_v33, %v6342_v11  ;;  %5974 = vmatprep.subr.bf16.mxu1 %v5973_v32  ;;  %v5079_v0 = vadd.f32 %v5078_v45, %v5077_v51  ;;  %v4015_v41 = vsub.f32 %v3999_v49, %v4011_v22  ;;  %v9324_v49 = vld [vmem:[#allocation101_spill] sm:$0xff]  ;;  %v9325_v22 = vld [vmem:[#allocation102_spill] sm:$0xff]  ;;  %v9326_v11 = vld [vmem:[#allocation103_spill] sm:$0xff] }
 0xa7a   : > { %5976 = vmatpush3.bf16.msra.mxu1 %v5973_v32  ;;  %v9327_v21 = vld [vmem:[#allocation104_spill] sm:$0xff]  ;;  %v9328_v33 = vld [vmem:[#allocation105_spill] sm:$0xff]  ;;  %v9329_v51 = vld [vmem:[#allocation106_spill] sm:$0xff] }
 0xa7b   : > { %v4012_v14 = vmax.f32 %v4008_v28, 0.0  ;;  %4764 = vmatmul.mubr.msk.f32.gmra.mrb[212].mxu0 %vm561_vm0, %v7705_v20  ;;  %v4122_v35 = vsub.f32 %v5079_v0, %v6343_v63  ;;  %v4126_v60 = vsub.f32 0.0, %v5079_v0  ;;  %v5080_v24 = vpop.f32.mrb[54].mxu1  ;;  %v9330_v32 = vld [vmem:[#allocation107_spill] sm:$0xff]  ;;  %v9331_v45 = vld [vmem:[#allocation108_spill] sm:$0xff]  ;;  %v9333_v28 = vld [vmem:[#allocation110_spill] sm:$0xff] }
 0xa7c   : > { %3962 = vmatprep.mubr.f32.mxu0 %v9065_v34  ;;  %v5081_v26 = vpop.f32.mrb[55].mxu1  ;;  %v9334_v0 = vld [vmem:[#allocation111_spill] sm:$0xff] }
 0xa7d   : > { %v4016_v46 = vsub.f32 %v4000_v54, %v4012_v14  ;;  %v4128_v10 = vsub.f32 %v4126_v60, %v6343_v63  ;;  %v5082_v50 = vadd.f32 %v5081_v26, %v5080_v24  ;;  %v4124_v52 = vmax.f32 %v4122_v35, 0.0  ;;  %v9332_v54 = vld [vmem:[#allocation109_spill] sm:$0xff]  ;;  %v9338_v24 = vld [vmem:[#allocation126_spill] sm:$0xff] }
 0xa7e   : > { %v9336_v14 = vld [vmem:[#allocation113_spill] sm:$0xff] }
 0xa7f   : > { %v4130_v25 = vmax.f32 %v4128_v10, 0.0  ;;  %v4123_v43 = vsub.f32 %v5082_v50, %v6344_v16  ;;  %v4127_v40 = vsub.f32 0.0, %v5082_v50  ;;  %4765 = vmatmul.mubr.msk.f32.gmra.mrb[214].mxu0 %vm561_vm0, %v7716_v29  ;;  %v5977_v61 = vpack.c.bf16 %v4016_v46, %v4015_v41  ;;  %v9335_v41 = vld [vmem:[#allocation112_spill] sm:$0xff]  ;;  %v9337_v63 = vld [vmem:[#allocation125_spill] sm:$0xff]  ;;  %v9339_v10 = vld [vmem:[#allocation127_spill] sm:$0xff] }
 0xa80   : > { %3968 = vmatprep.mubr.f32.mxu0 %v9065_v34  ;;  %v9340_v50 = vld [vmem:[#allocation128_spill] sm:$0xff] }
 0xa81   : > { %v4125_v20 = vmax.f32 %v4123_v43, 0.0  ;;  %v4129_v15 = vsub.f32 %v4127_v40, %v6344_v16  ;;  %5978 = vmatprep.subr.bf16.mxu1 %v5977_v61  ;;  %v4132_v55 = vsub.f32 %v4124_v52, %v4130_v25  ;;  %v9341_v16 = vld [vmem:[#allocation129_spill] sm:$0xff]  ;;  %v9342_v43 = vld [vmem:[#allocation130_spill] sm:$0xff] }
 0xa82   : > { %5980 = vmatpush3.bf16.msra.mxu1 %v5977_v61 }
 0xa83   : > { %v4131_v53 = vmax.f32 %v4129_v15, 0.0  ;;  %4766 = vmatmul.mubr.msk.f32.gmra.mrb[216].mxu0 %vm561_vm0, %v7726_v36  ;;  %5986 = vmatprep.subr.bf16.mxu1 %v9181_v2  ;;  %v9308_v36 = vld [vmem:[#allocation89_spill] sm:$0xff]  ;;  %v9344_v15 = vld [vmem:[#allocation132_spill] sm:$0xff] }
 0xa84   : > { %3974 = vmatprep.mubr.f32.mxu0 %v9065_v34  ;;  %v9311_v2 = vld [vmem:[#allocation121_spill] sm:$0xff] }
 0xa85   : > { %v4133_v37 = vsub.f32 %v4125_v20, %v4131_v53  ;;  %5186 = vmatmul.mubr.msk.f32.vlgmr.msra.gmra.mrb[56].mxu1 %vm1495_vm1, %v7613_v7  ;;  %v9302_v7 = vld [vmem:[#allocation116_spill] sm:$0xff]  ;;  %v9343_v20 = vld [vmem:[#allocation131_spill] sm:$0xff] }
 0xa86   : > { %5188 = vmatprep.mubr.msk.f32.mxu1 %vm1495_vm1, %v7637_v30  ;;  %5988 = vmatpush1.bf16.msra.mxu1 %v9182_v42  ;;  %v9303_v30 = vld [vmem:[#allocation87_spill] sm:$0xff] }
 0xa87   : > { %4767 = vmatmul.mubr.msk.f32.gmra.mrb[218].mxu0 %vm561_vm0, %v7736_v13  ;;  %v5981_v29 = vpack.c.bf16 %v4133_v37, %v4132_v55  ;;  %5990 = vmatprep.subr.bf16.mxu1 %v9183_v8  ;;  %v9309_v13 = vld [vmem:[#allocation120_spill] sm:$0xff]  ;;  %v9312_v42 = vld [vmem:[#allocation91_spill] sm:$0xff]  ;;  %v9313_v8 = vld [vmem:[#allocation122_spill] sm:$0xff] }
 0xa88   : > { %3980 = vmatprep.mubr.f32.mxu0 %v9065_v34  ;;  %v9345_v37 = vld [vmem:[#allocation133_spill] sm:$0xff] }
 0xa89   : > { %5189 = vmatmul.mubr.msk.f32.gmra.mrb[58].mxu1 %vm1495_vm1, %v7664_v44  ;;  %5982 = vmatprep.subr.bf16.mxu0 %v5981_v29  ;;  %v9304_v44 = vld [vmem:[#allocation115_spill] sm:$0xff] }
 0xa8a   : > { %5191 = vmatprep.mubr.msk.f32.mxu1 %vm1495_vm1, %v7696_v6  ;;  %5984 = vmatpush3.bf16.msra.mxu0 %v5981_v29  ;;  %v9306_v6 = vld [vmem:[#allocation88_spill] sm:$0xff] }
 0xa8b   : > { %4768 = vmatmul.mubr.msk.f32.gmra.mrb[220].mxu0 %vm561_vm0, %v7743_v38  ;;  %5992 = vmatpush1.bf16.msra.mxu1 %v9184_v56  ;;  %v9310_v38 = vld [vmem:[#allocation90_spill] sm:$0xff]  ;;  %v9314_v56 = vld [vmem:[#allocation92_spill] sm:$0xff] }
 0xa8c   : > { %3986 = vmatprep.mubr.f32.mxu0 %v9065_v34  ;;  %5994 = vmatprep.subr.bf16.mxu1 %v9185_v9  ;;  %v9305_v34 = vld [vmem:[#allocation117_spill] sm:$0xff]  ;;  %v9315_v9 = vld [vmem:[#allocation123_spill] sm:$0xff] }
 0xa8d   : > { %5192 = vmatmul.mubr.msk.f32.gmra.mrb[60].mxu1 %vm1495_vm1, %v7711_v48  ;;  %v9307_v48 = vld [vmem:[#allocation119_spill] sm:$0xff] }
 0xa8e   : > { %5194 = vmatprep.mubr.msk.f32.mxu1 %vm1495_vm1, %v9196_v17  ;;  %v9317_v17 = vld [vmem:[#allocation124_spill] sm:$0xff] }
 0xa8f   : > { %4769 = vmatmul.mubr.msk.f32.gmra.mrb[222].mxu0 %vm561_vm0, %v9197_v18  ;;  %5996 = vmatpush1.bf16.msra.mxu1 %v9186_v23  ;;  %v9316_v23 = vld [vmem:[#allocation93_spill] sm:$0xff]  ;;  %v9318_v18 = vld [vmem:[#allocation94_spill] sm:$0xff] }
 0xa90   : > { %5201 = vmatprep.mubr.msk.f32.mxu0 %vm1671_vm2, %v9302_v7  ;;  %5998 = vmatprep.subr.bf16.mxu1 %v9303_v30  ;;  %v9346_v30 = vld [vmem:[#allocation134_spill] sm:$0xff] }
 0xa91   : > { %5195 = vmatmul.mubr.msk.f32.gmra.mrb[62].mxu1 %vm1495_vm1, %v9304_v44 }
 0xa93   : > { %5202 = vmatmul.mubr.msk.f32.vlgmr.msra.gmra.mrb[224].mxu0 %vm1671_vm2, %v9305_v34  ;;  %6000 = vmatpush1.bf16.msra.mxu1 %v9306_v6  ;;  %v9347_v6 = vld [vmem:[#allocation135_spill] sm:$0xff] }
 0xa94   : > { %5204 = vmatprep.mubr.msk.f32.mxu0 %vm1671_vm2, %v9307_v48  ;;  %6002 = vmatprep.subr.bf16.mxu1 %v9308_v36 }
 0xa97   : > { %5205 = vmatmul.mubr.msk.f32.gmra.mrb[226].mxu0 %vm1671_vm2, %v9309_v13  ;;  %6004 = vmatpush1.bf16.msra.mxu1 %v9310_v38  ;;  %v9348_v13 = vld [vmem:[#allocation136_spill] sm:$0xff] }
 0xa98   : > { %5207 = vmatprep.mubr.msk.f32.mxu0 %vm1671_vm2, %v9311_v2  ;;  %6006 = vmatprep.subr.bf16.mxu1 %v9312_v42  ;;  %v9349_v42 = vld [vmem:[#allocation137_spill] sm:$0xff] }
 0xa9b   : > { %5208 = vmatmul.mubr.msk.f32.gmra.mrb[228].mxu0 %vm1671_vm2, %v9313_v8  ;;  %6008 = vmatpush1.bf16.msra.mxu1 %v9314_v56 }
 0xa9c   : > { %5210 = vmatprep.mubr.msk.f32.mxu0 %vm1671_vm2, %v9315_v9  ;;  %6010 = vmatprep.subr.bf16.mxu1 %v9316_v23  ;;  %v9350_v9 = vld [vmem:[#allocation138_spill] sm:$0xff] }
 0xa9f   : > { %5211 = vmatmul.mubr.msk.f32.gmra.mrb[230].mxu0 %vm1671_vm2, %v9317_v17  ;;  %6012 = vmatpush1.bf16.msra.mxu1 %v9318_v18  ;;  %v9351_v18 = vld [vmem:[#allocation139_spill] sm:$0xff] }
 0xaa0   : > { %6014 = vmatprep.subr.bf16.mxu1 %v9319_v12 }
 0xaa3   : > { %6016 = vmatpush1.bf16.msra.mxu1 %v9320_v47 }
 0xaa4   : > { %6018 = vmatprep.subr.bf16.mxu1 %v9321_v5  ;;  %v9352_v5 = vld [vmem:[#allocation140_spill] sm:$0xff] }
 0xaa7   : > { %6020 = vmatpush1.bf16.msra.mxu1 %v9322_v59 }
 0xaa8   : > { %6022 = vmatprep.subr.bf16.mxu1 %v9323_v4 }
 0xaab   : > { %6024 = vmatpush1.bf16.msra.mxu1 %v9324_v49  ;;  %v9353_v49 = vld [vmem:[#allocation141_spill] sm:$0xff] }
 0xaac   : > { %6026 = vmatprep.subr.bf16.mxu1 %v9325_v22  ;;  %v9354_v22 = vld [vmem:[#allocation142_spill] sm:$0xff] }
 0xaaf   : > { %6028 = vmatpush1.bf16.msra.mxu1 %v9326_v11 }
 0xab0   : > { %6030 = vmatprep.subr.bf16.mxu1 %v9327_v21 }
 0xab3   : > { %6032 = vmatpush1.bf16.msra.mxu1 %v9328_v33  ;;  %v9355_v33 = vld [vmem:[#allocation143_spill] sm:$0xff] }
 0xab4   : > { %6034 = vmatprep.subr.bf16.mxu1 %v9329_v51  ;;  %v9356_v51 = vld [vmem:[#allocation144_spill] sm:$0xff] }
 0xab7   : > { %6036 = vmatpush1.bf16.msra.mxu1 %v9330_v32 }
 0xab8   : > { %6038 = vmatprep.subr.bf16.mxu1 %v9331_v45 }
 0xabb   : > { %6040 = vmatpush1.bf16.msra.mxu1 %v9332_v54  ;;  %v9357_v54 = vld [vmem:[#allocation145_spill] sm:$0xff] }
 0xabc   : > { %6042 = vmatprep.subr.bf16.mxu1 %v9333_v28  ;;  %v9358_v28 = vld [vmem:[#allocation146_spill] sm:$0xff] }
 0xabf   : > { %6044 = vmatpush1.bf16.msra.mxu1 %v9334_v0 }
 0xac0   : > { %6046 = vmatprep.subr.bf16.mxu1 %v9335_v41 }
 0xac3   : > { %6048 = vmatpush1.bf16.msra.mxu1 %v9336_v14  ;;  %v9359_v14 = vld [vmem:[#allocation147_spill] sm:$0xff] }
 0xac4   : > { %6050 = vmatprep.subr.bf16.mxu1 %v9337_v63 }
 0xb46   : > { %v3946_v35 = vpop.f32.mrb[208].mxu0 }
 0xb47   : > { %v3948_v60 = vpop.f32.mrb[209].mxu0 }
 0xb48   : > { %4303 = vmatprep.mubr.f32.mxu1 %v3948_v60 }
 0xb49   : > { %4304 = vmatmul.mubr.f32.vlgmr.msra.gmra.mrb[64].mxu1 %v3946_v35 }
 0xb4a   : > { %6052 = vmatpush1.bf16.msra.mxu1 %v9338_v24  ;;  %v3952_v26 = vpop.f32.mrb[210].mxu0 }
 0xb4b   : > { %v3954_v46 = vpop.f32.mrb[211].mxu0  ;;  %6054 = vmatprep.subr.bf16.mxu1 %v9339_v10 }
 0xb4c   : > { %4309 = vmatprep.mubr.f32.mxu1 %v3954_v46 }
 0xb4d   : > { %4310 = vmatmul.mubr.f32.gmra.mrb[66].mxu1 %v3952_v26 }
 0xb4e   : > { %6056 = vmatpush1.bf16.msra.mxu1 %v9340_v50  ;;  %v3958_v52 = vpop.f32.mrb[212].mxu0 }
 0xb4f   : > { %v3960_v25 = vpop.f32.mrb[213].mxu0  ;;  %6058 = vmatprep.subr.bf16.mxu1 %v9341_v16 }
 0xb50   : > { %4315 = vmatprep.mubr.f32.mxu1 %v3960_v25 }
 0xb51   : > { %4316 = vmatmul.mubr.f32.gmra.mrb[68].mxu1 %v3958_v52 }
 0xb52   : > { %6060 = vmatpush1.bf16.msra.mxu1 %v9342_v43  ;;  %v3964_v40 = vpop.f32.mrb[214].mxu0 }
 0xb53   : > { %v3966_v61 = vpop.f32.mrb[215].mxu0  ;;  %6062 = vmatprep.subr.bf16.mxu1 %v9343_v20 }
 0xb54   : > { %4321 = vmatprep.mubr.f32.mxu1 %v3966_v61 }
 0xb55   : > { %4322 = vmatmul.mubr.f32.gmra.mrb[70].mxu1 %v3964_v40 }
 0xb56   : > { %6064 = vmatpush1.bf16.msra.mxu1 %v9344_v15  ;;  %v3970_v55 = vpop.f32.mrb[216].mxu0 }
 0xb57   : > { %v3972_v53 = vpop.f32.mrb[217].mxu0  ;;  %6066 = vmatprep.subr.bf16.mxu1 %v9345_v37 }
 0xb58   : > { %v5187_v29 = vpop.f32.mrb[56].mxu1  ;;  %4327 = vmatprep.mubr.f32.mxu1 %v3972_v53 }
 0xb59   : > { %v4083_v7 = vpop.f32.mrb[57].mxu1  ;;  %4328 = vmatmul.mubr.f32.gmra.mrb[72].mxu1 %v3970_v55 }
 0xb5a   : > { %6068 = vmatpush1.bf16.msra.mxu1 %v9346_v30  ;;  %v3976_v44 = vpop.f32.mrb[218].mxu0 }
 0xb5b   : > { %v3978_v34 = vpop.f32.mrb[219].mxu0  ;;  %6070 = vmatprep.subr.bf16.mxu1 %v9347_v6 }
 0xb5c   : > { %v5190_v48 = vpop.f32.mrb[58].mxu1  ;;  %4333 = vmatprep.mubr.f32.mxu1 %v3978_v34 }
 0xb5d   : > { %v4093_v36 = vpop.f32.mrb[59].mxu1  ;;  %4334 = vmatmul.mubr.f32.gmra.mrb[74].mxu1 %v3976_v44 }
 0xb5e   : > { %6072 = vmatpush1.bf16.msra.mxu1 %v9348_v13  ;;  %v3982_v38 = vpop.f32.mrb[220].mxu0 }
 0xb5f   : > { %v3984_v2 = vpop.f32.mrb[221].mxu0  ;;  %6074 = vmatprep.subr.bf16.mxu1 %v9349_v42 }
 0xb60   : > { %v5193_v8 = vpop.f32.mrb[60].mxu1  ;;  %4339 = vmatprep.mubr.f32.mxu1 %v3984_v2 }
 0xb61   : > { %v4103_v56 = vpop.f32.mrb[61].mxu1  ;;  %4340 = vmatmul.mubr.f32.gmra.mrb[76].mxu1 %v3982_v38 }
 0xb62   : > { %6076 = vmatpush1.bf16.msra.mxu1 %v9350_v9  ;;  %v3988_v23 = vpop.f32.mrb[222].mxu0 }
 0xb63   : > { %v3990_v17 = vpop.f32.mrb[223].mxu0  ;;  %6078 = vmatprep.subr.bf16.mxu1 %v9351_v18 }
 0xb64   : > { %v5196_v12 = vpop.f32.mrb[62].mxu1  ;;  %4345 = vmatprep.mubr.f32.mxu1 %v3990_v17 }
 0xb65   : > { %v4113_v47 = vpop.f32.mrb[63].mxu1  ;;  %4346 = vmatmul.mubr.f32.gmra.mrb[78].mxu1 %v3988_v23 }
 0xb66   : > { %6080 = vmatpush1.bf16.msra.mxu1 %v9352_v5  ;;  %v5203_v59 = vpop.f32.mrb[224].mxu0 }
 0xb67   : > { %v4200_v4 = vpop.f32.mrb[225].mxu0  ;;  %6082 = vmatprep.subr.bf16.mxu1 %v9353_v49 }
 0xb68   : > { %4416 = vmatprep.mubr.f32.mxu1 %v4200_v4 }
 0xb6a   : > { %6084 = vmatpush1.bf16.msra.mxu1 %v9354_v22  ;;  %v5206_v11 = vpop.f32.mrb[226].mxu0 }
 0xb6b   : > { %v4210_v21 = vpop.f32.mrb[227].mxu0  ;;  %6086 = vmatprep.subr.bf16.mxu1 %v9355_v33 }
 0xb6e   : > { %6088 = vmatpush1.bf16.msra.mxu1 %v9356_v51  ;;  %v5209_v32 = vpop.f32.mrb[228].mxu0 }
 0xb6f   : > { %v4220_v45 = vpop.f32.mrb[229].mxu0  ;;  %6090 = vmatprep.subr.bf16.mxu1 %v9357_v54 }
 0xb72   : > { %6092 = vmatpush1.bf16.msra.mxu1 %v9358_v28  ;;  %v5212_v0 = vpop.f32.mrb[230].mxu0 }
 0xb73   : > { %v4230_v41 = vpop.f32.mrb[231].mxu0  ;;  %6094 = vmatprep.subr.bf16.mxu1 %v9359_v14 }
 0xb76   : > { %6096 = vmatpush1.bf16.msra.mxu1 %v9247_v31 }
 0xb77   : > { %6098 = vmatprep.subr.bf16.mxu1 %v9248_v39 }
 0xb7a   : > { %6100 = vmatpush1.bf16.msra.mxu1 %v9249_v3 }
 0xb7b   : > { %6102 = vmatprep.subr.bf16.mxu1 %v9250_v19 }
 0xb7e   : > { %6104 = vmatpush1.bf16.msra.mxu1 %v9251_v1 }
 0xb7f   : > { %6106 = vmatprep.subr.bf16.mxu1 %v9252_v62 }
 0xb82   : > { %6108 = vmatpush1.bf16.msra.mxu1 %v9253_v27 }
 0xb83   : > { %6110 = vmatprep.subr.bf16.mxu1 %v9254_v58 }
 0xb86   : > { %6112 = vmatpush1.bf16.msra.mxu1 %v9255_v57 }
 0xb89   : > { %4417 = vmatmul.mubr.f32.vlgmr.msra.gmra.mrb[64].mxu1 %v4083_v7 }
 0xb8a   : > { %4422 = vmatprep.mubr.f32.mxu1 %v5203_v59 }
 0xb8d   : > { %4423 = vmatmul.mubr.f32.gmra.mrb[66].mxu1 %v5187_v29 }
 0xb8e   : > { %4428 = vmatprep.mubr.f32.mxu1 %v4210_v21 }
 0xb91   : > { %4429 = vmatmul.mubr.f32.gmra.mrb[68].mxu1 %v4093_v36 }
 0xb92   : > { %4434 = vmatprep.mubr.f32.mxu1 %v5206_v11 }
 0xb95   : > { %4435 = vmatmul.mubr.f32.gmra.mrb[70].mxu1 %v5190_v48 }
 0xb96   : > { %4440 = vmatprep.mubr.f32.mxu1 %v4220_v45 }
 0xb99   : > { %4441 = vmatmul.mubr.f32.gmra.mrb[72].mxu1 %v4103_v56 }
 0xb9a   : > { %4446 = vmatprep.mubr.f32.mxu1 %v5209_v32 }
 0xb9d   : > { %4447 = vmatmul.mubr.f32.gmra.mrb[74].mxu1 %v5193_v8 }
 0xb9e   : > { %4452 = vmatprep.mubr.f32.mxu1 %v4230_v41 }
 0xba1   : > { %4453 = vmatmul.mubr.f32.gmra.mrb[76].mxu1 %v4113_v47 }
 0xba2   : > { %4458 = vmatprep.mubr.f32.mxu1 %v5212_v0 }
 0xba5   : > { %4459 = vmatmul.mubr.f32.gmra.mrb[78].mxu1 %v5196_v12 }
 0xc5c   : > { %v4418_v1 = vpop.f32.mrb[64].mxu1 }
 0xc5d   : > { %4465 = vst [vmem:[%s8654_s17] sm:$0xff] %v4418_v1  ;;  %v4420_v62 = vpop.f32.mrb[65].mxu1 }
 0xc5e   : > { %4466 = vst [vmem:[%s8654_s17 + $0x8] sm:$0xff] %v4420_v62 }
 0xc60   : > { %v4424_v57 = vpop.f32.mrb[66].mxu1 }
 0xc61   : > { %4467 = vst [vmem:[%s8654_s17 + $0x10] sm:$0xff] %v4424_v57  ;;  %v4426_v3 = vpop.f32.mrb[67].mxu1 }
 0xc62   : > { %4468 = vst [vmem:[%s8654_s17 + $0x18] sm:$0xff] %v4426_v3 }
 0xc64   : > { %v4430_v39 = vpop.f32.mrb[68].mxu1  ;;  %v4503_v50 = vld [vmem:[%s8654_s17] sm:$0xff] (%p9361_p9) }
 0xc65   : > { %4469 = vst [vmem:[%s8654_s17 + $0x20] sm:$0xff] %v4430_v39  ;;  %v4432_v31 = vpop.f32.mrb[69].mxu1  ;;  %v4505_v52 = vld [vmem:[%s8654_s17 + $0x8] sm:$0xff] (%p9361_p9)  ;;  %4504 = vst [vmem:[%s4490_s30] sm:$0xff] (%p9361_p9), %v4503_v50 }
 0xc66   : > { %4470 = vst [vmem:[%s8654_s17 + $0x28] sm:$0xff] %v4432_v31  ;;  %4506 = vst [vmem:[%s4490_s30 + $0x8] sm:$0xff] (%p9361_p9), %v4505_v52 }
 0xc68   : > { %v4436_v19 = vpop.f32.mrb[70].mxu1  ;;  %v4507_v25 = vld [vmem:[%s8654_s17 + $0x10] sm:$0xff] (%p9361_p9) }
 0xc69   : > { %4471 = vst [vmem:[%s8654_s17 + $0x30] sm:$0xff] %v4436_v19  ;;  %v4438_v58 = vpop.f32.mrb[71].mxu1  ;;  %v4509_v16 = vld [vmem:[%s8654_s17 + $0x18] sm:$0xff] (%p9361_p9)  ;;  %4508 = vst [vmem:[%s4490_s30 + $0x20] sm:$0xff] (%p9361_p9), %v4507_v25 }
 0xc6a   : > { %4472 = vst [vmem:[%s8654_s17 + $0x38] sm:$0xff] %v4438_v58  ;;  %4510 = vst [vmem:[%s4490_s30 + $0x28] sm:$0xff] (%p9361_p9), %v4509_v16 }
 0xc6c   : > { %v4442_v27 = vpop.f32.mrb[72].mxu1  ;;  %v4511_v43 = vld [vmem:[%s8654_s17 + $0x20] sm:$0xff] (%p9361_p9) }
 0xc6d   : > { %4473 = vst [vmem:[%s8654_s17 + $0x40] sm:$0xff] %v4442_v27  ;;  %v4444_v63 = vpop.f32.mrb[73].mxu1  ;;  %v4513_v40 = vld [vmem:[%s8654_s17 + $0x28] sm:$0xff] (%p9361_p9)  ;;  %4512 = vst [vmem:[%s4490_s30 + $0x40] sm:$0xff] (%p9361_p9), %v4511_v43 }
 0xc6e   : > { %4474 = vst [vmem:[%s8654_s17 + $0x48] sm:$0xff] %v4444_v63  ;;  %4514 = vst [vmem:[%s4490_s30 + $0x48] sm:$0xff] (%p9361_p9), %v4513_v40 }
 0xc70   : > { %v4448_v35 = vpop.f32.mrb[74].mxu1  ;;  %v4515_v61 = vld [vmem:[%s8654_s17 + $0x30] sm:$0xff] (%p9361_p9) }
 0xc71   : > { %4475 = vst [vmem:[%s8654_s17 + $0x50] sm:$0xff] %v4448_v35  ;;  %v4450_v60 = vpop.f32.mrb[75].mxu1  ;;  %v4517_v20 = vld [vmem:[%s8654_s17 + $0x38] sm:$0xff] (%p9361_p9)  ;;  %4516 = vst [vmem:[%s4490_s30 + $0x60] sm:$0xff] (%p9361_p9), %v4515_v61 }
 0xc72   : > { %4476 = vst [vmem:[%s8654_s17 + $0x58] sm:$0xff] %v4450_v60  ;;  %4518 = vst [vmem:[%s4490_s30 + $0x68] sm:$0xff] (%p9361_p9), %v4517_v20 }
 0xc74   : > { %v4454_v24 = vpop.f32.mrb[76].mxu1  ;;  %4487 = sbr.rel (!%p9361_p9) target bundleno = 3203 (0xc83), region = 107  ;;  %v4519_v15 = vld [vmem:[%s8654_s17 + $0x40] sm:$0xff] (%p9361_p9) }
 0xc75   : > { %4477 = vst [vmem:[%s8654_s17 + $0x60] sm:$0xff] %v4454_v24  ;;  %v4456_v26 = vpop.f32.mrb[77].mxu1  ;;  %4520 = vst [vmem:[%s4490_s30 + $0x80] sm:$0xff] (%p9361_p9), %v4519_v15  ;;  %v4521_v55 = vld [vmem:[%s8654_s17 + $0x48] sm:$0xff] (%p9361_p9) }
 0xc76   : > { %4478 = vst [vmem:[%s8654_s17 + $0x68] sm:$0xff] %v4456_v26  ;;  %4522 = vst [vmem:[%s4490_s30 + $0x88] sm:$0xff] (%p9361_p9), %v4521_v55 }
 0xc78   : > { %v4460_v46 = vpop.f32.mrb[78].mxu1  ;;  %v4523_v53 = vld [vmem:[%s8654_s17 + $0x50] sm:$0xff] (%p9361_p9) }
 0xc79   : > { %4479 = vst [vmem:[%s8654_s17 + $0x70] sm:$0xff] %v4460_v46  ;;  %v4462_v10 = vpop.f32.mrb[79].mxu1  ;;  %v4525_v37 = vld [vmem:[%s8654_s17 + $0x58] sm:$0xff] (%p9361_p9)  ;;  %4524 = vst [vmem:[%s4490_s30 + $0xa0] sm:$0xff] (%p9361_p9), %v4523_v53 }
 0xc7a   : > { %4480 = vst [vmem:[%s8654_s17 + $0x78] sm:$0xff] %v4462_v10  ;;  %4526 = vst [vmem:[%s4490_s30 + $0xa8] sm:$0xff] (%p9361_p9), %v4525_v37 }
 0xc7c   : > { %v4527_v29 = vld [vmem:[%s8654_s17 + $0x60] sm:$0xff] }
 0xc7d   : > { %v4529_v7 = vld [vmem:[%s8654_s17 + $0x68] sm:$0xff]  ;;  %4528 = vst [vmem:[%s4490_s30 + $0xc0] sm:$0xff] %v4527_v29 }
 0xc7e   : > { %4530 = vst [vmem:[%s4490_s30 + $0xc8] sm:$0xff] %v4529_v7 }
 0xc80   : > { %v4531_v30 = vld [vmem:[%s8654_s17 + $0x70] sm:$0xff] }
 0xc81   : > { %4532 = vst [vmem:[%s4490_s30 + $0xe0] sm:$0xff] %v4531_v30  ;;  %v4533_v44 = vld [vmem:[%s8654_s17 + $0x78] sm:$0xff] }
 0xc82   : > { %4534 = vst [vmem:[%s4490_s30 + $0xe8] sm:$0xff] %v4533_v44 }
 0xc83 PF: > { %s9363_s15 = sld [smem:[#allocation17_spill]]  ;;  %s9364_s16 = sld [smem:[#allocation18_spill]] }
 0xc84   : > { %s9365_s13 = smov %s6506_s14 }
 0xc89   : > { %p21_p0 = scmp.ge.s32.totalorder %s9363_s15, 4   ;;  %s9366_s14 = smov %s9364_s16 }
 0xc8b   :  { %23 = sbr.rel (!%p21_p0) target bundleno = 10 (0xa), region = 163 }
 0xc92   :  { %4550 = vsyncpa [#allocation3], 1 }
 0xc93   :  { %4552 = vsyncpa [#allocation3 + $0x1], 1 }
 0xc94   :  { %4553 = vsyncpa [#allocation8], 1 }
 0xc95   :  { %4554 = vsyncpa [#allocation11], 1 }
 0xc96   :  { %4555 = vsyncpa [#allocation4], 1 }
 0xc97   :  { %4557 = vsyncpa [#allocation4 + $0x1], 1 }

</bundles_post_ra>
